<compile_context>
chip_gen: v7x
topology: tpu7x:2x2x1
jax: 0.10.0
libtpu: 0.0.40
codegen_flags: <defaults>
</compile_context>

<pallas_src>
import functools

import jax
import jax.numpy as jnp
from jax.experimental import pallas as pl
from jax.experimental.pallas import tpu as pltpu


def _round_up(x, m):
    return (x + m - 1) // m * m


def _conv_stats_kernel(x_ref, w_ref, y_ref, sum_ref, m2_ref, *,
                       k, stride, dilation, ho, wo):
    """Direct conv for one image (in-kernel tap accumulation) + BN partials.

    x_ref   : (1, Hp, Wp, Cin)   bf16  one zero-padded NHWC image
    w_ref   : (k*k, Cin, CP)     bf16  per-tap weights, Cout zero-padded to CP
    y_ref   : (1, Ho*Wo, CP)     bf16  raw conv output (flattened spatial)
    sum_ref : (1, 1, CP)         f32   per-image sum over rows
    m2_ref  : (1, 1, CP)         f32   per-image sum of squared deviations
    """
    hw = ho * wo
    cp = w_ref.shape[-1]
    cin = x_ref.shape[-1]

    acc = jnp.zeros((hw, cp), jnp.float32)
    for i in range(k):                       # static, unrolled: k*k taps
        for j in range(k):
            hs, ws = i * dilation, j * dilation
            if stride == 1:
                patch = x_ref[0, hs:hs + ho, ws:ws + wo, :]        # (ho, wo, cin)
            else:
                patch = x_ref[0, pl.ds(hs, ho, stride),
                              pl.ds(ws, wo, stride), :]
            lhs = patch.reshape(hw, cin)                           # (hw, cin)
            acc = acc + jnp.dot(lhs, w_ref[i * k + j],
                                preferred_element_type=jnp.float32)

    # bf16 intermediate store; statistics taken from the f32 accumulator.
    y_ref[0] = acc.astype(y_ref.dtype)

    s = jnp.sum(acc, axis=0, keepdims=True)          # (1, CP)
    mu = s * (1.0 / hw)
    d = acc - mu                                      # mean-shifted partials
    sum_ref[0] = s
    m2_ref[0] = jnp.sum(d * d, axis=0, keepdims=True)


def _bn_relu_kernel(y_ref, scale_ref, shift_ref, o_ref):
    """Pure lane-dense epilogue: o = max(y * scale + shift, 0).

    y_ref     : (1, Ho*Wo, CP) bf16
    scale_ref : (1, CP)        f32   gamma * rsqrt(var + eps)
    shift_ref : (1, CP)        f32   beta - mean * scale
    o_ref     : (1, Ho*Wo, CP) f32
    """
    y = y_ref[0].astype(jnp.float32)
    o_ref[0] = jnp.maximum(y * scale_ref[...] + shift_ref[...], 0.0)


def conv_bn_relu(x_nchw, weight_oihw, gamma, beta, *, stride=1, pad=1,
                 dilation=1, eps=1e-5):
    """ConvBnReLU forward. x_nchw: (N, Cin, H, W); weight_oihw: (Cout, Cin, K, K)."""
    n, cin, h, w = x_nchw.shape
    cout, cin_w, kh, kw = weight_oihw.shape
    assert cin == cin_w and kh == kw
    k = kh
    ho = (h + 2 * pad - dilation * (k - 1) - 1) // stride + 1
    wo = (w + 2 * pad - dilation * (k - 1) - 1) // stride + 1
    hw = ho * wo
    m = n * hw
    hp, wp = h + 2 * pad, w + 2 * pad
    cp = _round_up(cout, 128)        # lane-dense output channels

    # ---- wrapper: layout glue only (no im2col) -------------------------------
    x_nhwc = jnp.transpose(x_nchw, (0, 2, 3, 1)).astype(jnp.bfloat16)
    x_p = jnp.pad(x_nhwc, ((0, 0), (pad, pad), (pad, pad), (0, 0)))

    # (Cout, Cin, K, K) -> (K*K, Cin, CP), tap-major, Cout zero-padded.
    w_taps = jnp.transpose(weight_oihw, (2, 3, 1, 0)).reshape(k * k, cin, cout)
    w_p = jnp.zeros((k * k, cin, cp), jnp.bfloat16).at[:, :, :cout].set(
        w_taps.astype(jnp.bfloat16))

    cparams = pltpu.CompilerParams(dimension_semantics=("parallel",))

    # ---- kernel 1: direct conv (tap accumulation) + per-image BN partials ----
    kernel1 = functools.partial(_conv_stats_kernel, k=k, stride=stride,
                                dilation=dilation, ho=ho, wo=wo)
    y_bf16, psum, pm2 = pl.pallas_call(
        kernel1,
        out_shape=(jax.ShapeDtypeStruct((n, hw, cp), jnp.bfloat16),
                   jax.ShapeDtypeStruct((n, 1, cp), jnp.float32),
                   jax.ShapeDtypeStruct((n, 1, cp), jnp.float32)),
        grid=(n,),
        in_specs=[pl.BlockSpec((1, hp, wp, cin), lambda i: (i, 0, 0, 0)),
                  pl.BlockSpec((k * k, cin, cp), lambda i: (0, 0, 0))],
        out_specs=(pl.BlockSpec((1, hw, cp), lambda i: (i, 0, 0)),
                   pl.BlockSpec((1, 1, cp), lambda i: (i, 0, 0)),
                   pl.BlockSpec((1, 1, cp), lambda i: (i, 0, 0))),
        compiler_params=cparams,
    )(x_p, w_p)

    # ---- hoisted global-statistics reduction (tiny, plain JAX) ---------------
    # Chan's parallel-variance combination of the per-image (count, sum, M2).
    tile_sum = psum[:, 0, :]                              # (N, CP)
    tile_m2 = pm2[:, 0, :]                                # (N, CP)
    tile_mean = tile_sum / float(hw)
    g_mean = jnp.sum(tile_sum, axis=0) / float(m)         # (CP,)
    g_m2 = (jnp.sum(tile_m2, axis=0)
            + float(hw) * jnp.sum((tile_mean - g_mean[None, :]) ** 2, axis=0))
    var = g_m2 / float(m)                                 # biased, torch BN train

    gamma_p = jnp.zeros((cp,), jnp.float32).at[:cout].set(gamma.astype(jnp.float32))
    beta_p = jnp.zeros((cp,), jnp.float32).at[:cout].set(beta.astype(jnp.float32))
    inv = jax.lax.rsqrt(var + eps)
    scale = (gamma_p * inv).reshape(1, cp)
    shift = (beta_p - g_mean * gamma_p * inv).reshape(1, cp)

    # ---- kernel 2: fused scale/shift + ReLU (pure FMA + max epilogue) --------
    out_flat = pl.pallas_call(
        _bn_relu_kernel,
        out_shape=jax.ShapeDtypeStruct((n, hw, cp), jnp.float32),
        grid=(n,),
        in_specs=[pl.BlockSpec((1, hw, cp), lambda i: (i, 0, 0)),
                  pl.BlockSpec((1, cp), lambda i: (0, 0)),
                  pl.BlockSpec((1, cp), lambda i: (0, 0))],
        out_specs=pl.BlockSpec((1, hw, cp), lambda i: (i, 0, 0)),
        compiler_params=cparams,
    )(y_bf16, scale, shift)

    # Module contract: f32 NCHW.  (Downstream consumers that accept bf16/NHWC
    # could skip this transpose and the f32 cast for extra HBM savings.)
    out = out_flat[:, :, :cout].reshape(n, ho, wo, cout)
    return jnp.transpose(out, (0, 3, 1, 2))


def _reference(x, w, gamma, beta, *, stride=1, pad=1, dilation=1, eps=1e-5):
    """Plain-JAX reference: Conv2d(bias=False) + BatchNorm2d(train) + ReLU.

    Conv operands are quantized to bf16 (matching the MXU contract); the BN /
    ReLU path is f32.  The kernel additionally stores its conv intermediate in
    bf16, which is accounted for by the comparison tolerance below.
    """
    xq = x.astype(jnp.bfloat16).astype(jnp.float32)
    wq = w.astype(jnp.bfloat16).astype(jnp.float32)
    y = jax.lax.conv_general_dilated(
        xq, wq, window_strides=(stride, stride),
        padding=[(pad, pad), (pad, pad)],
        rhs_dilation=(dilation, dilation),
        dimension_numbers=("NCHW", "OIHW", "NCHW"))
    mean = jnp.mean(y, axis=(0, 2, 3), keepdims=True)
    var = jnp.mean((y - mean) ** 2, axis=(0, 2, 3), keepdims=True)
    yn = ((y - mean) * jax.lax.rsqrt(var + eps) * gamma.reshape(1, -1, 1, 1)
          + beta.reshape(1, -1, 1, 1))
    return jnp.maximum(yn, 0.0)


if __name__ == "__main__":
    key = jax.random.PRNGKey(0)
    kx, kw, kg, kb = jax.random.split(key, 4)

    n, cin, h, w = 2, 4, 16, 16
    cout, ksize = 8, 3

    x = jax.random.normal(kx, (n, cin, h, w), jnp.float32)
    weight = 0.1 * jax.random.normal(kw, (cout, cin, ksize, ksize), jnp.float32)
    gamma = 1.0 + 0.1 * jax.random.normal(kg, (cout,), jnp.float32)
    beta = 0.1 * jax.random.normal(kb, (cout,), jnp.float32)

    out = conv_bn_relu(x, weight, gamma, beta, stride=1, pad=1)
    out = jax.block_until_ready(out)

    ref = _reference(x, weight, gamma, beta, stride=1, pad=1)
    assert out.shape == (n, cout, h, w), out.shape
    err = float(jnp.max(jnp.abs(out - ref)))
    # bf16 MXU operands + bf16 conv intermediate (f32 stats / epilogue) give
    # ~1e-2-level worst-case absolute error on the normalized output.
    assert err < 3e-2, err

    # TODO(synk): BatchNorm running_mean/running_var buffer updates (training
    # bookkeeping) are not modeled; they do not affect the forward output.
    print("KERNEL_OK")
</pallas_src>

<mosaic_0001>
module attributes {stable_mosaic.version = 11 : i64} {
  func.func @_conv_stats_kernel(%arg0: i32, %arg1: memref<1x18x18x4xbf16, #tpu.memory_space<vmem>>, %arg2: memref<9x4x128xbf16, #tpu.memory_space<vmem>>, %arg3: memref<1x256x128xbf16, #tpu.memory_space<vmem>>, %arg4: memref<1x1x128xf32, #tpu.memory_space<vmem>>, %arg5: memref<1x1x128xf32, #tpu.memory_space<vmem>>) attributes {dimension_semantics = [#tpu.dimension_semantics<parallel>], iteration_bounds = array<i64: 2>, scalar_prefetch = 0 : i64, scratch_operands = 0 : i64, tpu.core_type = #tpu.core_type<tc>, window_params = [{transform_indices = @transform_0, window_bounds = array<i64: 1, 18, 18, 4>}, {pipeline_mode = #tpu.pipeline_mode<synchronous>, transform_indices = @transform_1, window_bounds = array<i64: 9, 4, 128>}, {transform_indices = @transform_2, window_bounds = array<i64: 1, 256, 128>}, {transform_indices = @transform_3, window_bounds = array<i64: 1, 1, 128>}, {transform_indices = @transform_4, window_bounds = array<i64: 1, 1, 128>}]} {
    %cst = arith.constant 0.000000e+00 : f32
    %0 = vector.broadcast %cst : f32 to vector<256x128xf32>
    %c0 = arith.constant 0 : index
    %c0_0 = arith.constant 0 : index
    %c0_1 = arith.constant 0 : index
    %c0_2 = arith.constant 0 : index
    %1 = vector.load %arg1[%c0, %c0_0, %c0_1, %c0_2] : memref<1x18x18x4xbf16, #tpu.memory_space<vmem>>, vector<1x16x16x4xbf16>
    %2 = vector.shape_cast %1 : vector<1x16x16x4xbf16> to vector<16x16x4xbf16>
    %3 = vector.shape_cast %2 : vector<16x16x4xbf16> to vector<256x4xbf16>
    %c0_3 = arith.constant 0 : index
    %c0_4 = arith.constant 0 : index
    %c0_5 = arith.constant 0 : index
    %4 = vector.load %arg2[%c0_3, %c0_4, %c0_5] : memref<9x4x128xbf16, #tpu.memory_space<vmem>>, vector<1x4x128xbf16>
    %5 = vector.shape_cast %4 : vector<1x4x128xbf16> to vector<4x128xbf16>
    %cst_6 = arith.constant dense<0.000000e+00> : vector<256x128xf32>
    %6 = tpu.matmul %3, %5, %cst_6 {dimension_numbers = #tpu.dot_dimension_numbers<[1], [0], [0], [1], [0, 0, 1, 1], [], []>} : vector<256x4xbf16>, vector<4x128xbf16>, vector<256x128xf32> -> vector<256x128xf32>
    %7 = arith.addf %0, %6 : vector<256x128xf32>
    %c0_7 = arith.constant 0 : index
    %c0_8 = arith.constant 0 : index
    %c1 = arith.constant 1 : index
    %c0_9 = arith.constant 0 : index
    %8 = vector.load %arg1[%c0_7, %c0_8, %c1, %c0_9] : memref<1x18x18x4xbf16, #tpu.memory_space<vmem>>, vector<1x16x16x4xbf16>
    %9 = vector.shape_cast %8 : vector<1x16x16x4xbf16> to vector<16x16x4xbf16>
    %10 = vector.shape_cast %9 : vector<16x16x4xbf16> to vector<256x4xbf16>
    %c1_10 = arith.constant 1 : index
    %c0_11 = arith.constant 0 : index
    %c0_12 = arith.constant 0 : index
    %11 = vector.load %arg2[%c1_10, %c0_11, %c0_12] : memref<9x4x128xbf16, #tpu.memory_space<vmem>>, vector<1x4x128xbf16>
    %12 = vector.shape_cast %11 : vector<1x4x128xbf16> to vector<4x128xbf16>
    %cst_13 = arith.constant dense<0.000000e+00> : vector<256x128xf32>
    %13 = tpu.matmul %10, %12, %cst_13 {dimension_numbers = #tpu.dot_dimension_numbers<[1], [0], [0], [1], [0, 0, 1, 1], [], []>} : vector<256x4xbf16>, vector<4x128xbf16>, vector<256x128xf32> -> vector<256x128xf32>
    %14 = arith.addf %7, %13 : vector<256x128xf32>
    %c0_14 = arith.constant 0 : index
    %c0_15 = arith.constant 0 : index
    %c2 = arith.constant 2 : index
    %c0_16 = arith.constant 0 : index
    %15 = vector.load %arg1[%c0_14, %c0_15, %c2, %c0_16] : memref<1x18x18x4xbf16, #tpu.memory_space<vmem>>, vector<1x16x16x4xbf16>
    %16 = vector.shape_cast %15 : vector<1x16x16x4xbf16> to vector<16x16x4xbf16>
    %17 = vector.shape_cast %16 : vector<16x16x4xbf16> to vector<256x4xbf16>
    %c2_17 = arith.constant 2 : index
    %c0_18 = arith.constant 0 : index
    %c0_19 = arith.constant 0 : index
    %18 = vector.load %arg2[%c2_17, %c0_18, %c0_19] : memref<9x4x128xbf16, #tpu.memory_space<vmem>>, vector<1x4x128xbf16>
    %19 = vector.shape_cast %18 : vector<1x4x128xbf16> to vector<4x128xbf16>
    %cst_20 = arith.constant dense<0.000000e+00> : vector<256x128xf32>
    %20 = tpu.matmul %17, %19, %cst_20 {dimension_numbers = #tpu.dot_dimension_numbers<[1], [0], [0], [1], [0, 0, 1, 1], [], []>} : vector<256x4xbf16>, vector<4x128xbf16>, vector<256x128xf32> -> vector<256x128xf32>
    %21 = arith.addf %14, %20 : vector<256x128xf32>
    %c0_21 = arith.constant 0 : index
    %c1_22 = arith.constant 1 : index
    %c0_23 = arith.constant 0 : index
    %c0_24 = arith.constant 0 : index
    %22 = vector.load %arg1[%c0_21, %c1_22, %c0_23, %c0_24] : memref<1x18x18x4xbf16, #tpu.memory_space<vmem>>, vector<1x16x16x4xbf16>
    %23 = vector.shape_cast %22 : vector<1x16x16x4xbf16> to vector<16x16x4xbf16>
    %24 = vector.shape_cast %23 : vector<16x16x4xbf16> to vector<256x4xbf16>
    %c3 = arith.constant 3 : index
    %c0_25 = arith.constant 0 : index
    %c0_26 = arith.constant 0 : index
    %25 = vector.load %arg2[%c3, %c0_25, %c0_26] : memref<9x4x128xbf16, #tpu.memory_space<vmem>>, vector<1x4x128xbf16>
    %26 = vector.shape_cast %25 : vector<1x4x128xbf16> to vector<4x128xbf16>
    %cst_27 = arith.constant dense<0.000000e+00> : vector<256x128xf32>
    %27 = tpu.matmul %24, %26, %cst_27 {dimension_numbers = #tpu.dot_dimension_numbers<[1], [0], [0], [1], [0, 0, 1, 1], [], []>} : vector<256x4xbf16>, vector<4x128xbf16>, vector<256x128xf32> -> vector<256x128xf32>
    %28 = arith.addf %21, %27 : vector<256x128xf32>
    %c0_28 = arith.constant 0 : index
    %c1_29 = arith.constant 1 : index
    %c1_30 = arith.constant 1 : index
    %c0_31 = arith.constant 0 : index
    %29 = vector.load %arg1[%c0_28, %c1_29, %c1_30, %c0_31] : memref<1x18x18x4xbf16, #tpu.memory_space<vmem>>, vector<1x16x16x4xbf16>
    %30 = vector.shape_cast %29 : vector<1x16x16x4xbf16> to vector<16x16x4xbf16>
    %31 = vector.shape_cast %30 : vector<16x16x4xbf16> to vector<256x4xbf16>
    %c4 = arith.constant 4 : index
    %c0_32 = arith.constant 0 : index
    %c0_33 = arith.constant 0 : index
    %32 = vector.load %arg2[%c4, %c0_32, %c0_33] : memref<9x4x128xbf16, #tpu.memory_space<vmem>>, vector<1x4x128xbf16>
    %33 = vector.shape_cast %32 : vector<1x4x128xbf16> to vector<4x128xbf16>
    %cst_34 = arith.constant dense<0.000000e+00> : vector<256x128xf32>
    %34 = tpu.matmul %31, %33, %cst_34 {dimension_numbers = #tpu.dot_dimension_numbers<[1], [0], [0], [1], [0, 0, 1, 1], [], []>} : vector<256x4xbf16>, vector<4x128xbf16>, vector<256x128xf32> -> vector<256x128xf32>
    %35 = arith.addf %28, %34 : vector<256x128xf32>
    %c0_35 = arith.constant 0 : index
    %c1_36 = arith.constant 1 : index
    %c2_37 = arith.constant 2 : index
    %c0_38 = arith.constant 0 : index
    %36 = vector.load %arg1[%c0_35, %c1_36, %c2_37, %c0_38] : memref<1x18x18x4xbf16, #tpu.memory_space<vmem>>, vector<1x16x16x4xbf16>
    %37 = vector.shape_cast %36 : vector<1x16x16x4xbf16> to vector<16x16x4xbf16>
    %38 = vector.shape_cast %37 : vector<16x16x4xbf16> to vector<256x4xbf16>
    %c5 = arith.constant 5 : index
    %c0_39 = arith.constant 0 : index
    %c0_40 = arith.constant 0 : index
    %39 = vector.load %arg2[%c5, %c0_39, %c0_40] : memref<9x4x128xbf16, #tpu.memory_space<vmem>>, vector<1x4x128xbf16>
    %40 = vector.shape_cast %39 : vector<1x4x128xbf16> to vector<4x128xbf16>
    %cst_41 = arith.constant dense<0.000000e+00> : vector<256x128xf32>
    %41 = tpu.matmul %38, %40, %cst_41 {dimension_numbers = #tpu.dot_dimension_numbers<[1], [0], [0], [1], [0, 0, 1, 1], [], []>} : vector<256x4xbf16>, vector<4x128xbf16>, vector<256x128xf32> -> vector<256x128xf32>
    %42 = arith.addf %35, %41 : vector<256x128xf32>
    %c0_42 = arith.constant 0 : index
    %c2_43 = arith.constant 2 : index
    %c0_44 = arith.constant 0 : index
    %c0_45 = arith.constant 0 : index
    %43 = vector.load %arg1[%c0_42, %c2_43, %c0_44, %c0_45] : memref<1x18x18x4xbf16, #tpu.memory_space<vmem>>, vector<1x16x16x4xbf16>
    %44 = vector.shape_cast %43 : vector<1x16x16x4xbf16> to vector<16x16x4xbf16>
    %45 = vector.shape_cast %44 : vector<16x16x4xbf16> to vector<256x4xbf16>
    %c6 = arith.constant 6 : index
    %c0_46 = arith.constant 0 : index
    %c0_47 = arith.constant 0 : index
    %46 = vector.load %arg2[%c6, %c0_46, %c0_47] : memref<9x4x128xbf16, #tpu.memory_space<vmem>>, vector<1x4x128xbf16>
    %47 = vector.shape_cast %46 : vector<1x4x128xbf16> to vector<4x128xbf16>
    %cst_48 = arith.constant dense<0.000000e+00> : vector<256x128xf32>
    %48 = tpu.matmul %45, %47, %cst_48 {dimension_numbers = #tpu.dot_dimension_numbers<[1], [0], [0], [1], [0, 0, 1, 1], [], []>} : vector<256x4xbf16>, vector<4x128xbf16>, vector<256x128xf32> -> vector<256x128xf32>
    %49 = arith.addf %42, %48 : vector<256x128xf32>
    %c0_49 = arith.constant 0 : index
    %c2_50 = arith.constant 2 : index
    %c1_51 = arith.constant 1 : index
    %c0_52 = arith.constant 0 : index
    %50 = vector.load %arg1[%c0_49, %c2_50, %c1_51, %c0_52] : memref<1x18x18x4xbf16, #tpu.memory_space<vmem>>, vector<1x16x16x4xbf16>
    %51 = vector.shape_cast %50 : vector<1x16x16x4xbf16> to vector<16x16x4xbf16>
    %52 = vector.shape_cast %51 : vector<16x16x4xbf16> to vector<256x4xbf16>
    %c7 = arith.constant 7 : index
    %c0_53 = arith.constant 0 : index
    %c0_54 = arith.constant 0 : index
    %53 = vector.load %arg2[%c7, %c0_53, %c0_54] : memref<9x4x128xbf16, #tpu.memory_space<vmem>>, vector<1x4x128xbf16>
    %54 = vector.shape_cast %53 : vector<1x4x128xbf16> to vector<4x128xbf16>
    %cst_55 = arith.constant dense<0.000000e+00> : vector<256x128xf32>
    %55 = tpu.matmul %52, %54, %cst_55 {dimension_numbers = #tpu.dot_dimension_numbers<[1], [0], [0], [1], [0, 0, 1, 1], [], []>} : vector<256x4xbf16>, vector<4x128xbf16>, vector<256x128xf32> -> vector<256x128xf32>
    %56 = arith.addf %49, %55 : vector<256x128xf32>
    %c0_56 = arith.constant 0 : index
    %c2_57 = arith.constant 2 : index
    %c2_58 = arith.constant 2 : index
    %c0_59 = arith.constant 0 : index
    %57 = vector.load %arg1[%c0_56, %c2_57, %c2_58, %c0_59] : memref<1x18x18x4xbf16, #tpu.memory_space<vmem>>, vector<1x16x16x4xbf16>
    %58 = vector.shape_cast %57 : vector<1x16x16x4xbf16> to vector<16x16x4xbf16>
    %59 = vector.shape_cast %58 : vector<16x16x4xbf16> to vector<256x4xbf16>
    %c8 = arith.constant 8 : index
    %c0_60 = arith.constant 0 : index
    %c0_61 = arith.constant 0 : index
    %60 = vector.load %arg2[%c8, %c0_60, %c0_61] : memref<9x4x128xbf16, #tpu.memory_space<vmem>>, vector<1x4x128xbf16>
    %61 = vector.shape_cast %60 : vector<1x4x128xbf16> to vector<4x128xbf16>
    %cst_62 = arith.constant dense<0.000000e+00> : vector<256x128xf32>
    %62 = tpu.matmul %59, %61, %cst_62 {dimension_numbers = #tpu.dot_dimension_numbers<[1], [0], [0], [1], [0, 0, 1, 1], [], []>} : vector<256x4xbf16>, vector<4x128xbf16>, vector<256x128xf32> -> vector<256x128xf32>
    %63 = arith.addf %56, %62 : vector<256x128xf32>
    %64 = arith.truncf %63 : vector<256x128xf32> to vector<256x128xbf16>
    %c0_63 = arith.constant 0 : index
    %c0_64 = arith.constant 0 : index
    %c0_65 = arith.constant 0 : index
    %65 = vector.load %arg3[%c0_63, %c0_64, %c0_65] : memref<1x256x128xbf16, #tpu.memory_space<vmem>>, vector<1x256x128xbf16>
    %66 = vector.shape_cast %65 : vector<1x256x128xbf16> to vector<256x128xbf16>
    %67 = vector.shape_cast %64 : vector<256x128xbf16> to vector<1x256x128xbf16>
    tpu.vector_store %arg3[%c0_63, %c0_64, %c0_65], %67 {strides = array<i32>} : memref<1x256x128xbf16, #tpu.memory_space<vmem>>, vector<1x256x128xbf16>,
    %cst_66 = arith.constant dense<0.000000e+00> : vector<128xf32>
    %68 = vector.multi_reduction <add>, %63, %cst_66 [0] : vector<256x128xf32> to vector<128xf32>
    %69 = vector.shape_cast %68 : vector<128xf32> to vector<1x128xf32>
    %cst_67 = arith.constant 3.906250e-03 : f32
    %70 = vector.broadcast %cst_67 : f32 to vector<1x128xf32>
    %71 = arith.mulf %69, %70 : vector<1x128xf32>
    %72 = vector.broadcast %71 : vector<1x128xf32> to vector<256x128xf32>
    %73 = arith.subf %63, %72 : vector<256x128xf32>
    %c0_68 = arith.constant 0 : index
    %c0_69 = arith.constant 0 : index
    %c0_70 = arith.constant 0 : index
    %74 = vector.load %arg4[%c0_68, %c0_69, %c0_70] : memref<1x1x128xf32, #tpu.memory_space<vmem>>, vector<1x1x128xf32>
    %75 = vector.shape_cast %74 : vector<1x1x128xf32> to vector<1x128xf32>
    %76 = vector.shape_cast %69 : vector<1x128xf32> to vector<1x1x128xf32>
    tpu.vector_store %arg4[%c0_68, %c0_69, %c0_70], %76 {strides = array<i32>} : memref<1x1x128xf32, #tpu.memory_space<vmem>>, vector<1x1x128xf32>,
    %77 = arith.mulf %73, %73 : vector<256x128xf32>
    %cst_71 = arith.constant dense<0.000000e+00> : vector<128xf32>
    %78 = vector.multi_reduction <add>, %77, %cst_71 [0] : vector<256x128xf32> to vector<128xf32>
    %79 = vector.shape_cast %78 : vector<128xf32> to vector<1x128xf32>
    %c0_72 = arith.constant 0 : index
    %c0_73 = arith.constant 0 : index
    %c0_74 = arith.constant 0 : index
    %80 = vector.load %arg5[%c0_72, %c0_73, %c0_74] : memref<1x1x128xf32, #tpu.memory_space<vmem>>, vector<1x1x128xf32>
    %81 = vector.shape_cast %80 : vector<1x1x128xf32> to vector<1x128xf32>
    %82 = vector.shape_cast %79 : vector<1x128xf32> to vector<1x1x128xf32>
    tpu.vector_store %arg5[%c0_72, %c0_73, %c0_74], %82 {strides = array<i32>} : memref<1x1x128xf32, #tpu.memory_space<vmem>>, vector<1x1x128xf32>,
    return
  }
  func.func @transform_0(%arg0: i32) -> (i32, i32, i32, i32) {
    %c0_i32 = arith.constant 0 : i32
    %c0_i32_0 = arith.constant 0 : i32
    %c0_i32_1 = arith.constant 0 : i32
    %c0_i32_2 = arith.constant 0 : i32
    return %arg0, %c0_i32, %c0_i32_0, %c0_i32_1 : i32, i32, i32, i32
  }
  func.func @transform_1(%arg0: i32) -> (i32, i32, i32) {
    %c0_i32 = arith.constant 0 : i32
    %c0_i32_0 = arith.constant 0 : i32
    %c0_i32_1 = arith.constant 0 : i32
    %c0_i32_2 = arith.constant 0 : i32
    return %c0_i32, %c0_i32_0, %c0_i32_1 : i32, i32, i32
  }
  func.func @transform_2(%arg0: i32) -> (i32, i32, i32) {
    %c0_i32 = arith.constant 0 : i32
    %c0_i32_0 = arith.constant 0 : i32
    %c0_i32_1 = arith.constant 0 : i32
    return %arg0, %c0_i32, %c0_i32_0 : i32, i32, i32
  }
  func.func @transform_3(%arg0: i32) -> (i32, i32, i32) {
    %c0_i32 = arith.constant 0 : i32
    %c0_i32_0 = arith.constant 0 : i32
    %c0_i32_1 = arith.constant 0 : i32
    return %arg0, %c0_i32, %c0_i32_0 : i32, i32, i32
  }
  func.func @transform_4(%arg0: i32) -> (i32, i32, i32) {
    %c0_i32 = arith.constant 0 : i32
    %c0_i32_0 = arith.constant 0 : i32
    %c0_i32_1 = arith.constant 0 : i32
    return %arg0, %c0_i32, %c0_i32_0 : i32, i32, i32
  }
}

</mosaic_0001>

<bundles_post_ra>
// kernel: tpu_custom_call.1
= control target key start
LH: loop header
LB: loop body
LE: loop exit
PB: predicated region body
PF: predicated region fallthrough
CT: control target
= control target key end

     0   :  { %10 = vsyncpa [#allocation3], 0  ;;  %s9097_s0 = inlined_call_operand.vmem [shape: bf16[2,18,18,4], index: 0, kind: input, shape index: {}]   ;;  %s9098_s1 = inlined_call_operand.vmem [shape: bf16[9,4,128], index: 1, kind: input, shape index: {}]   ;;  %s9099_s2 = inlined_call_operand.hbm [shape: bf16[2,256,128], index: 2, kind: output, shape index: {0}]   ;;  %s9100_s3 = inlined_call_operand.hbm [shape: f32[2,1,128], index: 3, kind: output, shape index: {1}]   ;;  %s9101_s4 = inlined_call_operand.hbm [shape: f32[2,1,128], index: 4, kind: output, shape index: {2}]  }
   0x1   :  { %12 = vsyncpa [#allocation3 + $0x1], 0 }
   0x2   :  { %13 = vsyncpa [#allocation5], 0 }
   0x3   :  { %15 = vsyncpa [#allocation5 + $0x1], 0  ;;  %s6983_s15 = smov 0   ;;  %s6985_s16 = smov 0  }
   0x4   :  { %s6987_s17 = smov 0   ;;  %s6989_s18 = smov 0  }
   0x5 LB: > { %s7004_s19 = sadd.s32 4294967295, %s6951_s18   ;;  %s5236_s20 = sadd.s32 4294967294, %s6951_s18   ;;  %s6951_s18 = sphi %s6989_s18, %s9174_s18   ;;  %s6947_s17 = sphi %s6987_s17, %s9173_s17   ;;  %s6943_s16 = sphi %s6985_s16, %s9172_s16   ;;  %s6939_s15 = sphi %s6983_s15, %s9171_s15  }
   0x6   : > { %s7008_s21 = sadd.s32 1, %s6951_s18   ;;  %s75_s22 = sadd.s32 1, %s6947_s17 }
   0x7   : > { %s72_s23 = ssub.s32 %s6951_s18, %s7008_s21  ;;  %p85_p0 = scmp.ne.s32.totalorder %s6947_s17, %s6943_s16 }
   0x8   : > { %p73_p1 = scmp.eq.s32.totalorder %s72_s23, 0  ;;  %p86_p2 = scmp.eq.s32.totalorder %s7004_s19, 1 }
   0x9   : > { %p91_p3 = scmp.ne.s32.totalorder %s6943_s16, %s6939_s15  ;;  %p92_p4 = scmp.eq.s32.totalorder %s5236_s20, 1 }
   0xa   : > { %s7021_s24 = scalar_select %p73_p1, %s6947_s17, %s75_s22  }
   0xb   : > { %p7023_p5 = por %p86_p2, %p85_p0  ;;  %p7027_p6 = por %p92_p4, %p91_p3 }
   0xc   : > { %p5239_p7 = scmp.ge.s32.totalorder %s6951_s18, 1  ;;  %p173_p8 = scmp.lt.s32.totalorder %s6951_s18, 3 }
   0xe   : > { %p174_p9 = pnand %p5239_p7, %p173_p8 }
  0x10   : > { %177 = sbr.rel (%p174_p9) target bundleno = 733 (0x2dd), region = 28 }
  0x17   : > { %v5242_v0 = vld [vmem:[%s9098_s1 + $0x2] sm:$0x3]  ;;  %vm748_vm0 = vcmask 1041408   ;;  %v5469_v1 = vld [vmem:[%s9098_s1 + $0x8] sm:$0x3]  ;;  %p207_p10 = scmp.lt.s32.totalorder %s7004_s19, 1 }
  0x18   : > { %6662 = vmatprep.subr.msk.bf16.mxu1 %vm748_vm0, %v5242_v0  ;;  %6666 = vmatprep.subr.msk.bf16.mxu0 %vm748_vm0, %v5469_v1  ;;  %v750_v2 = vsel %vm748_vm0, %v5242_v0, 0  ;;  %v7044_v3 = vsel %vm748_vm0, %v5469_v1, 0  ;;  %v245_v4 = vld [vmem:[%s9098_s1] sm:$0x3]  ;;  %v5534_v5 = vld [vmem:[%s9098_s1 + $0xa] sm:$0x3] }
  0x19   : > { %9117 = vst [vmem:[#allocation9_spill] sm:$0xff] %v7044_v3  ;;  %6099 = vmatpush3.bf16.msra.mxu1 %v750_v2  ;;  %6235 = vmatpush3.bf16.msra.mxu0 %v7044_v3  ;;  %s208_s5 = scalar_select %p207_p10, %s7004_s19, 1  ;;  %vm262_vm1 = vsmask.f32 3328  ;;  %vm263_vm2 = vsmask.f32 7440 }
  0x1a   : > { %6663 = vmatprep.subr.msk.bf16.mxu1 %vm748_vm0, %v245_v4  ;;  %6668 = vmatprep.subr.msk.bf16.mxu0 %vm748_vm0, %v5534_v5  ;;  %vm699_vm3 = vcmask 31744   ;;  %v7072_v17 = vsel %vm748_vm0, %v245_v4, 0  ;;  %v7078_v26 = vld [vmem:[%s9098_s1 + $0xc] sm:$0x3]  ;;  %vm7085_vm4 = vmor %vm262_vm1, %vm263_vm2  ;;  %v7091_v37 = vsel %vm748_vm0, %v5534_v5, 0  ;;  %vm1253_vm5 = vcmask 1042432  }
  0x1b   : > { %s6672_s10 = smul.u32 216, %s208_s5  ;;  %v7095_v41 = vsel %vm748_vm0, %v7078_v26, 0  ;;  %vm1254_vm6 = vcmask 1046532   ;;  %s8736_s12 = sand.u32 1, %s6943_s16  }
  0x1c   : > { %vm7311_vm7 = vmor %vm1253_vm5, %vm1254_vm6  ;;  %s5849_s22 = sshll.u32 %s7004_s19, 11  ;;  %s5074_s30 = scalar_lea.sflag [#allocation3], %s8736_s12 }
  0x1d   : > { %s7059_s13 = scalar_lea.vmem %s9097_s0, %s6672_s10  ;;  %s8883_s29 = scalar_lea.hbm %s9099_s2, %s5849_s22 }
  0x1e   : > { %v213_v6 = vld [vmem:[%s7059_s13] sm:$0xf]  ;;  %v214_v7 = vld [vmem:[%s7059_s13 + $0x4] sm:$0xf]  ;;  %v246_v8 = vld [vmem:[%s7059_s13 + $0x8] sm:$0x1] }
  0x1f   : > { %v266_v9 = vshrl.u32 %v213_v6, 16  ;;  %v269_v10 = vshll.u32 %v213_v6, 16  ;;  %v275_v11 = vshll.u32 %v214_v7, 16  ;;  %v279_v12 = vshrl.u32 %v214_v7, 16  ;;  %v5421_v13 = vld [vmem:[%s7059_s13 + $0xc] sm:$0xf] }
  0x20   : > { %v285_v14 = vshll.u32 %v246_v8, 16  ;;  %v7066_v15 = vld [vmem:[%s7059_s13 + $0x10] sm:$0xf]  ;;  %v7069_v16 = vld [vmem:[%s7059_s13 + $0x14] sm:$0x1]  ;;  %v2070_v23 = vshrl.u32 %v5421_v13, 16 }
  0x21   : > { %v268_v18 = vrot.slane %v266_v9, 4  ;;  %v271_v19 = vrot.slane %v269_v10, 5  ;;  %v277_v20 = vrot.slane %v275_v11, 5  ;;  %v281_v21 = vrot.slane %v279_v12, 4  ;;  %v215_v31 = vld [vmem:[%s7059_s13 + $0xc] sm:$0xf] }
  0x22   : > { %v287_v22 = vrot.slane %v285_v14, 5  ;;  %v2073_v24 = vshll.u32 %v5421_v13, 16  ;;  %v2079_v25 = vshll.u32 %v7066_v15, 16  ;;  %v2083_v29 = vshrl.u32 %v7066_v15, 16  ;;  %v216_v36 = vld [vmem:[%s7059_s13 + $0x10] sm:$0xf] }
  0x23   : > { %v272_v27 = vor.u32 %v271_v19, %v268_v18  ;;  %v282_v28 = vor.u32 %v281_v21, %v277_v20  ;;  %v2089_v30 = vshll.u32 %v7069_v16, 16  ;;  %v2072_v33 = vrot.slane %v2070_v23, 4  ;;  %v247_v44 = vld [vmem:[%s7059_s13 + $0x14] sm:$0x1]  ;;  %v5424_v55 = vld [vmem:[%s7059_s13 + $0x18] sm:$0xf] }
  0x24   : > { %v2075_v34 = vrot.slane %v2073_v24, 5  ;;  %v2081_v35 = vrot.slane %v2079_v25, 5  ;;  %v2085_v40 = vrot.slane %v2083_v29, 4  ;;  %v290_v45 = vshrl.u32 %v215_v31, 16  ;;  %v7104_v60 = vld [vmem:[%s7059_s13 + $0x1c] sm:$0xf] }
  0x25   : > { %v273_v38 = vrot.slane %v272_v27, 4  ;;  %v283_v39 = vrot.slane %v282_v28, 4  ;;  %v2091_v43 = vrot.slane %v2089_v30, 5  ;;  %v293_v46 = vshll.u32 %v215_v31, 16  ;;  %v7112_v1 = vld [vmem:[%s7059_s13 + $0x20] sm:$0x1] }
  0x26   : > { %v2076_v42 = vor.u32 %v2075_v34, %v2072_v33  ;;  %v2086_v49 = vor.u32 %v2085_v40, %v2081_v35  ;;  %v299_v50 = vshll.u32 %v216_v36, 16  ;;  %v292_v53 = vrot.slane %v290_v45, 4  ;;  %v217_v18 = vld [vmem:[%s7059_s13 + $0x18] sm:$0xf]  ;;  %v218_v23 = vld [vmem:[%s7059_s13 + $0x1c] sm:$0xf] }
  0x27   : > { %v278_v47 = vsel %vm7085_vm4, %v273_v38, %v277_v20  ;;  %v288_v48 = vsel %vm7085_vm4, %v283_v39, %v287_v22  ;;  %v295_v54 = vrot.slane %v293_v46, 5  ;;  %v303_v58 = vshrl.u32 %v216_v36, 16  ;;  %v248_v31 = vld [vmem:[%s7059_s13 + $0x20] sm:$0x1]  ;;  %v5427_v40 = vld [vmem:[%s7059_s13 + $0x24] sm:$0xf] }
  0x28   : > { %v5243_v51 = vcombine.low %v278_v47, %v288_v48  ;;  %v2077_v52 = vrot.slane %v2076_v42, 4  ;;  %v2087_v56 = vrot.slane %v2086_v49, 4  ;;  %v301_v57 = vrot.slane %v299_v50, 5  ;;  %v7135_v46 = vld [vmem:[%s7059_s13 + $0x28] sm:$0xf]  ;;  %s6953_s6 = smov [#allocation2]  }
  0x29   : > { %v309_v59 = vshll.u32 %v247_v44, 16  ;;  %v2813_v62 = vrot.slane %v7066_v15, 5  ;;  %v2816_v63 = vrot.slane %v7069_v16, 5  ;;  %v296_v0 = vor.u32 %v295_v54, %v292_v53  ;;  %v7144_v54 = vld [vmem:[%s7059_s13 + $0x2c] sm:$0x1]  ;;  %s6833_s7 = sshll.u32 %s6953_s6, 4  ;;  %s6834_s7 = int_to_ptr.vmem [resolvable:$false] %s6833_s7 }
  0x2a   : > { %6100 = vmatprep.mubr.msk.bf16.mxu1 %vm699_vm3, %v5243_v51  ;;  %v2082_v61 = vsel %vm7085_vm4, %v2077_v52, %v2081_v35  ;;  %v2092_v2 = vsel %vm7085_vm4, %v2087_v56, %v2091_v43  ;;  %v305_v4 = vrot.slane %v303_v58, 4  ;;  %v2094_v6 = vshrl.u32 %v5424_v55, 16  ;;  %v5323_v51 = vld [vmem:[%s9098_s1 + $0x4] sm:$0x3]  ;;  %v7344_v16 = vld [vmem:[%s7059_s13 + $0x7c] sm:$0xf] }
  0x2b   : > { %v311_v5 = vrot.slane %v309_v59, 5  ;;  %v5470_v7 = vcombine.low %v2082_v61, %v2092_v2  ;;  %v297_v8 = vrot.slane %v296_v0, 4  ;;  %v2097_v9 = vshll.u32 %v5424_v55, 16  ;;  %v219_v0 = vld [vmem:[%s7059_s13 + $0x24] sm:$0xf]  ;;  %s6835_s8 = scalar_lea.vmem %s6834_s7, 4096 }
  0x2c   : > { %v2103_v10 = vshll.u32 %v7104_v60, 16  ;;  %v306_v11 = vor.u32 %v305_v4, %v301_v57  ;;  %v2096_v12 = vrot.slane %v2094_v6, 4  ;;  %v2107_v13 = vshrl.u32 %v7104_v60, 16 }
  0x2d   : > { %v2113_v14 = vshll.u32 %v7112_v1, 16  ;;  %6236 = vmatprep.mubr.msk.bf16.mxu0 %vm699_vm3, %v5470_v7  ;;  %v302_v19 = vsel %vm7085_vm4, %v297_v8, %v301_v57  ;;  %v2099_v20 = vrot.slane %v2097_v9, 5  ;;  %v2820_v22 = vrot.slane %v7104_v60, 5  ;;  %v220_v7 = vld [vmem:[%s7059_s13 + $0x28] sm:$0xf] }
  0x2e   : > { %v2105_v21 = vrot.slane %v2103_v10, 5  ;;  %v307_v24 = vrot.slane %v306_v11, 4  ;;  %v2109_v25 = vrot.slane %v2107_v13, 4  ;;  %v2823_v28 = vrot.slane %v7112_v1, 5  ;;  %v249_v13 = vld [vmem:[%s7059_s13 + $0x2c] sm:$0x1] }
  0x2f   : > { %v2115_v27 = vrot.slane %v2113_v14, 5  ;;  %v2100_v29 = vor.u32 %v2099_v20, %v2096_v12  ;;  %v7128_v30 = vrot.slane %v2820_v22, 4  ;;  %v314_v33 = vshrl.u32 %v217_v18, 16 }
  0x30   : > { %v317_v34 = vshll.u32 %v217_v18, 16  ;;  %v312_v35 = vsel %vm7085_vm4, %v307_v24, %v311_v5  ;;  %v2110_v36 = vor.u32 %v2109_v25, %v2105_v21  ;;  %v323_v38 = vshll.u32 %v218_v23, 16  ;;  %v5430_v24 = vld [vmem:[%s7059_s13 + $0x30] sm:$0xf] }
  0x31   : > { %v327_v39 = vshrl.u32 %v218_v23, 16  ;;  %v5244_v42 = vcombine.low %v302_v19, %v312_v35  ;;  %v2101_v43 = vrot.slane %v2100_v29, 4  ;;  %v316_v44 = vrot.slane %v314_v33, 4  ;;  %v7164_v33 = vld [vmem:[%s7059_s13 + $0x34] sm:$0xf] }
  0x32   : > { %v319_v45 = vrot.slane %v317_v34, 5  ;;  %v2111_v47 = vrot.slane %v2110_v36, 4  ;;  %v325_v48 = vrot.slane %v323_v38, 5  ;;  %v333_v50 = vshll.u32 %v248_v31, 16 }
  0x33   : > { %v329_v49 = vrot.slane %v327_v39, 4  ;;  %6101 = vmatmul.mubr.msk.bf16.vlgmr.msra.gmra.mrb[0].mxu1 %vm699_vm3, %v5244_v42  ;;  %v2106_v52 = vsel %vm7085_vm4, %v2101_v43, %v2105_v21  ;;  %v2118_v55 = vshrl.u32 %v5427_v40, 16  ;;  %v2121_v56 = vshll.u32 %v5427_v40, 16  ;;  %v7172_v40 = vld [vmem:[%s7059_s13 + $0x38] sm:$0x1] }
  0x34   : > { %v320_v53 = vor.u32 %v319_v45, %v316_v44  ;;  %6133 = vmatpush3.bf16.msra.mxu1 %v7072_v17  ;;  %v2116_v57 = vsel %vm7085_vm4, %v2111_v47, %v2115_v27  ;;  %v335_v59 = vrot.slane %v333_v50, 5  ;;  %v2127_v61 = vshll.u32 %v7135_v46, 16 }
  0x35   : > { %v330_v58 = vor.u32 %v329_v49, %v325_v48  ;;  %v5471_v2 = vcombine.low %v2106_v52, %v2116_v57  ;;  %v2120_v5 = vrot.slane %v2118_v55, 4  ;;  %v2123_v6 = vrot.slane %v2121_v56, 5  ;;  %6664 = vmatprep.subr.msk.bf16.mxu1 %vm748_vm0, %v5323_v51  ;;  %v221_v52 = vld [vmem:[%s7059_s13 + $0x30] sm:$0xf] }
  0x36   : > { %v321_v4 = vrot.slane %v320_v53, 4  ;;  %v2129_v9 = vrot.slane %v2127_v61, 5  ;;  %v2131_v17 = vshrl.u32 %v7135_v46, 16  ;;  %v2137_v10 = vshll.u32 %v7144_v54, 16 }
  0x37   : > { %v331_v8 = vrot.slane %v330_v58, 4  ;;  %6237 = vmatmul.mubr.msk.bf16.vlgmr.msra.gmra.mrb[0].mxu0 %vm699_vm3, %v5471_v2  ;;  %v2124_v12 = vor.u32 %v2123_v6, %v2120_v5  ;;  %v338_v14 = vshrl.u32 %v219_v0, 16  ;;  %v341_v18 = vshll.u32 %v219_v0, 16  ;;  %v222_v58 = vld [vmem:[%s7059_s13 + $0x34] sm:$0xf] }
  0x38   : > { %v326_v11 = vsel %vm7085_vm4, %v321_v4, %v325_v48  ;;  %6269 = vmatpush3.bf16.msra.mxu0 %v7091_v37  ;;  %v2133_v20 = vrot.slane %v2131_v17, 4  ;;  %v2139_v21 = vrot.slane %v2137_v10, 5  ;;  %v347_v23 = vshll.u32 %v220_v7, 16  ;;  %v250_v4 = vld [vmem:[%s7059_s13 + $0x38] sm:$0x1] }
  0x39   : > { %v336_v19 = vsel %vm7085_vm4, %v331_v8, %v335_v59  ;;  %v2125_v27 = vrot.slane %v2124_v12, 4  ;;  %v340_v29 = vrot.slane %v338_v14, 4  ;;  %v343_v31 = vrot.slane %v341_v18, 5  ;;  %6669 = vmatprep.subr.msk.bf16.mxu0 %vm748_vm0, %v7078_v26  ;;  %v5433_v12 = vld [vmem:[%s7059_s13 + $0x3c] sm:$0xf] }
  0x3a   : > { %v5245_v25 = vcombine.low %v326_v11, %v336_v19  ;;  %v2134_v34 = vor.u32 %v2133_v20, %v2129_v9  ;;  %v349_v35 = vrot.slane %v347_v23, 5  ;;  %v351_v37 = vshrl.u32 %v220_v7, 16  ;;  %v7189_v20 = vld [vmem:[%s7059_s13 + $0x40] sm:$0xf] }
  0x3b   : > { %v357_v36 = vshll.u32 %v249_v13, 16  ;;  %v2130_v38 = vsel %vm7085_vm4, %v2125_v27, %v2129_v9  ;;  %v344_v39 = vor.u32 %v343_v31, %v340_v29  ;;  %v2142_v42 = vshrl.u32 %v5430_v24, 16 }
  0x3c   : > { %6104 = vmatprep.mubr.msk.bf16.mxu1 %vm699_vm3, %v5245_v25  ;;  %v2145_v43 = vshll.u32 %v5430_v24, 16  ;;  %v2135_v44 = vrot.slane %v2134_v34, 4  ;;  %v353_v45 = vrot.slane %v351_v37, 4  ;;  %v2151_v26 = vshll.u32 %v7164_v33, 16  ;;  %v7194_v34 = vld [vmem:[%s7059_s13 + $0x44] sm:$0x1] }
  0x3d   : > { %v359_v47 = vrot.slane %v357_v36, 5  ;;  %v345_v48 = vrot.slane %v344_v39, 4  ;;  %v2144_v49 = vrot.slane %v2142_v42, 4  ;;  %v2155_v51 = vshrl.u32 %v7164_v33, 16  ;;  %v223_v42 = vld [vmem:[%s7059_s13 + $0x3c] sm:$0xf] }
  0x3e   : > { %v2147_v50 = vrot.slane %v2145_v43, 5  ;;  %v2140_v53 = vsel %vm7085_vm4, %v2135_v44, %v2139_v21  ;;  %v354_v55 = vor.u32 %v353_v45, %v349_v35  ;;  %v2153_v56 = vrot.slane %v2151_v26, 5  ;;  %v224_v26 = vld [vmem:[%s7059_s13 + $0x40] sm:$0xf] }
  0x3f   : > { %v2161_v57 = vshll.u32 %v7172_v40, 16  ;;  %v5472_v59 = vcombine.low %v2130_v38, %v2140_v53  ;;  %v350_v61 = vsel %vm7085_vm4, %v345_v48, %v349_v35  ;;  %v2157_v2 = vrot.slane %v2155_v51, 4 }
  0x40   : > { %v2148_v0 = vor.u32 %v2147_v50, %v2144_v49  ;;  %v355_v5 = vrot.slane %v354_v55, 4  ;;  %v362_v7 = vshrl.u32 %v221_v52, 16  ;;  %v365_v8 = vshll.u32 %v221_v52, 16 }
  0x41   : > { %v2163_v6 = vrot.slane %v2161_v57, 5  ;;  %6240 = vmatprep.mubr.msk.bf16.mxu0 %vm699_vm3, %v5472_v59  ;;  %v2158_v17 = vor.u32 %v2157_v2, %v2153_v56  ;;  %v371_v10 = vshll.u32 %v222_v58, 16  ;;  %v375_v11 = vshrl.u32 %v222_v58, 16  ;;  %v5436_v2 = vld [vmem:[%s7059_s13 + $0x48] sm:$0xf] }
  0x42   : > { %v2149_v9 = vrot.slane %v2148_v0, 4  ;;  %v360_v13 = vsel %vm7085_vm4, %v355_v5, %v359_v47  ;;  %v364_v14 = vrot.slane %v362_v7, 4  ;;  %v367_v18 = vrot.slane %v365_v8, 5  ;;  %v7212_v8 = vld [vmem:[%s7059_s13 + $0x4c] sm:$0xf] }
  0x43   : > { %v381_v19 = vshll.u32 %v250_v4, 16  ;;  %v5246_v21 = vcombine.low %v350_v61, %v360_v13  ;;  %v2159_v24 = vrot.slane %v2158_v17, 4  ;;  %v373_v25 = vrot.slane %v371_v10, 5  ;;  %v251_v61 = vld [vmem:[%s7059_s13 + $0x44] sm:$0x1] }
  0x44   : > { %v2154_v23 = vsel %vm7085_vm4, %v2149_v9, %v2153_v56  ;;  %v368_v27 = vor.u32 %v367_v18, %v364_v14  ;;  %v377_v29 = vrot.slane %v375_v11, 4  ;;  %v2166_v35 = vshrl.u32 %v5433_v12, 16 }
  0x45   : > { %v383_v31 = vrot.slane %v381_v19, 5  ;;  %6105 = vmatmul.mubr.msk.bf16.gmra.mrb[4].mxu1 %vm699_vm3, %v5246_v21  ;;  %v2164_v37 = vsel %vm7085_vm4, %v2159_v24, %v2163_v6  ;;  %v2169_v36 = vshll.u32 %v5433_v12, 16  ;;  %v2175_v38 = vshll.u32 %v7189_v20, 16 }
  0x46   : > { %v2179_v39 = vshrl.u32 %v7189_v20, 16  ;;  %v5473_v43 = vcombine.low %v2154_v23, %v2164_v37  ;;  %v369_v44 = vrot.slane %v368_v27, 4  ;;  %v378_v45 = vor.u32 %v377_v29, %v373_v25  ;;  %v7220_v23 = vld [vmem:[%s7059_s13 + $0x50] sm:$0x1]  ;;  %v7224_v27 = vld [vmem:[%s7059_s13 + $0x48] sm:$0xf] }
  0x47   : > { %v2168_v47 = vrot.slane %v2166_v35, 4  ;;  %v2171_v48 = vrot.slane %v2169_v36, 5  ;;  %v2177_v49 = vrot.slane %v2175_v38, 5  ;;  %v2185_v51 = vshll.u32 %v7194_v34, 16  ;;  %v7227_v36 = vld [vmem:[%s7059_s13 + $0x4c] sm:$0xf] }
  0x48   : > { %v2181_v50 = vrot.slane %v2179_v39, 4  ;;  %6241 = vmatmul.mubr.msk.bf16.gmra.mrb[4].mxu0 %vm699_vm3, %v5473_v43  ;;  %v374_v52 = vsel %vm7085_vm4, %v369_v44, %v373_v25  ;;  %v379_v53 = vrot.slane %v378_v45, 4  ;;  %v386_v55 = vshrl.u32 %v223_v42, 16 }
  0x49   : > { %v389_v56 = vshll.u32 %v223_v42, 16  ;;  %v2172_v57 = vor.u32 %v2171_v48, %v2168_v47  ;;  %v2187_v59 = vrot.slane %v2185_v51, 5  ;;  %v395_v0 = vshll.u32 %v224_v26, 16 }
  0x4a   : > { %v2182_v58 = vor.u32 %v2181_v50, %v2177_v49  ;;  %v384_v4 = vsel %vm7085_vm4, %v379_v53, %v383_v31  ;;  %v388_v5 = vrot.slane %v386_v55, 4  ;;  %v399_v7 = vshrl.u32 %v224_v26, 16  ;;  %v252_v26 = vld [vmem:[%s7059_s13 + $0x50] sm:$0x1]  ;;  %v5439_v53 = vld [vmem:[%s7059_s13 + $0x54] sm:$0xf] }
  0x4b   : > { %v391_v6 = vrot.slane %v389_v56, 5  ;;  %v5247_v9 = vcombine.low %v374_v52, %v384_v4  ;;  %v2173_v17 = vrot.slane %v2172_v57, 4  ;;  %v397_v11 = vrot.slane %v395_v0, 5  ;;  %v7243_v4 = vld [vmem:[%s7059_s13 + $0x58] sm:$0xf] }
  0x4c   : > { %v2183_v10 = vrot.slane %v2182_v58, 4  ;;  %v401_v13 = vrot.slane %v399_v7, 4  ;;  %v405_v14 = vshll.u32 %v251_v61, 16  ;;  %v2190_v18 = vshrl.u32 %v5436_v2, 16 }
  0x4d   : > { %v392_v12 = vor.u32 %v391_v6, %v388_v5  ;;  %6108 = vmatprep.mubr.msk.bf16.mxu1 %vm699_vm3, %v5247_v9  ;;  %v2178_v19 = vsel %vm7085_vm4, %v2173_v17, %v2177_v49  ;;  %v2193_v24 = vshll.u32 %v5436_v2, 16  ;;  %v2199_v25 = vshll.u32 %v7212_v8, 16 }
  0x4e   : > { %v2188_v21 = vsel %vm7085_vm4, %v2183_v10, %v2187_v59  ;;  %v402_v35 = vor.u32 %v401_v13, %v397_v11  ;;  %v407_v37 = vrot.slane %v405_v14, 5  ;;  %v2192_v38 = vrot.slane %v2190_v18, 4 }
  0x4f   : > { %v5474_v29 = vcombine.low %v2178_v19, %v2188_v21  ;;  %v393_v31 = vrot.slane %v392_v12, 4  ;;  %v2195_v39 = vrot.slane %v2193_v24, 5  ;;  %v2201_v42 = vrot.slane %v2199_v25, 5  ;;  %v7249_v12 = vld [vmem:[%s7059_s13 + $0x5c] sm:$0x1] }
  0x50   : > { %v2203_v43 = vshrl.u32 %v7212_v8, 16  ;;  %v403_v45 = vrot.slane %v402_v35, 4  ;;  %v2209_v47 = vshll.u32 %v7220_v23, 16  ;;  %v410_v48 = vshrl.u32 %v7224_v27, 16  ;;  %v7253_v24 = vld [vmem:[%s7059_s13 + $0x54] sm:$0xf] }
  0x51   : > { %6244 = vmatprep.mubr.msk.bf16.mxu0 %vm699_vm3, %v5474_v29  ;;  %v398_v44 = vsel %vm7085_vm4, %v393_v31, %v397_v11  ;;  %v2196_v49 = vor.u32 %v2195_v39, %v2192_v38  ;;  %v413_v51 = vshll.u32 %v7224_v27, 16  ;;  %v419_v52 = vshll.u32 %v7227_v36, 16 }
  0x52   : > { %v2205_v50 = vrot.slane %v2203_v43, 4  ;;  %v408_v55 = vsel %vm7085_vm4, %v403_v45, %v407_v37  ;;  %v2211_v56 = vrot.slane %v2209_v47, 5  ;;  %v412_v57 = vrot.slane %v410_v48, 4  ;;  %v7259_v37 = vld [vmem:[%s7059_s13 + $0x58] sm:$0xf] }
  0x53   : > { %v423_v58 = vshrl.u32 %v7227_v36, 16  ;;  %v5248_v59 = vcombine.low %v398_v44, %v408_v55  ;;  %v2197_v61 = vrot.slane %v2196_v49, 4  ;;  %v415_v2 = vrot.slane %v413_v51, 5 }
  0x54   : > { %v2206_v0 = vor.u32 %v2205_v50, %v2201_v42  ;;  %v421_v5 = vrot.slane %v419_v52, 5  ;;  %v429_v7 = vshll.u32 %v252_v26, 16  ;;  %v2214_v9 = vshrl.u32 %v5439_v53, 16  ;;  %v253_v26 = vld [vmem:[%s7059_s13 + $0x5c] sm:$0x1] }
  0x55   : > { %v425_v6 = vrot.slane %v423_v58, 4  ;;  %6109 = vmatmul.mubr.msk.bf16.gmra.mrb[8].mxu1 %vm699_vm3, %v5248_v59  ;;  %v2202_v17 = vsel %vm7085_vm4, %v2197_v61, %v2201_v42  ;;  %v416_v11 = vor.u32 %v415_v2, %v412_v57  ;;  %v2217_v13 = vshll.u32 %v5439_v53, 16  ;;  %v5442_v53 = vld [vmem:[%s7059_s13 + $0x60] sm:$0xf]  ;;  %v7273_v59 = vld [vmem:[%s7059_s13 + $0x64] sm:$0xf] }
  0x56   : > { %v2207_v10 = vrot.slane %v2206_v0, 4  ;;  %v431_v18 = vrot.slane %v429_v7, 5  ;;  %v2216_v19 = vrot.slane %v2214_v9, 4  ;;  %v2223_v21 = vshll.u32 %v7243_v4, 16  ;;  %v7280_v9 = vld [vmem:[%s7059_s13 + $0x68] sm:$0x1] }
  0x57   : > { %v426_v14 = vor.u32 %v425_v6, %v421_v5  ;;  %v417_v29 = vrot.slane %v416_v11, 4  ;;  %v2219_v31 = vrot.slane %v2217_v13, 5  ;;  %v2227_v35 = vshrl.u32 %v7243_v4, 16 }
  0x58   : > { %v2212_v25 = vsel %vm7085_vm4, %v2207_v10, %v2211_v56  ;;  %v2225_v42 = vrot.slane %v2223_v21, 5  ;;  %v2233_v43 = vshll.u32 %v7249_v12, 16  ;;  %v434_v48 = vshrl.u32 %v7253_v24, 16 }
  0x59   : > { %v5475_v38 = vcombine.low %v2202_v17, %v2212_v25  ;;  %v427_v39 = vrot.slane %v426_v14, 4  ;;  %v422_v44 = vsel %vm7085_vm4, %v417_v29, %v421_v5  ;;  %v2220_v45 = vor.u32 %v2219_v31, %v2216_v19  ;;  %v7284_v19 = vld [vmem:[%s7059_s13 + $0x60] sm:$0xf] }
  0x5a   : > { %v2229_v47 = vrot.slane %v2227_v35, 4  ;;  %v2235_v50 = vrot.slane %v2233_v43, 5  ;;  %v437_v51 = vshll.u32 %v7253_v24, 16  ;;  %v443_v52 = vshll.u32 %v7259_v37, 16  ;;  %v7290_v35 = vld [vmem:[%s7059_s13 + $0x64] sm:$0xf] }
  0x5b   : > { %6245 = vmatmul.mubr.msk.bf16.gmra.mrb[8].mxu0 %vm699_vm3, %v5475_v38  ;;  %v432_v49 = vsel %vm7085_vm4, %v427_v39, %v431_v18  ;;  %v2221_v56 = vrot.slane %v2220_v45, 4  ;;  %v436_v58 = vrot.slane %v434_v48, 4  ;;  %v447_v2 = vshrl.u32 %v7259_v37, 16 }
  0x5c   : > { %v5249_v55 = vcombine.low %v422_v44, %v432_v49  ;;  %v2230_v57 = vor.u32 %v2229_v47, %v2225_v42  ;;  %v439_v61 = vrot.slane %v437_v51, 5  ;;  %v445_v0 = vrot.slane %v443_v52, 5 }
  0x5d   : > { %v453_v5 = vshll.u32 %v253_v26, 16  ;;  %v2226_v6 = vsel %vm7085_vm4, %v2221_v56, %v2225_v42  ;;  %v2238_v17 = vshrl.u32 %v5442_v53, 16  ;;  %v2241_v10 = vshll.u32 %v5442_v53, 16 }
  0x5e   : > { %6112 = vmatprep.mubr.msk.bf16.mxu1 %vm699_vm3, %v5249_v55  ;;  %v2231_v7 = vrot.slane %v2230_v57, 4  ;;  %v440_v11 = vor.u32 %v439_v61, %v436_v58  ;;  %v449_v13 = vrot.slane %v447_v2, 4  ;;  %v2247_v18 = vshll.u32 %v7273_v59, 16  ;;  %v5502_v58 = vld [vmem:[%s7059_s13 + $0xc] sm:$0xe] }
  0x5f   : > { %v455_v14 = vrot.slane %v453_v5, 5  ;;  %v2240_v25 = vrot.slane %v2238_v17, 4  ;;  %v2243_v29 = vrot.slane %v2241_v10, 5  ;;  %v2251_v31 = vshrl.u32 %v7273_v59, 16 }
  0x60   : > { %v2236_v21 = vsel %vm7085_vm4, %v2231_v7, %v2235_v50  ;;  %v441_v39 = vrot.slane %v440_v11, 4  ;;  %v450_v42 = vor.u32 %v449_v13, %v445_v0  ;;  %v2249_v43 = vrot.slane %v2247_v18, 5  ;;  %v254_v50 = vld [vmem:[%s7059_s13 + $0x68] sm:$0x1] }
  0x61   : > { %v5476_v38 = vcombine.low %v2226_v6, %v2236_v21  ;;  %v2244_v44 = vor.u32 %v2243_v29, %v2240_v25  ;;  %v2253_v45 = vrot.slane %v2251_v31, 4  ;;  %v2257_v47 = vshll.u32 %v7280_v9, 16  ;;  %v7318_v29 = vld [vmem:[%s7059_s13 + $0x70] sm:$0xf] }
  0x62   : > { %v458_v26 = vshrl.u32 %v7284_v19, 16  ;;  %v446_v48 = vsel %vm7085_vm4, %v441_v39, %v445_v0  ;;  %v451_v49 = vrot.slane %v450_v42, 4  ;;  %v461_v51 = vshll.u32 %v7284_v19, 16  ;;  %v7305_v0 = vld [vmem:[%s7059_s13 + $0x6c] sm:$0xf] }
  0x63   : > { %6248 = vmatprep.mubr.msk.bf16.mxu0 %vm699_vm3, %v5476_v38  ;;  %v467_v52 = vshll.u32 %v7290_v35, 16  ;;  %v2245_v53 = vrot.slane %v2244_v44, 4  ;;  %v2254_v55 = vor.u32 %v2253_v45, %v2249_v43  ;;  %v2259_v56 = vrot.slane %v2257_v47, 5 }
  0x64   : > { %v460_v57 = vrot.slane %v458_v26, 4  ;;  %v456_v61 = vsel %vm7085_vm4, %v451_v49, %v455_v14  ;;  %v463_v2 = vrot.slane %v461_v51, 5  ;;  %v471_v6 = vshrl.u32 %v7290_v35, 16  ;;  %v255_v26 = vld [vmem:[%s7059_s13 + $0x74] sm:$0x1] }
  0x65   : > { %v469_v5 = vrot.slane %v467_v52, 5  ;;  %v5250_v7 = vcombine.low %v446_v48, %v456_v61  ;;  %v2250_v17 = vsel %vm7085_vm4, %v2245_v53, %v2249_v43  ;;  %v2255_v10 = vrot.slane %v2254_v55, 4  ;;  %v5503_v48 = vld [vmem:[%s7059_s13 + $0x18] sm:$0xe] }
  0x66   : > { %v477_v11 = vshll.u32 %v254_v50, 16  ;;  %v464_v14 = vor.u32 %v463_v2, %v460_v57  ;;  %v473_v18 = vrot.slane %v471_v6, 4  ;;  %v5518_v21 = vrot.slane %v5502_v58, 9  ;;  %v7337_v53 = vld [vmem:[%s7059_s13 + $0x78] sm:$0xf] }
  0x67   : > { %v2815_v25 = vrot.slane %v2813_v62, 4  ;;  %6113 = vmatmul.mubr.msk.bf16.gmra.mrb[12].mxu1 %vm699_vm3, %v5250_v7  ;;  %v2260_v31 = vsel %vm7085_vm4, %v2255_v10, %v2259_v56  ;;  %v482_v39 = vshrl.u32 %v7305_v0, 16  ;;  %v485_v42 = vshll.u32 %v7305_v0, 16  ;;  %v256_v57 = vld [vmem:[%s7059_s13 + $0x80] sm:$0x1] }
  0x68   : > { %v479_v38 = vrot.slane %v477_v11, 5  ;;  %v5477_v43 = vcombine.low %v2250_v17, %v2260_v31  ;;  %v465_v44 = vrot.slane %v464_v14, 4  ;;  %v474_v45 = vor.u32 %v473_v18, %v469_v5  ;;  %v5504_v10 = vld [vmem:[%s7059_s13 + $0x24] sm:$0xe] }
  0x69   : > { %v2814_v47 = vsel %vm7311_vm7, %v5518_v21, %v2813_v62  ;;  %v2817_v49 = vsel %vm7311_vm7, %v2815_v25, %v2816_v63  ;;  %v484_v50 = vrot.slane %v482_v39, 4  ;;  %v487_v51 = vrot.slane %v485_v42, 5  ;;  %v7363_v39 = vld [vmem:[%s7059_s13 + $0x84] sm:$0xf] }
  0x6a   : > { %v491_v52 = vshll.u32 %v7318_v29, 16  ;;  %6249 = vmatmul.mubr.msk.bf16.gmra.mrb[12].mxu0 %vm699_vm3, %v5477_v43  ;;  %v470_v15 = vsel %vm7085_vm4, %v465_v44, %v469_v5  ;;  %v475_v62 = vrot.slane %v474_v45, 4  ;;  %v5535_v55 = vcombine.low %v2814_v47, %v2817_v49  ;;  %v7371_v43 = vld [vmem:[%s7059_s13 + $0x88] sm:$0xf] }
  0x6b   : > { %v495_v56 = vshrl.u32 %v7318_v29, 16  ;;  %v488_v63 = vor.u32 %v487_v51, %v484_v50  ;;  %v501_v61 = vshll.u32 %v255_v26, 16  ;;  %v5519_v2 = vrot.slane %v5503_v48, 9 }
  0x6c   : > { %v493_v58 = vrot.slane %v491_v52, 5  ;;  %v480_v6 = vsel %vm7085_vm4, %v475_v62, %v479_v38  ;;  %6270 = vmatprep.mubr.msk.bf16.mxu0 %vm699_vm3, %v5535_v55  ;;  %v2824_v5 = vsel %vm7311_vm7, %v7128_v30, %v2823_v28  ;;  %v506_v17 = vshrl.u32 %v7337_v53, 16  ;;  %v257_v52 = vld [vmem:[%s7059_s13 + $0x8c] sm:$0x1] }
  0x6d   : > { %v497_v7 = vrot.slane %v495_v56, 4  ;;  %v5251_v11 = vcombine.low %v470_v15, %v480_v6  ;;  %v489_v14 = vrot.slane %v488_v63, 4  ;;  %v503_v18 = vrot.slane %v501_v61, 5 }
  0x6e   : > { %v2821_v21 = vsel %vm7311_vm7, %v5519_v2, %v2820_v22  ;;  %v508_v38 = vrot.slane %v506_v17, 4  ;;  %v509_v1 = vshll.u32 %v7337_v53, 16  ;;  %v515_v30 = vshll.u32 %v7344_v16, 16  ;;  %v7376_v22 = vld [vmem:[%s9098_s1 + $0xe] sm:$0x3] }
  0x6f   : > { %v498_v25 = vor.u32 %v497_v7, %v493_v58  ;;  %v5536_v31 = vcombine.low %v2821_v21, %v2824_v5  ;;  %6116 = vmatprep.mubr.msk.bf16.mxu1 %vm699_vm3, %v5251_v11  ;;  %v494_v28 = vsel %vm7085_vm4, %v489_v14, %v493_v58  ;;  %v519_v60 = vshrl.u32 %v7344_v16, 16  ;;  %v7395_v5 = vld [vmem:[%s7059_s13 + $0x90] sm:$0xf] }
  0x70   : > { %v525_v42 = vshll.u32 %v256_v57, 16  ;;  %v511_v45 = vrot.slane %v509_v1, 5  ;;  %v5520_v47 = vrot.slane %v5504_v10, 9  ;;  %v2827_v26 = vrot.slane %v7135_v46, 5  ;;  %v5505_v57 = vld [vmem:[%s7059_s13 + $0x30] sm:$0xe] }
  0x71   : > { %v499_v44 = vrot.slane %v498_v25, 4  ;;  %v517_v48 = vrot.slane %v515_v30, 5  ;;  %v521_v49 = vrot.slane %v519_v60, 4  ;;  %v2830_v51 = vrot.slane %v7144_v54, 5  ;;  %v7407_v30 = vld [vmem:[%s7059_s13 + $0x94] sm:$0xf] }
  0x72   : > { %v527_v50 = vrot.slane %v525_v42, 5  ;;  %6271 = vmatmul.mubr.msk.bf16.vlgmr.msra.gmra.mrb[0].mxu0 %vm699_vm3, %v5536_v31  ;;  %v512_v62 = vor.u32 %v511_v45, %v508_v38  ;;  %v2828_v55 = vsel %vm7311_vm7, %v5520_v47, %v2827_v26  ;;  %v2829_v56 = vrot.slane %v2827_v26, 4  ;;  %v258_v60 = vld [vmem:[%s7059_s13 + $0x98] sm:$0x1]  ;;  %v5506_v26 = vld [vmem:[%s7059_s13 + $0x3c] sm:$0xe] }
  0x73   : > { %v504_v15 = vsel %vm7085_vm4, %v499_v44, %v503_v18  ;;  %6303 = vmatpush3.bf16.msra.mxu0 %v7095_v41  ;;  %v522_v46 = vor.u32 %v521_v49, %v517_v48  ;;  %v530_v58 = vshrl.u32 %v7363_v39, 16  ;;  %v533_v54 = vshll.u32 %v7363_v39, 16 }
  0x74   : > { %v5252_v63 = vcombine.low %v494_v28, %v504_v15  ;;  %v513_v61 = vrot.slane %v512_v62, 4  ;;  %v2831_v2 = vsel %vm7311_vm7, %v2829_v56, %v2830_v51  ;;  %v539_v6 = vshll.u32 %v7371_v43, 16  ;;  %6670 = vmatprep.subr.msk.bf16.mxu0 %vm748_vm0, %v7376_v22 }
  0x75   : > { %v543_v7 = vshrl.u32 %v7371_v43, 16  ;;  %v523_v41 = vrot.slane %v522_v46, 4  ;;  %v5537_v17 = vcombine.low %v2828_v55, %v2831_v2  ;;  %v532_v10 = vrot.slane %v530_v58, 4  ;;  %v7427_v46 = vld [vmem:[%s7059_s13 + $0xa0] sm:$0xf] }
  0x76   : > { %6117 = vmatmul.mubr.msk.bf16.gmra.mrb[16].mxu1 %vm699_vm3, %v5252_v63  ;;  %v535_v11 = vrot.slane %v533_v54, 5  ;;  %v518_v14 = vsel %vm7085_vm4, %v513_v61, %v517_v48  ;;  %v541_v18 = vrot.slane %v539_v6, 5  ;;  %v549_v25 = vshll.u32 %v257_v52, 16  ;;  %v7416_v52 = vld [vmem:[%s7059_s13 + $0x9c] sm:$0xf] }
  0x77   : > { %v545_v21 = vrot.slane %v543_v7, 4  ;;  %v528_v31 = vsel %vm7085_vm4, %v523_v41, %v527_v50  ;;  %6274 = vmatprep.mubr.msk.bf16.mxu0 %vm699_vm3, %v5537_v17  ;;  %v5521_v1 = vrot.slane %v5505_v57, 9  ;;  %v2834_v28 = vrot.slane %v7164_v33, 5 }
  0x78   : > { %v536_v38 = vor.u32 %v535_v11, %v532_v10  ;;  %v5253_v42 = vcombine.low %v518_v14, %v528_v31  ;;  %v551_v45 = vrot.slane %v549_v25, 5  ;;  %v2837_v47 = vrot.slane %v7172_v40, 5  ;;  %v259_v10 = vld [vmem:[%s7059_s13 + $0xa4] sm:$0x1]  ;;  %v5507_v11 = vld [vmem:[%s7059_s13 + $0x48] sm:$0xe] }
  0x79   : > { %v546_v44 = vor.u32 %v545_v21, %v541_v18  ;;  %v2835_v49 = vsel %vm7311_vm7, %v5521_v1, %v2834_v28  ;;  %v2836_v50 = vrot.slane %v2834_v28, 4  ;;  %v554_v51 = vshrl.u32 %v7395_v5, 16 }
  0x7a   : > { %v537_v48 = vrot.slane %v536_v38, 4  ;;  %6120 = vmatprep.mubr.msk.bf16.mxu1 %vm699_vm3, %v5253_v42  ;;  %v557_v15 = vshll.u32 %v7395_v5, 16  ;;  %v563_v62 = vshll.u32 %v7407_v30, 16  ;;  %v567_v40 = vshrl.u32 %v7407_v30, 16 }
  0x7b   : > { %v547_v33 = vrot.slane %v546_v44, 4  ;;  %v2838_v56 = vsel %vm7311_vm7, %v2836_v50, %v2837_v47  ;;  %v556_v57 = vrot.slane %v554_v51, 4  ;;  %v573_v63 = vshll.u32 %v258_v60, 16 }
  0x7c   : > { %v542_v55 = vsel %vm7085_vm4, %v537_v48, %v541_v18  ;;  %v5538_v54 = vcombine.low %v2835_v49, %v2838_v56  ;;  %v559_v61 = vrot.slane %v557_v15, 5  ;;  %v565_v2 = vrot.slane %v563_v62, 5  ;;  %v7453_v56 = vld [vmem:[%s7059_s13 + $0xac] sm:$0xf] }
  0x7d   : > { %v552_v58 = vsel %vm7085_vm4, %v547_v33, %v551_v45  ;;  %v569_v7 = vrot.slane %v567_v40, 4  ;;  %v575_v41 = vrot.slane %v573_v63, 5  ;;  %v5522_v17 = vrot.slane %v5506_v26, 9  ;;  %v7448_v33 = vld [vmem:[%s7059_s13 + $0xa8] sm:$0xf] }
  0x7e   : > { %v5254_v6 = vcombine.low %v542_v55, %v552_v58  ;;  %6275 = vmatmul.mubr.msk.bf16.gmra.mrb[4].mxu0 %vm699_vm3, %v5538_v54  ;;  %v560_v14 = vor.u32 %v559_v61, %v556_v57  ;;  %v2841_v18 = vrot.slane %v7189_v20, 5  ;;  %v2844_v21 = vrot.slane %v7194_v34, 5  ;;  %v260_v61 = vld [vmem:[%s7059_s13 + $0xb0] sm:$0x1] }
  0x7f   : > { %v578_v25 = vshrl.u32 %v7416_v52, 16  ;;  %v570_v31 = vor.u32 %v569_v7, %v565_v2  ;;  %v581_v38 = vshll.u32 %v7416_v52, 16  ;;  %v587_v1 = vshll.u32 %v7427_v46, 16 }
  0x80   : > { %6121 = vmatmul.mubr.msk.bf16.gmra.mrb[20].mxu1 %vm699_vm3, %v5254_v6  ;;  %v591_v28 = vshrl.u32 %v7427_v46, 16  ;;  %v561_v60 = vrot.slane %v560_v14, 4  ;;  %v2842_v42 = vsel %vm7311_vm7, %v5522_v17, %v2841_v18  ;;  %v2843_v20 = vrot.slane %v2841_v18, 4  ;;  %v7468_v14 = vld [vmem:[%s7059_s13 + $0xb4] sm:$0xf] }
  0x81   : > { %v580_v44 = vrot.slane %v578_v25, 4  ;;  %v571_v34 = vrot.slane %v570_v31, 4  ;;  %v583_v45 = vrot.slane %v581_v38, 5  ;;  %v589_v47 = vrot.slane %v587_v1, 5 }
  0x82   : > { %v593_v26 = vrot.slane %v591_v28, 4  ;;  %v566_v48 = vsel %vm7085_vm4, %v561_v60, %v565_v2  ;;  %v2845_v49 = vsel %vm7311_vm7, %v2843_v20, %v2844_v21  ;;  %v597_v50 = vshll.u32 %v259_v10, 16  ;;  %v5508_v2 = vld [vmem:[%s7059_s13 + $0x54] sm:$0xe] }
  0x83   : > { %v5523_v51 = vrot.slane %v5507_v11, 9  ;;  %v576_v15 = vsel %vm7085_vm4, %v571_v34, %v575_v41  ;;  %v5539_v62 = vcombine.low %v2842_v42, %v2845_v49  ;;  %v584_v40 = vor.u32 %v583_v45, %v580_v44  ;;  %v7477_v42 = vld [vmem:[%s7059_s13 + $0xb8] sm:$0xf]  ;;  %v261_v49 = vld [vmem:[%s7059_s13 + $0xbc] sm:$0x1] }
  0x84   : > { %v594_v55 = vor.u32 %v593_v26, %v589_v47  ;;  %v5255_v57 = vcombine.low %v566_v48, %v576_v15  ;;  %v599_v63 = vrot.slane %v597_v50, 5  ;;  %v2848_v58 = vrot.slane %v7212_v8, 5 }
  0x85   : > { %v2851_v54 = vrot.slane %v7220_v23, 5  ;;  %6278 = vmatprep.mubr.msk.bf16.mxu0 %vm699_vm3, %v5539_v62  ;;  %v585_v6 = vrot.slane %v584_v40, 4  ;;  %v602_v41 = vshrl.u32 %v7448_v33, 16  ;;  %v605_v17 = vshll.u32 %v7448_v33, 16 }
  0x86   : > { %v595_v7 = vrot.slane %v594_v55, 4  ;;  %6124 = vmatprep.mubr.msk.bf16.mxu1 %vm699_vm3, %v5255_v57  ;;  %v2849_v10 = vsel %vm7311_vm7, %v5523_v51, %v2848_v58  ;;  %v2850_v11 = vrot.slane %v2848_v58, 4  ;;  %v611_v8 = vshll.u32 %v7453_v56, 16  ;;  %v5509_v55 = vld [vmem:[%s7059_s13 + $0x60] sm:$0xe] }
  0x87   : > { %v615_v23 = vshrl.u32 %v7453_v56, 16  ;;  %v590_v18 = vsel %vm7085_vm4, %v585_v6, %v589_v47  ;;  %v604_v25 = vrot.slane %v602_v41, 4  ;;  %v607_v31 = vrot.slane %v605_v17, 5  ;;  %v5510_v6 = vld [vmem:[%s7059_s13 + $0x6c] sm:$0xe] }
  0x88   : > { %v600_v21 = vsel %vm7085_vm4, %v595_v7, %v599_v63  ;;  %v2852_v1 = vsel %vm7311_vm7, %v2850_v11, %v2851_v54  ;;  %v613_v28 = vrot.slane %v611_v8, 5  ;;  %v621_v34 = vshll.u32 %v260_v61, 16  ;;  %v5446_v11 = vld [vmem:[%s7059_s13 + $0x70] sm:$0xf]  ;;  %v5447_v8 = vld [vmem:[%s7059_s13 + $0x74] sm:$0x1] }
  0x89   : > { %v5256_v38 = vcombine.low %v590_v18, %v600_v21  ;;  %v617_v60 = vrot.slane %v615_v23, 4  ;;  %v5540_v20 = vcombine.low %v2849_v10, %v2852_v1  ;;  %v608_v44 = vor.u32 %v607_v31, %v604_v25 }
  0x8a   : > { %v5524_v45 = vrot.slane %v5508_v2, 9  ;;  %v2855_v26 = vrot.slane %v7243_v4, 5  ;;  %v2858_v48 = vrot.slane %v7249_v12, 5  ;;  %v626_v50 = vshrl.u32 %v7468_v14, 16 }
  0x8b   : > { %6125 = vmatmul.mubr.msk.bf16.gmra.mrb[24].mxu1 %vm699_vm3, %v5256_v38  ;;  %v618_v47 = vor.u32 %v617_v60, %v613_v28  ;;  %6279 = vmatmul.mubr.msk.bf16.gmra.mrb[8].mxu0 %vm699_vm3, %v5540_v20  ;;  %v609_v51 = vrot.slane %v608_v44, 4  ;;  %v623_v15 = vrot.slane %v621_v34, 5  ;;  %v629_v62 = vshll.u32 %v7468_v14, 16 }
  0x8c   : > { %v635_v40 = vshll.u32 %v7477_v42, 16  ;;  %v2856_v4 = vsel %vm7311_vm7, %v5524_v45, %v2855_v26  ;;  %v2857_v12 = vrot.slane %v2855_v26, 4  ;;  %v628_v63 = vrot.slane %v626_v50, 4 }
  0x8d   : > { %v619_v57 = vrot.slane %v618_v47, 4  ;;  %v614_v58 = vsel %vm7085_vm4, %v609_v51, %v613_v28  ;;  %v631_v54 = vrot.slane %v629_v62, 5  ;;  %v639_v2 = vshrl.u32 %v7477_v42, 16  ;;  %v5511_v47 = vld [vmem:[%s7059_s13 + $0x78] sm:$0xe] }
  0x8e   : > { %v637_v61 = vrot.slane %v635_v40, 5  ;;  %v2859_v41 = vsel %vm7311_vm7, %v2857_v12, %v2858_v48  ;;  %v645_v17 = vshll.u32 %v261_v49, 16  ;;  %v5525_v10 = vrot.slane %v5509_v55, 9  ;;  %v6772_v51 = vld [vmem:[%s7059_s13] sm:$0xf] }
  0x8f   : > { %v624_v7 = vsel %vm7085_vm4, %v619_v57, %v623_v15  ;;  %v5541_v18 = vcombine.low %v2856_v4, %v2859_v41  ;;  %v632_v21 = vor.u32 %v631_v54, %v628_v63  ;;  %v641_v25 = vrot.slane %v639_v2, 4  ;;  %v7515_v15 = vld [vmem:[%s7059_s13 + $0x4] sm:$0xf]  ;;  %v7519_v40 = vld [vmem:[%s7059_s13 + $0x7c] sm:$0xf] }
  0x90   : > { %v5257_v23 = vcombine.low %v614_v58, %v624_v7  ;;  %v647_v31 = vrot.slane %v645_v17, 5  ;;  %v2862_v38 = vrot.slane %v7273_v59, 5  ;;  %v2865_v1 = vrot.slane %v7280_v9, 5  ;;  %v7522_v55 = vld [vmem:[%s7059_s13 + $0x80] sm:$0x1] }
  0x91   : > { %v5526_v28 = vrot.slane %v5510_v6, 9  ;;  %6282 = vmatprep.mubr.msk.bf16.mxu0 %vm699_vm3, %v5541_v18  ;;  %v633_v60 = vrot.slane %v632_v21, 4  ;;  %v642_v20 = vor.u32 %v641_v25, %v637_v61  ;;  %v2869_v44 = vrot.slane %v5446_v11, 5  ;;  %v5452_v57 = vld [vmem:[%s7059_s13 + $0x88] sm:$0xf] }
  0x92   : > { %6128 = vmatprep.mubr.msk.bf16.mxu1 %vm699_vm3, %v5257_v23  ;;  %v2872_v34 = vrot.slane %v5447_v8, 5  ;;  %v2863_v45 = vsel %vm7311_vm7, %v5525_v10, %v2862_v38  ;;  %v2864_v59 = vrot.slane %v2862_v38, 4  ;;  %v5275_v62 = vcombine.low %v6772_v51, %v7515_v15  ;;  %v5453_v54 = vld [vmem:[%s7059_s13 + $0x8c] sm:$0x1]  ;;  %v5455_v17 = vld [vmem:[%s7059_s13 + $0x94] sm:$0xf] }
  0x93   : > { %v638_v9 = vsel %vm7085_vm4, %v633_v60, %v637_v61  ;;  %v643_v26 = vrot.slane %v642_v20, 4  ;;  %v2870_v48 = vsel %vm7311_vm7, %v5526_v28, %v2869_v44  ;;  %v2871_v49 = vrot.slane %v2869_v44, 4  ;;  %v5512_v61 = vld [vmem:[%s7059_s13 + $0x84] sm:$0xe]  ;;  %v5513_v23 = vld [vmem:[%s7059_s13 + $0x90] sm:$0xe] }
  0x94   : > { %v2866_v50 = vsel %vm7311_vm7, %v2864_v59, %v2865_v1  ;;  %v5527_v58 = vrot.slane %v5511_v47, 9  ;;  %v2876_v7 = vrot.slane %v7519_v40, 5  ;;  %v2879_v41 = vrot.slane %v7522_v55, 5  ;;  %v5456_v25 = vld [vmem:[%s7059_s13 + $0x98] sm:$0x1] }
  0x95   : > { %v648_v4 = vsel %vm7085_vm4, %v643_v26, %v647_v31  ;;  %v5542_v12 = vcombine.low %v2863_v45, %v2866_v50  ;;  %v2873_v63 = vsel %vm7311_vm7, %v2871_v49, %v2872_v34  ;;  %v5528_v10 = vrot.slane %v5512_v61, 9  ;;  %v5458_v31 = vld [vmem:[%s7059_s13 + $0xa0] sm:$0xf]  ;;  %v5459_v60 = vld [vmem:[%s7059_s13 + $0xa4] sm:$0x1] }
  0x96   : > { %v5258_v2 = vcombine.low %v638_v9, %v648_v4  ;;  %v5543_v6 = vcombine.low %v2870_v48, %v2873_v63  ;;  %v2883_v11 = vrot.slane %v5452_v57, 5  ;;  %v2886_v8 = vrot.slane %v5453_v54, 5  ;;  %v5514_v20 = vld [vmem:[%s7059_s13 + $0x9c] sm:$0xe]  ;;  %v6774_v44 = vld [vmem:[%s7059_s13 + $0xc] sm:$0xf] }
  0x97   : > { %6283 = vmatmul.mubr.msk.bf16.gmra.mrb[12].mxu0 %vm699_vm3, %v5542_v12  ;;  %v2877_v18 = vsel %vm7311_vm7, %v5527_v58, %v2876_v7  ;;  %v2878_v21 = vrot.slane %v2876_v7, 4  ;;  %v2890_v28 = vrot.slane %v5455_v17, 5  ;;  %v7549_v34 = vld [vmem:[%s7059_s13 + $0x10] sm:$0xf]  ;;  %v6776_v47 = vld [vmem:[%s7059_s13 + $0x18] sm:$0xf] }
  0x98   : > { %6129 = vmatmul.mubr.msk.bf16.gmra.mrb[28].mxu1 %vm699_vm3, %v5258_v2  ;;  %6286 = vmatprep.mubr.msk.bf16.mxu0 %vm699_vm3, %v5543_v6  ;;  %v2884_v38 = vsel %vm7311_vm7, %v5528_v10, %v2883_v11  ;;  %v2885_v1 = vrot.slane %v2883_v11, 4  ;;  %v5276_v45 = vcombine.low %v6774_v44, %v7549_v34  ;;  %v7556_v9 = vld [vmem:[%s7059_s13 + $0x1c] sm:$0xf]  ;;  %v5529_v48 = vrot.slane %v5513_v23, 9  ;;  %v5461_v57 = vld [vmem:[%s7059_s13 + $0xac] sm:$0xf] }
  0x99   : > { %6134 = vmatprep.mubr.msk.bf16.mxu1 %vm699_vm3, %v5275_v62  ;;  %v2880_v59 = vsel %vm7311_vm7, %v2878_v21, %v2879_v41  ;;  %v5277_v26 = vcombine.low %v6776_v47, %v7556_v9  ;;  %v2892_v51 = vrot.slane %v2890_v28, 4  ;;  %v2893_v62 = vrot.slane %v5456_v25, 5  ;;  %v6778_v54 = vld [vmem:[%s9098_s1 + $0x4] sm:$0x3]  ;;  %v5464_v2 = vld [vmem:[%s7059_s13 + $0xb8] sm:$0xf] }
  0x9a   : > { %v5544_v49 = vcombine.low %v2877_v18, %v2880_v59  ;;  %v2887_v50 = vsel %vm7311_vm7, %v2885_v1, %v2886_v8  ;;  %v5530_v12 = vrot.slane %v5514_v20, 9  ;;  %v2897_v63 = vrot.slane %v5458_v31, 5  ;;  %v7571_v7 = vld [vmem:[%s9098_s1 + $0x6] sm:$0x3]  ;;  %v5462_v10 = vld [vmem:[%s7059_s13 + $0xb0] sm:$0x1] }
  0x9b   : > { %v5545_v4 = vcombine.low %v2884_v38, %v2887_v50  ;;  %v2900_v58 = vrot.slane %v5459_v60, 5  ;;  %v1467_v61 = vsel %vm748_vm0, %v6778_v54, 0  ;;  %v2891_v41 = vsel %vm7311_vm7, %v5529_v48, %v2890_v28  ;;  %v5515_v11 = vld [vmem:[%s7059_s13 + $0xa8] sm:$0xe]  ;;  %v5465_v25 = vld [vmem:[%s7059_s13 + $0xbc] sm:$0x1] }
  0x9c   : > { %v2899_v6 = vrot.slane %v2897_v63, 4  ;;  %v2894_v17 = vsel %vm7311_vm7, %v2892_v51, %v2893_v62  ;;  %v2904_v8 = vrot.slane %v5461_v57, 5  ;;  %v2898_v23 = vsel %vm7311_vm7, %v5530_v12, %v2897_v63  ;;  %v5516_v31 = vld [vmem:[%s7059_s13 + $0xb4] sm:$0xe]  ;;  %v6779_v38 = vld [vmem:[%s7059_s13 + $0x24] sm:$0xf] }
  0x9d   : > { %v2911_v21 = vrot.slane %v5464_v2, 5  ;;  %v7592_v1 = vld [vmem:[%s7059_s13 + $0x28] sm:$0xf]  ;;  %v5546_v60 = vcombine.low %v2891_v41, %v2894_v17  ;;  %v5531_v44 = vrot.slane %v5515_v11, 9  ;;  %v2907_v59 = vrot.slane %v5462_v10, 5 }
  0x9e   : > { %v2901_v18 = vsel %vm7311_vm7, %v2899_v6, %v2900_v58  ;;  %v5278_v28 = vcombine.low %v6779_v38, %v7592_v1  ;;  %v6781_v47 = vld [vmem:[%s7059_s13 + $0x30] sm:$0xf]  ;;  %v2914_v51 = vrot.slane %v5465_v25, 5  ;;  %v5467_v62 = vld [vmem:[%s7059_s13 + $0xc4] sm:$0xf]  ;;  %v2299_v25 = vshrl.u32 %v7519_v40, 16 }
  0x9f   : > { %6287 = vmatmul.mubr.msk.bf16.gmra.mrb[16].mxu0 %vm699_vm3, %v5544_v49  ;;  %v5547_v20 = vcombine.low %v2898_v23, %v2901_v18  ;;  %v5532_v49 = vrot.slane %v5516_v31, 9  ;;  %v2913_v50 = vrot.slane %v2911_v21, 4  ;;  %v2905_v57 = vsel %vm7311_vm7, %v5531_v44, %v2904_v8  ;;  %v5517_v12 = vld [vmem:[%s7059_s13 + $0xc0] sm:$0xe]  ;;  %v6783_v41 = vld [vmem:[%s7059_s13 + $0x3c] sm:$0xf] }
  0xa0   : > { %6135 = vmatmul.mubr.msk.bf16.vlgmr.msra.gmra.mrb[0].mxu1 %vm699_vm3, %v5276_v45  ;;  %6290 = vmatprep.mubr.msk.bf16.mxu0 %vm699_vm3, %v5545_v4  ;;  %v2906_v45 = vrot.slane %v2904_v8, 4  ;;  %v2918_v63 = vrot.slane %v5467_v62, 5  ;;  %v5533_v6 = vrot.slane %v5517_v12, 9  ;;  %v7617_v17 = vld [vmem:[%s7059_s13 + $0x40] sm:$0xf]  ;;  %v5281_v18 = vcombine.low %v7224_v27, %v7227_v36  ;;  %v6735_v62 = vld [vmem:[%s7059_s13 + $0x24] sm:$0xff]  }
  0xa1   : > { %6167 = vmatpush3.bf16.msra.mxu1 %v1467_v61  ;;  %6138 = vmatprep.mubr.msk.bf16.mxu1 %vm699_vm3, %v5277_v26  ;;  %v7597_v26 = vld [vmem:[%s7059_s13 + $0x34] sm:$0xf]  ;;  %v2912_v58 = vsel %vm7311_vm7, %v5532_v49, %v2911_v21  ;;  %v2915_v54 = vsel %vm7311_vm7, %v2913_v50, %v2914_v51  ;;  %v5468_v61 = vld [vmem:[%s7059_s13 + $0xc8] sm:$0x1]  ;;  %v5280_v10 = vcombine.low %v6783_v41, %v7617_v17  ;;  %v2295_v21 = vshll.u32 %v7519_v40, 16 }
  0xa2   : > { %6665 = vmatprep.subr.msk.bf16.mxu1 %vm748_vm0, %v7571_v7  ;;  %v5279_v48 = vcombine.low %v6781_v47, %v7597_v26  ;;  %v2908_v4 = vsel %vm7311_vm7, %v2906_v45, %v2907_v59  ;;  %v5549_v11 = vcombine.low %v2912_v58, %v2915_v54  ;;  %v2920_v8 = vrot.slane %v2918_v63, 4  ;;  %v1205_v45 = vld [vmem:[%s7059_s13] sm:$0xe]  ;;  %v1206_v59 = vld [vmem:[%s7059_s13 + $0xc] sm:$0xe] }
  0xa3   : > { %v5548_v2 = vcombine.low %v2905_v57, %v2908_v4  ;;  %v2921_v23 = vrot.slane %v5468_v61, 5  ;;  %v2919_v31 = vsel %vm7311_vm7, %v5533_v6, %v2918_v63  ;;  %v7632_v27 = vrot.slane %v2295_v21, 5  ;;  %v1209_v41 = vld [vmem:[%s7059_s13 + $0x30] sm:$0xe] }
  0xa4   : > { %v2301_v36 = vrot.slane %v2299_v25, 4  ;;  %v5283_v44 = vcombine.low %v7284_v19, %v7290_v35  ;;  %v2305_v47 = vshll.u32 %v7522_v55, 16  ;;  %v5307_v19 = vrot.slane %v1205_v45, 9 }
  0xa5   : > { %v2922_v38 = vsel %vm7311_vm7, %v2920_v8, %v2921_v23  ;;  %9122 = vst [vmem:[#allocation10_spill] sm:$0xff] %v7632_v27  ;;  %v5308_v35 = vrot.slane %v1206_v59, 9  ;;  %v1272_v4 = vrot.slane %v7556_v9, 5  ;;  %v1279_v12 = vrot.slane %v7592_v1, 5  ;;  %v1210_v8 = vld [vmem:[%s7059_s13 + $0x3c] sm:$0xe] }
  0xa6   : > { %v5550_v40 = vcombine.low %v2919_v31, %v2922_v38  ;;  %v2302_v49 = vor.u32 %v2301_v36, %v7632_v27  ;;  %v7652_v51 = vrot.slane %v2305_v47, 5  ;;  %v5284_v58 = vcombine.low %v7305_v0, %v7318_v29  ;;  %v1211_v31 = vld [vmem:[%s7059_s13 + $0x48] sm:$0xe]  ;;  %v6789_v59 = vld [vmem:[%s7059_s13 + $0x38] sm:$0x1] }
  0xa7   : > { %6291 = vmatmul.mubr.msk.bf16.gmra.mrb[20].mxu0 %vm699_vm3, %v5546_v60  ;;  %v5282_v60 = vcombine.low %v7253_v24, %v7259_v37  ;;  %v6786_v24 = vld [vmem:[%s7059_s13 + $0x14] sm:$0x1]  ;;  %v4107_v54 = vsel %vm748_vm0, %v7376_v22, 0  ;;  %v5285_v61 = vcombine.low %v7337_v53, %v7344_v16  ;;  %v5286_v6 = vcombine.low %v7363_v39, %v7371_v43  ;;  %v6787_v16 = vld [vmem:[%s7059_s13 + $0x20] sm:$0x1] }
  0xa8   : > { %6139 = vmatmul.mubr.msk.bf16.gmra.mrb[4].mxu1 %vm699_vm3, %v5278_v28  ;;  %6294 = vmatprep.mubr.msk.bf16.mxu0 %vm699_vm3, %v5547_v20  ;;  %v1265_v28 = vrot.slane %v7549_v34, 5  ;;  %v6733_v20 = vld [vmem:[%s7059_s13 + $0x18] sm:$0xff]   ;;  %v6785_v34 = vld [vmem:[%s7059_s13 + $0x8] sm:$0x1]  ;;  %v1268_v37 = vrot.slane %v6786_v24, 5  ;;  %9123 = vst [vmem:[#allocation11_spill] sm:$0xff] %v7652_v51  ;;  %v5287_v9 = vcombine.low %v7395_v5, %v7407_v30 }
  0xa9   : > { %6142 = vmatprep.mubr.msk.bf16.mxu1 %vm699_vm3, %v5279_v48  ;;  %v1258_v48 = vrot.slane %v7515_v15, 5  ;;  %v1261_v50 = vrot.slane %v6785_v34, 5  ;;  %v1207_v15 = vld [vmem:[%s7059_s13 + $0x18] sm:$0xe]  ;;  %v7657_v63 = vrot.slane %v2302_v49, 4  ;;  %v1275_v22 = vrot.slane %v6787_v16, 5 }
  0xaa   : > { %v1267_v55 = vrot.slane %v1265_v28, 4  ;;  %v5309_v1 = vrot.slane %v1207_v15, 9  ;;  %v7679_v29 = vsel %vm7311_vm7, %v5308_v35, %v1265_v28  ;;  %v1281_v25 = vrot.slane %v1279_v12, 4  ;;  %v5632_v24 = vld [vmem:[%s7059_s13 + $0x18] sm:$0xf] }
  0xab   : > { %v1260_v57 = vrot.slane %v1258_v48, 4  ;;  %9124 = vst [vmem:[#allocation12_spill] sm:$0xff] %v7657_v63  ;;  %v7675_v0 = vsel %vm7311_vm7, %v5307_v19, %v1258_v48  ;;  %v1289_v47 = vrot.slane %v6789_v59, 5  ;;  %v7716_v49 = vsel %vm748_vm0, %v7571_v7, 0  ;;  %v5633_v7 = vld [vmem:[%s7059_s13 + $0x1c] sm:$0xf] }
  0xac   : > { %v7683_v53 = vsel %vm7311_vm7, %v1267_v55, %v1268_v37  ;;  %v7720_v34 = vsel %vm7311_vm7, %v5309_v1, %v1272_v4  ;;  %v6739_v37 = vld [vmem:[%s7059_s13 + $0x3c] sm:$0xff]   ;;  %v5312_v35 = vrot.slane %v1210_v8, 9  ;;  %v6790_v55 = vld [vmem:[%s7059_s13 + $0x44] sm:$0x1]  ;;  %v3628_v8 = vshll.u32 %v5632_v24, 16 }
  0xad   : > { %v7694_v23 = vsel %vm7311_vm7, %v1260_v57, %v1261_v50  ;;  %v1212_v50 = vld [vmem:[%s7059_s13 + $0x54] sm:$0xe]  ;;  %v1296_v15 = vrot.slane %v6790_v55, 5  ;;  %v5636_v39 = vld [vmem:[%s7059_s13 + $0x28] sm:$0xf] }
  0xae   : > { %v6797_v5 = vld [vmem:[%s7059_s13 + $0x70] sm:$0xf] }
  0xaf   : > { %6295 = vmatmul.mubr.msk.bf16.gmra.mrb[24].mxu0 %vm699_vm3, %v5548_v2  ;;  %v1208_v2 = vld [vmem:[%s7059_s13 + $0x24] sm:$0xe]  ;;  %v1321_v30 = vrot.slane %v6797_v5, 5 }
  0xb0   : > { %6143 = vmatmul.mubr.msk.bf16.gmra.mrb[8].mxu1 %vm699_vm3, %v5280_v10  ;;  %6298 = vmatprep.mubr.msk.bf16.mxu0 %vm699_vm3, %v5549_v11  ;;  %v1286_v10 = vrot.slane %v7597_v26, 5  ;;  %v6737_v11 = vld [vmem:[%s7059_s13 + $0x30] sm:$0xff]   ;;  %v5310_v21 = vrot.slane %v1208_v2, 9 }
  0xb1   : > { %6146 = vmatprep.mubr.msk.bf16.mxu1 %vm699_vm3, %v5281_v18  ;;  %v7690_v26 = vld [vmem:[%s9098_s1 + $0x10] sm:$0x3]  ;;  %v1274_v18 = vrot.slane %v1272_v4, 4  ;;  %v1323_v48 = vrot.slane %v1321_v30, 4 }
  0xb2   : > { %v1288_v45 = vrot.slane %v1286_v10, 4  ;;  %v7727_v19 = vsel %vm7311_vm7, %v5310_v21, %v1279_v12  ;;  %v3638_v21 = vshrl.u32 %v5633_v7, 16 }
  0xb3   : > { %v7736_v4 = vsel %vm7311_vm7, %v1274_v18, %v1275_v22  ;;  %v3625_v22 = vshrl.u32 %v5632_v24, 16  ;;  %v3634_v18 = vshll.u32 %v5633_v7, 16  ;;  %v5635_v24 = vld [vmem:[%s7059_s13 + $0x24] sm:$0xf] }
  0xb4   : > { %v7749_v1 = vsel %vm7311_vm7, %v1288_v45, %v1289_v47 }
  0xb5   : > { %v3627_v43 = vrot.slane %v3625_v22, 4  ;;  %v7791_v7 = vrot.slane %v3634_v18, 5  ;;  %v3652_v22 = vshll.u32 %v5635_v24, 16  ;;  %v3662_v18 = vshrl.u32 %v5636_v39, 16 }
  0xb7   : > { %6299 = vmatmul.mubr.msk.bf16.gmra.mrb[28].mxu0 %vm699_vm3, %v5550_v40  ;;  %v6788_v40 = vld [vmem:[%s7059_s13 + $0x2c] sm:$0x1]  ;;  %v3654_v27 = vrot.slane %v3652_v22, 5 }
  0xb8   : > { %6147 = vmatmul.mubr.msk.bf16.gmra.mrb[12].mxu1 %vm699_vm3, %v5282_v60  ;;  %6304 = vmatprep.mubr.msk.bf16.mxu0 %vm699_vm3, %v6733_v20  ;;  %v1282_v28 = vrot.slane %v6788_v40, 5  ;;  %v1293_v60 = vrot.slane %v7617_v17, 5  ;;  %v6793_v40 = vld [vmem:[%s7059_s13 + $0x50] sm:$0x1]  ;;  %v6798_v17 = vld [vmem:[%s7059_s13 + $0x74] sm:$0x1] }
  0xb9   : > { %6150 = vmatprep.mubr.msk.bf16.mxu1 %vm699_vm3, %v5283_v44  ;;  %v5311_v44 = vrot.slane %v1209_v41, 9  ;;  %v5314_v41 = vrot.slane %v1212_v50, 9  ;;  %v1213_v50 = vld [vmem:[%s7059_s13 + $0x60] sm:$0xe]  ;;  %v5637_v20 = vld [vmem:[%s7059_s13 + $0x2c] sm:$0x1] }
  0xba   : > { %v1295_v12 = vrot.slane %v1293_v60, 4  ;;  %v7762_v45 = vsel %vm7311_vm7, %v5312_v35, %v1293_v60  ;;  %v6794_v35 = vld [vmem:[%s7059_s13 + $0x5c] sm:$0x1] }
  0xbb   : > { %v7745_v2 = vsel %vm7311_vm7, %v5311_v44, %v1286_v10  ;;  %v1310_v55 = vrot.slane %v6794_v35, 5  ;;  %v1214_v35 = vld [vmem:[%s7059_s13 + $0x6c] sm:$0xe] }
  0xbc   : > { %v7766_v59 = vsel %vm7311_vm7, %v1295_v12, %v1296_v15  ;;  %v6795_v15 = vld [vmem:[%s7059_s13 + $0x64] sm:$0xf]  ;;  %v3640_v12 = vrot.slane %v3638_v21, 4  ;;  %v5316_v5 = vrot.slane %v1214_v35, 9 }
  0xbd   : > { %v6745_v21 = vld [vmem:[%s7059_s13 + $0x60] sm:$0xff]  }
  0xbf   : > { %6305 = vmatmul.mubr.msk.bf16.vlgmr.msra.gmra.mrb[0].mxu0 %vm699_vm3, %v6735_v62  ;;  %v6791_v62 = vld [vmem:[%s7059_s13 + $0x4c] sm:$0xf] }
  0xc0   : > { %6151 = vmatmul.mubr.msk.bf16.gmra.mrb[16].mxu1 %vm699_vm3, %v5284_v58  ;;  %6337 = vmatpush3.bf16.msra.mxu0 %v4107_v54  ;;  %v1300_v57 = vrot.slane %v6791_v62, 5  ;;  %v7740_v58 = vsel %vm7311_vm7, %v1281_v25, %v1282_v28  ;;  %v5313_v54 = vrot.slane %v1211_v31, 9  ;;  %v1303_v28 = vrot.slane %v6793_v40, 5 }
  0xc1   : > { %6154 = vmatprep.mubr.msk.bf16.mxu1 %vm699_vm3, %v5285_v61  ;;  %6308 = vmatprep.mubr.msk.bf16.mxu0 %vm699_vm3, %v6737_v11  ;;  %v6741_v61 = vld [vmem:[%s7059_s13 + $0x48] sm:$0xff]   ;;  %v6792_v11 = vld [vmem:[%s7059_s13 + $0x58] sm:$0xf]  ;;  %v1314_v62 = vrot.slane %v6795_v15, 5  ;;  %v5639_v15 = vld [vmem:[%s7059_s13 + $0x34] sm:$0xf] }
  0xc2   : > { %6671 = vmatprep.subr.msk.bf16.mxu0 %vm748_vm0, %v7690_v26  ;;  %v1307_v16 = vrot.slane %v6792_v11, 5  ;;  %v1302_v31 = vrot.slane %v1300_v57, 4  ;;  %v7770_v47 = vsel %vm7311_vm7, %v5313_v54, %v1300_v57  ;;  %v5634_v57 = vld [vmem:[%s7059_s13 + $0x20] sm:$0x1]  ;;  %v5638_v54 = vld [vmem:[%s7059_s13 + $0x30] sm:$0xf] }
  0xc3   : > { %v5315_v11 = vrot.slane %v1213_v50, 9  ;;  %v3676_v50 = vshll.u32 %v5638_v54, 16  ;;  %v3644_v25 = vshll.u32 %v5634_v57, 16  ;;  %v3682_v36 = vshll.u32 %v5639_v15, 16 }
  0xc4   : > { %v7781_v60 = vsel %vm7311_vm7, %v5314_v41, %v1307_v16  ;;  %v7797_v41 = vsel %vm7311_vm7, %v1302_v31, %v1303_v28  ;;  %v1316_v31 = vrot.slane %v1314_v62, 4  ;;  %v3673_v28 = vshrl.u32 %v5638_v54, 16 }
  0xc5   : > { %v7839_v35 = vrot.slane %v3682_v36, 5 }
  0xc7   : > { %6309 = vmatmul.mubr.msk.bf16.gmra.mrb[4].mxu0 %vm699_vm3, %v6739_v37  ;;  %v1309_v37 = vrot.slane %v1307_v16, 4  ;;  %v6796_v16 = vld [vmem:[%s7059_s13 + $0x68] sm:$0x1] }
  0xc8   : > { %6155 = vmatmul.mubr.msk.bf16.gmra.mrb[20].mxu1 %vm699_vm3, %v5286_v6  ;;  %6312 = vmatprep.mubr.msk.bf16.mxu0 %vm699_vm3, %v6741_v61  ;;  %v3630_v6 = vrot.slane %v3628_v8, 5  ;;  %v6743_v61 = vld [vmem:[%s7059_s13 + $0x54] sm:$0xff]   ;;  %v1317_v40 = vrot.slane %v6796_v16, 5  ;;  %v3658_v8 = vshll.u32 %v5636_v39, 16  ;;  %v3641_v16 = vor.u32 %v3640_v12, %v7791_v7 }
  0xc9   : > { %6158 = vmatprep.mubr.msk.bf16.mxu1 %vm699_vm3, %v5287_v9  ;;  %v3649_v9 = vshrl.u32 %v5635_v24, 16  ;;  %v7806_v44 = vsel %vm7311_vm7, %v1309_v37, %v1310_v55  ;;  %v1324_v24 = vrot.slane %v6798_v17, 5  ;;  %v3686_v39 = vshrl.u32 %v5639_v15, 16 }
  0xca   : > { %v3631_v10 = vor.u32 %v3630_v6, %v3627_v43  ;;  %v7812_v37 = vrot.slane %v3658_v8, 5  ;;  %v3664_v55 = vrot.slane %v3662_v18, 4  ;;  %v9125_v43 = vcombine.low %v7416_v52, %v7427_v46  ;;  %v6799_v8 = vld [vmem:[%s7059_s13 + $0x7c] sm:$0xf]  ;;  %v7848_v18 = vld [vmem:[%s7059_s13 + $0x38] sm:$0x1] }
  0xcb   : > { %v3651_v38 = vrot.slane %v3649_v9, 4  ;;  %v7821_v17 = vsel %vm7311_vm7, %v5315_v11, %v1314_v62  ;;  %v7825_v57 = vsel %vm7311_vm7, %v1316_v31, %v1317_v40  ;;  %v3675_v6 = vrot.slane %v3673_v28, 4  ;;  %9127 = vst [vmem:[#allocation13_spill] sm:$0xff] %v7848_v18 }
  0xcc   : > { %v3678_v12 = vrot.slane %v3676_v50, 5  ;;  %v9126_v52 = vcombine.low %v7448_v33, %v7453_v56  ;;  %v3632_v46 = vrot.slane %v3631_v10, 4  ;;  %v3642_v54 = vrot.slane %v3641_v16, 4  ;;  %v6747_v33 = vld [vmem:[%s7059_s13 + $0x6c] sm:$0xff]   ;;  %v1216_v16 = vld [vmem:[%s7059_s13 + $0x84] sm:$0xe] }
  0xcd   : > { %v3668_v62 = vshll.u32 %v5637_v20, 16  ;;  %v7833_v11 = vsel %vm7311_vm7, %v5316_v5, %v1321_v30  ;;  %v7837_v40 = vsel %vm7311_vm7, %v1323_v48, %v1324_v24  ;;  %v3688_v9 = vrot.slane %v3686_v39, 4  ;;  %v6748_v48 = vld [vmem:[%s7059_s13 + $0x78] sm:$0xff]  }
  0xce   : > { %v3655_v10 = vor.u32 %v3654_v27, %v3651_v38  ;;  %v3665_v20 = vor.u32 %v3664_v55, %v7812_v37  ;;  %v1328_v30 = vrot.slane %v6799_v8, 5  ;;  %v3679_v38 = vor.u32 %v3678_v12, %v3675_v6  ;;  %v5641_v5 = vld [vmem:[%s7059_s13 + $0x3c] sm:$0xf] }
  0xcf   : > { %6313 = vmatmul.mubr.msk.bf16.gmra.mrb[8].mxu0 %vm699_vm3, %v6743_v61  ;;  %v3646_v61 = vrot.slane %v3644_v25, 5  ;;  %v1215_v25 = vld [vmem:[%s7059_s13 + $0x78] sm:$0xe]  ;;  %v7864_v50 = vrot.slane %v3668_v62, 5  ;;  %v3689_v39 = vor.u32 %v3688_v9, %v7839_v35  ;;  %v3692_v55 = vshll.u32 %v7848_v18, 16 }
  0xd0   : > { %6159 = vmatmul.mubr.msk.bf16.gmra.mrb[24].mxu1 %vm699_vm3, %v9125_v43  ;;  %6316 = vmatprep.mubr.msk.bf16.mxu0 %vm699_vm3, %v6745_v21  ;;  %v3637_v21 = vsel %vm7085_vm4, %v3632_v46, %v7791_v7  ;;  %v5317_v24 = vrot.slane %v1215_v25, 9  ;;  %v6800_v43 = vld [vmem:[%s7059_s13 + $0x88] sm:$0xf]  ;;  %v7872_v7 = vld [vmem:[%s7059_s13 + $0x40] sm:$0xf]  ;;  %v3656_v12 = vrot.slane %v3655_v10, 4  ;;  %v9129_v62 = vcombine.low %v7468_v14, %v7477_v42 }
  0xd1   : > { %6162 = vmatprep.mubr.msk.bf16.mxu1 %vm699_vm3, %v9126_v52  ;;  %v3647_v31 = vsel %vm7085_vm4, %v3642_v54, %v3646_v61  ;;  %v1335_v6 = vrot.slane %v6800_v43, 5  ;;  %9128 = vst [vmem:[#allocation14_spill] sm:$0xff] %v7872_v7  ;;  %v3666_v52 = vrot.slane %v3665_v20, 4  ;;  %v1330_v46 = vrot.slane %v1328_v30, 4  ;;  %v6801_v54 = vld [vmem:[%s7059_s13 + $0x80] sm:$0x1] }
  0xd2   : > { %v1331_v61 = vrot.slane %v6801_v54, 5  ;;  %v3680_v9 = vrot.slane %v3679_v38, 4  ;;  %v5318_v25 = vrot.slane %v1216_v16, 9  ;;  %v3697_v8 = vshrl.u32 %v5641_v5, 16  ;;  %v6749_v10 = vld [vmem:[%s7059_s13 + $0x84] sm:$0xff]  }
  0xd3   : > { %v3700_v43 = vshll.u32 %v5641_v5, 16  ;;  %v7886_v20 = vcombine.low %v3637_v21, %v3647_v31  ;;  %v7890_v14 = vsel %vm748_vm0, %v7690_v26, 0  ;;  %v3710_v38 = vshrl.u32 %v7872_v7, 16  ;;  %v6750_v21 = vld [vmem:[%s7059_s13 + $0x90] sm:$0xff]   ;;  %v6806_v18 = vld [vmem:[%s7059_s13 + $0xa0] sm:$0xf] }
  0xd4   : > { %v3690_v16 = vrot.slane %v3689_v39, 4  ;;  %v3694_v5 = vrot.slane %v3692_v55, 5  ;;  %v1337_v54 = vrot.slane %v1335_v6, 4  ;;  %v3661_v31 = vsel %vm7085_vm4, %v3656_v12, %v7812_v37 }
  0xd5   : > { %v3671_v26 = vsel %vm7085_vm4, %v3666_v52, %v7864_v50  ;;  %v7905_v39 = vsel %vm7311_vm7, %v5317_v24, %v1328_v30  ;;  %v7909_v55 = vsel %vm7311_vm7, %v1330_v46, %v1331_v61  ;;  %v3685_v37 = vsel %vm7085_vm4, %v3680_v9, %v7839_v35  ;;  %v5647_v30 = vld [vmem:[%s7059_s13 + $0x54] sm:$0xf]  ;;  %v7926_v24 = vld [vmem:[%s7059_s13 + $0x58] sm:$0xf]  ;;  %v7931_v61 = vld [vmem:[%s7059_s13 + $0x90] sm:$0xe] }
  0xd6   : > { %v7922_v12 = vsel %vm7311_vm7, %v5318_v25, %v1335_v6  ;;  %v3699_v50 = vrot.slane %v3697_v8, 4  ;;  %v3702_v52 = vrot.slane %v3700_v43, 5  ;;  %v3712_v46 = vrot.slane %v3710_v38, 4 }
  0xd7   : > { %6317 = vmatmul.mubr.msk.bf16.gmra.mrb[12].mxu0 %vm699_vm3, %v6747_v33  ;;  %v9130_v33 = vcombine.low %v7675_v0, %v7694_v23  ;;  %v6802_v0 = vld [vmem:[%s7059_s13 + $0x8c] sm:$0x1]  ;;  %v3695_v36 = vsel %vm7085_vm4, %v3690_v16, %v3694_v5  ;;  %v3745_v25 = vshrl.u32 %v5647_v30, 16  ;;  %v3748_v8 = vshll.u32 %v5647_v30, 16 }
  0xd8   : > { %6163 = vmatmul.mubr.msk.bf16.gmra.mrb[28].mxu1 %vm699_vm3, %v9129_v62  ;;  %6320 = vmatprep.mubr.msk.bf16.mxu0 %vm699_vm3, %v6748_v48  ;;  %v3706_v48 = vshll.u32 %v7872_v7, 16  ;;  %v1338_v23 = vrot.slane %v6802_v0, 5  ;;  %v5644_v62 = vld [vmem:[%s7059_s13 + $0x48] sm:$0xf]  ;;  %v7915_v0 = vld [vmem:[%s7059_s13 + $0x4c] sm:$0xf]  ;;  %v9132_v38 = vcombine.low %v7679_v29, %v7683_v53  ;;  %v7949_v16 = vcombine.low %v3661_v31, %v3671_v26 }
  0xd9   : > { %6168 = vmatprep.mubr.msk.bf16.mxu1 %vm699_vm3, %v9130_v33  ;;  %v7912_v33 = vld [vmem:[%s7059_s13 + $0x44] sm:$0x1]  ;;  %v3721_v27 = vshrl.u32 %v5644_v62, 16  ;;  %v3724_v15 = vshll.u32 %v5644_v62, 16  ;;  %v3730_v6 = vshll.u32 %v7915_v0, 16  ;;  %v3734_v9 = vshrl.u32 %v7915_v0, 16 }
  0xda   : > { %9131 = vst [vmem:[#allocation15_spill] sm:$0xff] %v7912_v33  ;;  %v7928_v28 = vrot.slane %v3706_v48, 5  ;;  %v7937_v35 = vsel %vm7311_vm7, %v1337_v54, %v1338_v23  ;;  %v3754_v43 = vshll.u32 %v7926_v24, 16  ;;  %v3758_v48 = vshrl.u32 %v7926_v24, 16  ;;  %v5650_v31 = vld [vmem:[%s7059_s13 + $0x60] sm:$0xf] }
  0xdb   : > { %v3716_v5 = vshll.u32 %v7912_v33, 16  ;;  %v5319_v54 = vrot.slane %v7931_v61, 9  ;;  %v9133_v23 = vcombine.low %v7720_v34, %v7736_v4  ;;  %v7960_v29 = vcombine.low %v3685_v37, %v3695_v36  ;;  %v6751_v26 = vld [vmem:[%s7059_s13 + $0x9c] sm:$0xff]   ;;  %v6752_v30 = vld [vmem:[%s7059_s13 + $0xa8] sm:$0xff]  }
  0xdc   : > { %v3703_v53 = vor.u32 %v3702_v52, %v3699_v50  ;;  %v3723_v62 = vrot.slane %v3721_v27, 4  ;;  %v7971_v34 = vrot.slane %v3730_v6, 5  ;;  %v3736_v4 = vrot.slane %v3734_v9, 4  ;;  %v6803_v36 = vld [vmem:[%s9098_s1 + $0x8] sm:$0x3] }
  0xdd   : > { %v3747_v27 = vrot.slane %v3745_v25, 4  ;;  %v3750_v37 = vrot.slane %v3748_v8, 5  ;;  %v7980_v50 = vrot.slane %v3754_v43, 5  ;;  %v3760_v52 = vrot.slane %v3758_v48, 4  ;;  %v6804_v6 = vld [vmem:[%s7059_s13 + $0x94] sm:$0xf] }
  0xde   : > { %v7986_v9 = vld [vmem:[%s7059_s13 + $0x64] sm:$0xf]  ;;  %v3769_v61 = vshrl.u32 %v5650_v31, 16  ;;  %v7988_v22 = vrot.slane %v3703_v53, 4  ;;  %v1349_v25 = vrot.slane %v6806_v18, 5  ;;  %v3737_v43 = vor.u32 %v3736_v4, %v7971_v34 }
  0xdf   : > { %6321 = vmatmul.mubr.msk.bf16.gmra.mrb[16].mxu0 %vm699_vm3, %v6749_v10  ;;  %9134 = vst [vmem:[#allocation16_spill] sm:$0xff] %v7986_v9  ;;  %v3772_v10 = vshll.u32 %v5650_v31, 16  ;;  %v3751_v31 = vor.u32 %v3750_v37, %v3747_v27  ;;  %v3761_v53 = vor.u32 %v3760_v52, %v7980_v50  ;;  %v9135_v18 = vcombine.low %v7727_v19, %v7740_v58  ;;  %v6753_v37 = vld [vmem:[%s7059_s13 + $0xb4] sm:$0xff]  }
  0xe0   : > { %6169 = vmatmul.mubr.msk.bf16.vlgmr.msra.gmra.mrb[0].mxu1 %vm699_vm3, %v9132_v38  ;;  %6324 = vmatprep.mubr.msk.bf16.mxu0 %vm699_vm3, %v6750_v21  ;;  %v3726_v21 = vrot.slane %v3724_v15, 5  ;;  %v7969_v38 = vld [vmem:[%s7059_s13 + $0x50] sm:$0x1]  ;;  %v7978_v15 = vld [vmem:[%s7059_s13 + $0x5c] sm:$0x1]  ;;  %v9136_v27 = vcombine.low %v7745_v2, %v7749_v1  ;;  %v1351_v52 = vrot.slane %v1349_v25, 4 }
  0xe1   : > { %6201 = vmatpush3.bf16.msra.mxu1 %v7716_v49  ;;  %6172 = vmatprep.mubr.msk.bf16.mxu1 %vm699_vm3, %v9133_v23  ;;  %v3713_v49 = vor.u32 %v3712_v46, %v7928_v28  ;;  %v7982_v46 = vrot.slane %v3716_v5, 5  ;;  %v1342_v23 = vrot.slane %v6804_v6, 5  ;;  %v3740_v48 = vshll.u32 %v7969_v38, 16  ;;  %v1218_v5 = vld [vmem:[%s7059_s13 + $0x9c] sm:$0xe] }
  0xe2   : > { %6667 = vmatprep.subr.msk.bf16.mxu1 %vm748_vm0, %v6803_v36  ;;  %v6805_v36 = vld [vmem:[%s7059_s13 + $0x98] sm:$0x1]  ;;  %v3727_v7 = vor.u32 %v3726_v21, %v3723_v62  ;;  %v3764_v6 = vshll.u32 %v7978_v15, 16  ;;  %v3782_v62 = vshrl.u32 %v7986_v9, 16  ;;  %v3774_v4 = vrot.slane %v3772_v10, 5 }
  0xe3   : > { %v1345_v33 = vrot.slane %v6805_v36, 5  ;;  %v3714_v8 = vrot.slane %v3713_v49, 4  ;;  %v3778_v36 = vshll.u32 %v7986_v9, 16  ;;  %v8007_v21 = vsel %vm7311_vm7, %v5319_v54, %v1342_v23  ;;  %v8018_v2 = vld [vmem:[%s7059_s13 + $0x68] sm:$0x1] }
  0xe4   : > { %v3771_v49 = vrot.slane %v3769_v61, 4  ;;  %v3728_v19 = vrot.slane %v3727_v7, 4  ;;  %v5320_v58 = vrot.slane %v1218_v5, 9  ;;  %v3738_v3 = vrot.slane %v3737_v43, 4  ;;  %9137 = vst [vmem:[#allocation17_spill] sm:$0xff] %v8018_v2  ;;  %v6754_v5 = vld [vmem:[%s7059_s13 + $0xc0] sm:$0xff]  }
  0xe5   : > { %v3742_v54 = vrot.slane %v3740_v48, 5  ;;  %v3766_v63 = vrot.slane %v3764_v6, 5  ;;  %v1356_v61 = vrot.slane %v7453_v56, 5  ;;  %v3752_v10 = vrot.slane %v3751_v31, 4  ;;  %v1220_v31 = vld [vmem:[%s7059_s13 + $0xb4] sm:$0xe] }
  0xe6   : > { %v3762_v51 = vrot.slane %v3761_v53, 4  ;;  %v8020_v1 = vrot.slane %v3778_v36, 5  ;;  %v3784_v7 = vrot.slane %v3782_v62, 4  ;;  %v3709_v43 = vsel %vm7085_vm4, %v7988_v22, %v7928_v28  ;;  %v6808_v62 = vld [vmem:[%s7059_s13 + $0xb0] sm:$0x1] }
  0xe7   : > { %6325 = vmatmul.mubr.msk.bf16.gmra.mrb[20].mxu0 %vm699_vm3, %v6751_v26  ;;  %v1344_v26 = vrot.slane %v1342_v23, 4  ;;  %v1219_v23 = vld [vmem:[%s7059_s13 + $0xa8] sm:$0xe]  ;;  %v3719_v48 = vsel %vm7085_vm4, %v3714_v8, %v7982_v46  ;;  %v3775_v6 = vor.u32 %v3774_v4, %v3771_v49  ;;  %v3733_v53 = vsel %vm7085_vm4, %v3728_v19, %v7971_v34  ;;  %v5653_v46 = vld [vmem:[%s7059_s13 + $0x6c] sm:$0xf] }
  0xe8   : > { %6173 = vmatmul.mubr.msk.bf16.gmra.mrb[4].mxu1 %vm699_vm3, %v9135_v18  ;;  %6328 = vmatprep.mubr.msk.bf16.mxu0 %vm699_vm3, %v6752_v30  ;;  %v6807_v18 = vld [vmem:[%s7059_s13 + $0xa4] sm:$0x1]  ;;  %v8040_v36 = vsel %vm7311_vm7, %v5320_v58, %v1349_v25  ;;  %v5321_v28 = vrot.slane %v1219_v23, 9  ;;  %v1358_v8 = vrot.slane %v1356_v61, 4  ;;  %v3788_v49 = vshll.u32 %v8018_v2, 16 }
  0xe9   : > { %6176 = vmatprep.mubr.msk.bf16.mxu1 %vm699_vm3, %v9136_v27  ;;  %v1352_v30 = vrot.slane %v6807_v18, 5  ;;  %v8032_v56 = vsel %vm7311_vm7, %v1344_v26, %v1345_v33  ;;  %v3743_v33 = vsel %vm7085_vm4, %v3738_v3, %v3742_v54  ;;  %v1359_v26 = vrot.slane %v6808_v62, 5  ;;  %v5656_v18 = vld [vmem:[%s7059_s13 + $0x78] sm:$0xf]  ;;  %v8095_v54 = vld [vmem:[%s7059_s13 + $0xbc] sm:$0x1] }
  0xea   : > { %v3757_v34 = vsel %vm7085_vm4, %v3752_v10, %v7980_v50  ;;  %v3767_v25 = vsel %vm7085_vm4, %v3762_v51, %v3766_v63  ;;  %v3785_v4 = vor.u32 %v3784_v7, %v8020_v1  ;;  %v5322_v27 = vrot.slane %v1220_v31, 9  ;;  %v8069_v51 = vld [vmem:[%s7059_s13 + $0x70] sm:$0xf]  ;;  %v8099_v10 = vld [vmem:[%s7059_s13 + $0x7c] sm:$0xf] }
  0xeb   : > { %v8044_v22 = vsel %vm7311_vm7, %v1351_v52, %v1352_v30  ;;  %v9139_v3 = vcombine.low %v7762_v45, %v7766_v59  ;;  %v8065_v19 = vrot.slane %v3775_v6, 4  ;;  %v1363_v50 = vrot.slane %v7477_v42, 5  ;;  %9140 = vst [vmem:[#allocation19_spill] sm:$0xff] %v8069_v51  ;;  %9142 = vst [vmem:[#allocation20_spill] sm:$0xff] %v8099_v10  ;;  %v5659_v7 = vld [vmem:[%s7059_s13 + $0x84] sm:$0xf] }
  0xec   : > { %9138 = vst [vmem:[#allocation18_spill] sm:$0xff] %v8044_v22  ;;  %v3793_v63 = vshrl.u32 %v5653_v46, 16  ;;  %v9141_v45 = vcombine.low %v7770_v47, %v7797_v41  ;;  %v8077_v58 = vcombine.low %v3733_v53, %v3743_v33  ;;  %v8083_v42 = vsel %vm7311_vm7, %v5321_v28, %v1356_v61  ;;  %v6755_v61 = vld [vmem:[%s7059_s13 + $0xcc] sm:$0xff]   ;;  %v8111_v31 = vld [vmem:[%s7059_s13 + $0x88] sm:$0xf] }
  0xed   : > { %v8086_v30 = vcombine.low %v3757_v34, %v3767_v25  ;;  %v8090_v47 = vsel %vm7311_vm7, %v1358_v8, %v1359_v26  ;;  %v8092_v41 = vrot.slane %v3788_v49, 5  ;;  %v3802_v6 = vshll.u32 %v8069_v51, 16  ;;  %9143 = vst [vmem:[#allocation21_spill] sm:$0xff] %v8111_v31  ;;  %v5662_v62 = vld [vmem:[%s7059_s13 + $0x90] sm:$0xf] }
  0xee   : > { %v8117_v28 = vrot.slane %v1363_v50, 4  ;;  %v8119_v33 = vrot.slane %v3793_v63, 4  ;;  %v3806_v8 = vshrl.u32 %v8069_v51, 16  ;;  %v3817_v26 = vshrl.u32 %v5656_v18, 16  ;;  %v8126_v25 = vld [vmem:[%s7059_s13 + $0x94] sm:$0xf] }
  0xef   : > { %6329 = vmatmul.mubr.msk.bf16.gmra.mrb[24].mxu0 %vm699_vm3, %v6753_v37  ;;  %v8063_v37 = vcombine.low %v3709_v43, %v3719_v48  ;;  %v8107_v43 = vsel %vm7311_vm7, %v5322_v27, %v1363_v50  ;;  %v3796_v48 = vshll.u32 %v5653_v46, 16  ;;  %v3820_v49 = vshll.u32 %v5656_v18, 16  ;;  %9144 = vst [vmem:[#allocation22_spill] sm:$0xff] %v8126_v25  ;;  %v8164_v2 = vld [vmem:[%s7059_s13 + $0x8c] sm:$0x1] }
  0xf0   : > { %6177 = vmatmul.mubr.msk.bf16.gmra.mrb[8].mxu1 %vm699_vm3, %v9139_v3  ;;  %6332 = vmatprep.mubr.msk.bf16.mxu0 %vm699_vm3, %v6754_v5  ;;  %v8103_v5 = vrot.slane %v3785_v4, 4  ;;  %v3826_v46 = vshll.u32 %v8099_v10, 16  ;;  %v3830_v34 = vshrl.u32 %v8099_v10, 16  ;;  %v3841_v4 = vshrl.u32 %v5659_v7, 16 }
  0xf1   : > { %6180 = vmatprep.mubr.msk.bf16.mxu1 %vm699_vm3, %v9141_v45  ;;  %v3844_v27 = vshll.u32 %v5659_v7, 16  ;;  %v3850_v3 = vshll.u32 %v8111_v31, 16  ;;  %v3854_v50 = vshrl.u32 %v8111_v31, 16  ;;  %v8136_v45 = vld [vmem:[%s7059_s13 + $0x74] sm:$0x1]  ;;  %v3798_v18 = vrot.slane %v3796_v48, 5 }
  0xf2   : > { %v3865_v52 = vshrl.u32 %v5662_v62, 16  ;;  %v3868_v53 = vshll.u32 %v5662_v62, 16  ;;  %v9145_v7 = vcombine.low %v7781_v60, %v7806_v44  ;;  %v3808_v59 = vrot.slane %v3806_v8, 4  ;;  %v5665_v48 = vld [vmem:[%s7059_s13 + $0x9c] sm:$0xf] }
  0xf3   : > { %v3874_v63 = vshll.u32 %v8126_v25, 16  ;;  %v3878_v23 = vshrl.u32 %v8126_v25, 16  ;;  %v9146_v62 = vcombine.low %v7821_v17, %v7825_v57  ;;  %v8154_v44 = vld [vmem:[%s7059_s13 + $0x80] sm:$0x1]  ;;  %v3819_v60 = vrot.slane %v3817_v26, 4 }
  0xf4   : > { %9147 = vst [vmem:[#allocation23_spill] sm:$0xff] %v8154_v44  ;;  %v3843_v31 = vrot.slane %v3841_v4, 4  ;;  %v3846_v8 = vrot.slane %v3844_v27, 5  ;;  %v8158_v10 = vrot.slane %v3850_v3, 5  ;;  %v3856_v51 = vrot.slane %v3854_v50, 4 }
  0xf5   : > { %v8161_v25 = vld [vmem:[%s7059_s13 + $0xa0] sm:$0xf]  ;;  %v3867_v17 = vrot.slane %v3865_v52, 4  ;;  %v3870_v57 = vrot.slane %v3868_v53, 5  ;;  %v3892_v9 = vshll.u32 %v5665_v48, 16  ;;  %v3799_v26 = vor.u32 %v3798_v18, %v8119_v33 }
  0xf6   : > { %v3836_v27 = vshll.u32 %v8154_v44, 16  ;;  %v8173_v3 = vld [vmem:[%s7059_s13 + $0x98] sm:$0x1]  ;;  %v3898_v50 = vshll.u32 %v8161_v25, 16  ;;  %v3902_v52 = vshrl.u32 %v8161_v25, 16  ;;  %v3847_v22 = vor.u32 %v3846_v8, %v3843_v31 }
  0xf7   : > { %6333 = vmatmul.mubr.msk.bf16.gmra.mrb[28].mxu0 %vm699_vm3, %v6755_v61  ;;  %v8144_v61 = vrot.slane %v3802_v6, 5  ;;  %v3832_v6 = vrot.slane %v3830_v34, 4  ;;  %v3880_v34 = vrot.slane %v3878_v23, 4  ;;  %v3860_v33 = vshll.u32 %v8164_v2, 16 }
  0xf8   : > { %6181 = vmatmul.mubr.msk.bf16.gmra.mrb[12].mxu1 %vm699_vm3, %v9145_v7  ;;  %6338 = vmatprep.mubr.msk.bf16.mxu0 %vm699_vm3, %v7886_v20  ;;  %v3822_v7 = vrot.slane %v3820_v49, 5  ;;  %v8156_v20 = vrot.slane %v3826_v46, 5  ;;  %v3812_v49 = vshll.u32 %v8136_v45, 16  ;;  %v8168_v46 = vrot.slane %v3874_v63, 5 }
  0xf9   : > { %6184 = vmatprep.mubr.msk.bf16.mxu1 %vm699_vm3, %v9146_v62  ;;  %v3889_v62 = vshrl.u32 %v5665_v48, 16  ;;  %v3809_v4 = vor.u32 %v3808_v59, %v8144_v61  ;;  %v3857_v23 = vor.u32 %v3856_v51, %v8158_v10  ;;  %v3871_v59 = vor.u32 %v3870_v57, %v3867_v17  ;;  %v8206_v57 = vld [vmem:[%s7059_s13 + $0xa4] sm:$0x1] }
  0xfa   : > { %v3823_v53 = vor.u32 %v3822_v7, %v3819_v60  ;;  %v3833_v48 = vor.u32 %v3832_v6, %v8156_v20  ;;  %v3894_v18 = vrot.slane %v3892_v9, 5  ;;  %v9148_v44 = vcombine.low %v7833_v11, %v7837_v40 }
  0xfb   : > { %v3891_v63 = vrot.slane %v3889_v62, 4  ;;  %v9149_v31 = vrot.slane %v8095_v54, 5  ;;  %v3814_v51 = vrot.slane %v3812_v49, 5  ;;  %v3881_v60 = vor.u32 %v3880_v34, %v8168_v46  ;;  %v8209_v34 = vld [vmem:[%s7059_s13 + $0xac] sm:$0xf] }
  0xfc   : > { %v3884_v9 = vshll.u32 %v8173_v3, 16  ;;  %v9150_v11 = vcombine.low %v7905_v39, %v7909_v55  ;;  %v3800_v40 = vrot.slane %v3799_v26, 4  ;;  %v8202_v54 = vrot.slane %v3898_v50, 5 }
  0xfd   : > { %v3824_v7 = vrot.slane %v3823_v53, 4  ;;  %v3834_v6 = vrot.slane %v3833_v48, 4  ;;  %v3838_v8 = vrot.slane %v3836_v27, 5  ;;  %v3862_v17 = vrot.slane %v3860_v33, 5  ;;  %v8219_v48 = vld [vmem:[%s7059_s13 + $0xb0] sm:$0x1] }
  0xfe   : > { %v3848_v39 = vrot.slane %v3847_v22, 4  ;;  %v3858_v55 = vrot.slane %v3857_v23, 4  ;;  %v3872_v62 = vrot.slane %v3871_v59, 4  ;;  %v3895_v49 = vor.u32 %v3894_v18, %v3891_v63 }
  0xff   : > { %6339 = vmatmul.mubr.msk.bf16.vlgmr.msra.gmra.mrb[0].mxu0 %vm699_vm3, %v7949_v16  ;;  %v8192_v16 = vsel %vm7311_vm7, %v8117_v28, %v9149_v31  ;;  %v3904_v28 = vrot.slane %v3902_v52, 4  ;;  %v3886_v26 = vrot.slane %v3884_v9, 5  ;;  %v3805_v52 = vsel %vm7085_vm4, %v3800_v40, %v8144_v61 }
 0x100   : > { %6185 = vmatmul.mubr.msk.bf16.gmra.mrb[16].mxu1 %vm699_vm3, %v9148_v44  ;;  %6371 = vmatpush3.bf16.msra.mxu0 %v7890_v14  ;;  %v3810_v14 = vrot.slane %v3809_v4, 4  ;;  %v5668_v44 = vld [vmem:[%s7059_s13 + $0xa8] sm:$0xf]  ;;  %v3908_v22 = vshll.u32 %v8206_v57, 16  ;;  %v3829_v33 = vsel %vm7085_vm4, %v3824_v7, %v8156_v20  ;;  %v3839_v23 = vsel %vm7085_vm4, %v3834_v6, %v3838_v8 }
 0x101   : > { %6188 = vmatprep.mubr.msk.bf16.mxu1 %vm699_vm3, %v9150_v11  ;;  %6342 = vmatprep.mubr.msk.bf16.mxu0 %vm699_vm3, %v7960_v29  ;;  %v3882_v29 = vrot.slane %v3881_v60, 4  ;;  %v3913_v4 = vshrl.u32 %v5668_v44, 16  ;;  %v3916_v50 = vshll.u32 %v5668_v44, 16  ;;  %v3905_v53 = vor.u32 %v3904_v28, %v8202_v54  ;;  %v5717_v11 = vld [vmem:[%s7059_s13 + $0x48] sm:$0xe] }
 0x102   : > { %v3815_v27 = vsel %vm7085_vm4, %v3810_v14, %v3814_v51  ;;  %v3922_v59 = vshll.u32 %v8209_v34, 16  ;;  %v3926_v61 = vshrl.u32 %v8209_v34, 16  ;;  %v3853_v63 = vsel %vm7085_vm4, %v3848_v39, %v8158_v10  ;;  %v8284_v39 = vld [vmem:[%s7059_s13 + $0xb8] sm:$0xf] }
 0x103   : > { %v3863_v18 = vsel %vm7085_vm4, %v3858_v55, %v3862_v17  ;;  %v3877_v20 = vsel %vm7085_vm4, %v3872_v62, %v8168_v46  ;;  %v3896_v31 = vrot.slane %v3895_v49, 4  ;;  %v9151_v51 = vcombine.low %v7922_v12, %v7937_v35 }
 0x104   : > { %v3915_v10 = vrot.slane %v3913_v4, 4  ;;  %v3918_v60 = vrot.slane %v3916_v50, 5  ;;  %v3932_v9 = vshll.u32 %v8219_v48, 16  ;;  %v9152_v46 = vcombine.low %v8007_v21, %v8032_v56  ;;  %v5671_v21 = vld [vmem:[%s7059_s13 + $0xb4] sm:$0xf] }
 0x105   : > { %v5338_v12 = vcombine.low %v8083_v42, %v8090_v47  ;;  %v9153_v35 = vsel %vm7085_vm4, %v8103_v5, %v8092_v41  ;;  %v3906_v14 = vrot.slane %v3905_v53, 4  ;;  %v3910_v28 = vrot.slane %v3908_v22, 5  ;;  %v5719_v4 = vld [vmem:[%s7059_s13 + $0x60] sm:$0xe]  ;;  %v5720_v53 = vld [vmem:[%s7059_s13 + $0x6c] sm:$0xe] }
 0x106   : > { %v5339_v56 = vcombine.low %v8107_v43, %v8192_v16  ;;  %v8267_v44 = vcombine.low %v3805_v52, %v3815_v27  ;;  %v8269_v42 = vrot.slane %v3922_v59, 5  ;;  %v3928_v47 = vrot.slane %v3926_v61, 4  ;;  %v9162_v16 = vld [vmem:[#allocation11_spill] sm:$0xff] }
 0x107   : > { %6343 = vmatmul.mubr.msk.bf16.gmra.mrb[4].mxu0 %vm699_vm3, %v8063_v37  ;;  %v3887_v37 = vsel %vm7085_vm4, %v3882_v29, %v3886_v26  ;;  %v8271_v41 = vcombine.low %v3829_v33, %v3839_v23  ;;  %v8273_v5 = vcombine.low %v3853_v63, %v3863_v18  ;;  %v3901_v6 = vsel %vm7085_vm4, %v3896_v31, %v8202_v54  ;;  %v9155_v23 = vld [vmem:[#allocation18_spill] sm:$0xff]  ;;  %v5674_v63 = vld [vmem:[%s7059_s13 + $0xc0] sm:$0xf]  ;;  %v9158_v31 = vld [vmem:[#allocation17_spill] sm:$0xff] }
 0x108   : > { %6189 = vmatmul.mubr.msk.bf16.gmra.mrb[20].mxu1 %vm699_vm3, %v9151_v51  ;;  %6346 = vmatprep.mubr.msk.bf16.mxu0 %vm699_vm3, %v8077_v58  ;;  %v9154_v58 = vsel %vm7085_vm4, %v8065_v19, %v8020_v1  ;;  %v8275_v7 = vcombine.low %v3877_v20, %v3887_v37  ;;  %v5733_v1 = vrot.slane %v5717_v11, 9  ;;  %v5718_v19 = vld [vmem:[%s7059_s13 + $0x54] sm:$0xe]  ;;  %v3919_v8 = vor.u32 %v3918_v60, %v3915_v10  ;;  %v9157_v18 = vld [vmem:[#allocation16_spill] sm:$0xff] }
 0x109   : > { %6192 = vmatprep.mubr.msk.bf16.mxu1 %vm699_vm3, %v9152_v46  ;;  %v5687_v40 = vcombine.low %v9154_v58, %v9153_v35  ;;  %v8281_v17 = vrot.slane %v3932_v9, 5  ;;  %v3937_v55 = vshrl.u32 %v5671_v21, 16  ;;  %v3911_v62 = vsel %vm7085_vm4, %v3906_v14, %v3910_v28  ;;  %v9159_v9 = vld [vmem:[#allocation19_spill] sm:$0xff]  ;;  %v8333_v35 = vld [vmem:[%s7059_s13 + $0xbc] sm:$0x1] }
 0x10a   : > { %v3940_v49 = vshll.u32 %v5671_v21, 16  ;;  %v4396_v29 = vrot.slane %v7915_v0, 5  ;;  %v4399_v26 = vrot.slane %v7969_v38, 5  ;;  %v3929_v50 = vor.u32 %v3928_v47, %v8269_v42  ;;  %v8336_v58 = vld [vmem:[%s7059_s13 + $0xc4] sm:$0xf] }
 0x10b   : > { %v5734_v52 = vrot.slane %v5718_v19, 9  ;;  %v4403_v54 = vrot.slane %v7926_v24, 5  ;;  %v4406_v27 = vrot.slane %v7978_v15, 5  ;;  %v3946_v22 = vshll.u32 %v8284_v39, 16  ;;  %v5721_v19 = vld [vmem:[%s7059_s13 + $0x78] sm:$0xe] }
 0x10c   : > { %v3950_v33 = vshrl.u32 %v8284_v39, 16  ;;  %v8301_v0 = vsel %vm7311_vm7, %v5733_v1, %v4396_v29  ;;  %v4398_v38 = vrot.slane %v4396_v29, 4  ;;  %v9156_v59 = vcombine.low %v8040_v36, %v9155_v23  ;;  %v9160_v23 = vld [vmem:[#allocation20_spill] sm:$0xff] }
 0x10d   : > { %v8308_v24 = vcombine.low %v3901_v6, %v3911_v62  ;;  %v8312_v15 = vsel %vm7311_vm7, %v5734_v52, %v4403_v54  ;;  %v5735_v61 = vrot.slane %v5719_v4, 9  ;;  %v4410_v20 = vrot.slane %v9157_v18, 5  ;;  %v6756_v6 = vld [vmem:[%s7059_s13 + $0xc] sm:$0xff]  }
 0x10e   : > { %v8318_v36 = vsel %vm7311_vm7, %v4398_v38, %v4399_v26  ;;  %v4413_v51 = vrot.slane %v9158_v31, 5  ;;  %v5736_v37 = vrot.slane %v5720_v53, 9  ;;  %v4417_v11 = vrot.slane %v9159_v9, 5 }
 0x10f   : > { %6347 = vmatmul.mubr.msk.bf16.gmra.mrb[8].mxu0 %vm699_vm3, %v8086_v30  ;;  %v4405_v30 = vrot.slane %v4403_v54, 4  ;;  %v5750_v10 = vcombine.low %v8301_v0, %v8318_v36  ;;  %v4420_v46 = vrot.slane %v8136_v45, 5  ;;  %v8342_v14 = vsel %vm7311_vm7, %v5735_v61, %v4410_v20 }
 0x110   : > { %6193 = vmatmul.mubr.msk.bf16.gmra.mrb[24].mxu1 %vm699_vm3, %v9156_v59  ;;  %6350 = vmatprep.mubr.msk.bf16.mxu0 %vm699_vm3, %v5687_v40  ;;  %v4412_v28 = vrot.slane %v4410_v20, 4  ;;  %v8344_v21 = vrot.slane %v3937_v55, 4  ;;  %v3961_v47 = vshrl.u32 %v5674_v63, 16  ;;  %v8348_v45 = vsel %vm7311_vm7, %v5736_v37, %v4417_v11  ;;  %v5448_v55 = vld [vmem:[%s7059_s13 + $0x78] sm:$0xf] }
 0x111   : > { %6196 = vmatprep.mubr.msk.bf16.mxu1 %vm699_vm3, %v5338_v12  ;;  %v8326_v60 = vsel %vm7311_vm7, %v4405_v30, %v4406_v27  ;;  %v8330_v12 = vrot.slane %v3919_v8, 4  ;;  %v4419_v1 = vrot.slane %v4417_v11, 4  ;;  %v8352_v8 = vrot.slane %v3929_v50, 4  ;;  %v9161_v59 = vld [vmem:[#allocation23_spill] sm:$0xff] }
 0x112   : > { %v5751_v40 = vcombine.low %v8312_v15, %v8326_v60  ;;  %v8354_v62 = vrot.slane %v3940_v49, 5  ;;  %v3964_v29 = vshll.u32 %v5674_v63, 16  ;;  %v8358_v26 = vsel %vm7311_vm7, %v4412_v28, %v4413_v51  ;;  %v9164_v28 = vld [vmem:[#allocation21_spill] sm:$0xff]  ;;  %v6819_v60 = vld [vmem:[%s7059_s13 + $0xa0] sm:$0xf] }
 0x113   : > { %v8361_v4 = vrot.slane %v3946_v22, 5  ;;  %v8363_v52 = vrot.slane %v3950_v33, 4  ;;  %v5752_v54 = vcombine.low %v8342_v14, %v8358_v26  ;;  %v8369_v27 = vsel %vm7311_vm7, %v4419_v1, %v4420_v46  ;;  %v5722_v33 = vld [vmem:[%s7059_s13 + $0x84] sm:$0xe]  ;;  %v6757_v1 = vld [vmem:[%s7059_s13 + $0x18] sm:$0xff]  }
 0x114   : > { %v3956_v49 = vshll.u32 %v8333_v35, 16  ;;  %v3970_v50 = vshll.u32 %v8336_v58, 16  ;;  %v5753_v53 = vcombine.low %v8348_v45, %v8369_v27  ;;  %v5737_v22 = vrot.slane %v5721_v19, 9  ;;  %v6823_v27 = vld [vmem:[%s7059_s13 + $0xac] sm:$0xf] }
 0x115   : > { %v3963_v38 = vrot.slane %v3961_v47, 4  ;;  %v4427_v30 = vrot.slane %v9161_v59, 5  ;;  %v2286_v61 = vshrl.u32 %v5448_v55, 16  ;;  %v3966_v63 = vrot.slane %v3964_v29, 5  ;;  %v5677_v29 = vld [vmem:[%s7059_s13 + $0xcc] sm:$0xf] }
 0x116   : > { %v3974_v18 = vshrl.u32 %v8336_v58, 16  ;;  %v2289_v43 = vshll.u32 %v5448_v55, 16  ;;  %v5738_v37 = vrot.slane %v5722_v33, 9  ;;  %v3925_v9 = vsel %vm7085_vm4, %v8330_v12, %v8269_v42  ;;  %v8412_v55 = vld [vmem:[%s7059_s13 + $0xd0] sm:$0xf] }
 0x117   : > { %6351 = vmatmul.mubr.msk.bf16.gmra.mrb[12].mxu0 %vm699_vm3, %v8267_v44  ;;  %v4424_v44 = vrot.slane %v9160_v23, 5  ;;  %v2288_v51 = vrot.slane %v2286_v61, 4  ;;  %v3943_v11 = vor.u32 %v8354_v62, %v8344_v21  ;;  %v4431_v47 = vrot.slane %v9164_v28, 5  ;;  %v6758_v21 = vld [vmem:[%s7059_s13 + $0x24] sm:$0xff]  }
 0x118   : > { %6197 = vmatmul.mubr.msk.bf16.gmra.mrb[28].mxu1 %vm699_vm3, %v5339_v56  ;;  %6354 = vmatprep.mubr.msk.bf16.mxu0 %vm699_vm3, %v8271_v41  ;;  %v9163_v56 = vld [vmem:[#allocation12_spill] sm:$0xff]  ;;  %v2291_v46 = vrot.slane %v2289_v43, 5  ;;  %v3935_v19 = vsel %vm7085_vm4, %v8352_v8, %v8281_v17  ;;  %v4434_v12 = vrot.slane %v8164_v2, 5  ;;  %v8420_v62 = vrot.slane %v3970_v50, 5  ;;  %v5723_v8 = vld [vmem:[%s7059_s13 + $0x90] sm:$0xe] }
 0x119   : > { %6202 = vmatprep.mubr.msk.bf16.mxu1 %vm699_vm3, %v6756_v6  ;;  %v2308_v41 = vsel %vm7085_vm4, %v9163_v56, %v9162_v16  ;;  %v8394_v20 = vsel %vm7311_vm7, %v5737_v22, %v4424_v44  ;;  %v4426_v31 = vrot.slane %v4424_v44, 4  ;;  %v3953_v6 = vor.u32 %v8363_v52, %v8361_v4  ;;  %v8426_v52 = vld [vmem:[%s7059_s13 + $0xc8] sm:$0x1] }
 0x11a   : > { %v3976_v22 = vrot.slane %v3974_v18, 4  ;;  %v2292_v17 = vor.u32 %v2291_v46, %v2288_v51  ;;  %v3958_v23 = vrot.slane %v3956_v49, 5  ;;  %v3967_v44 = vor.u32 %v3966_v63, %v3963_v38  ;;  %v9166_v16 = vld [vmem:[#allocation9_spill] sm:$0xff]  ;;  %v9167_v51 = vld [vmem:[#allocation10_spill] sm:$0xff] }
 0x11b   : > { %v8416_v42 = vsel %vm7311_vm7, %v4426_v31, %v4427_v30  ;;  %v8430_v59 = vsel %vm7311_vm7, %v5738_v37, %v4431_v47  ;;  %v4433_v30 = vrot.slane %v4431_v47, 4  ;;  %v3985_v2 = vshrl.u32 %v5677_v29, 16 }
 0x11c   : > { %v5754_v33 = vcombine.low %v8394_v20, %v8416_v42  ;;  %v3988_v50 = vshll.u32 %v5677_v29, 16  ;;  %v3994_v61 = vshll.u32 %v8412_v55, 16  ;;  %v2293_v18 = vrot.slane %v2292_v17, 4  ;;  %v6759_v29 = vld [vmem:[%s7059_s13 + $0x30] sm:$0xff]  }
 0x11d   : > { %v3998_v49 = vshrl.u32 %v8412_v55, 16  ;;  %v8441_v38 = vsel %vm7311_vm7, %v4433_v30, %v4434_v12  ;;  %v5739_v63 = vrot.slane %v5723_v8, 9  ;;  %v3977_v56 = vor.u32 %v3976_v22, %v8420_v62 }
 0x11e   : > { %v3980_v31 = vshll.u32 %v8426_v52, 16  ;;  %v5755_v37 = vcombine.low %v8430_v59, %v8441_v38  ;;  %v5693_v46 = vcombine.low %v3925_v9, %v3935_v19  ;;  %v3944_v28 = vrot.slane %v3943_v11, 4  ;;  %v5724_v11 = vld [vmem:[%s7059_s13 + $0x9c] sm:$0xe] }
 0x11f   : > { %6355 = vmatmul.mubr.msk.bf16.gmra.mrb[16].mxu0 %vm699_vm3, %v8273_v5  ;;  %v9165_v5 = vld [vmem:[#allocation22_spill] sm:$0xff]  ;;  %v3954_v47 = vrot.slane %v3953_v6, 4  ;;  %v3968_v12 = vrot.slane %v3967_v44, 4  ;;  %v4441_v8 = vrot.slane %v8173_v3, 5  ;;  %v3987_v30 = vrot.slane %v3985_v2, 4  ;;  %v6760_v19 = vld [vmem:[%s7059_s13 + $0x3c] sm:$0xff]  }
 0x120   : > { %6203 = vmatmul.mubr.msk.bf16.vlgmr.msra.gmra.mrb[0].mxu1 %vm699_vm3, %v6757_v1  ;;  %6358 = vmatprep.mubr.msk.bf16.mxu0 %vm699_vm3, %v8275_v7  ;;  %v4438_v43 = vrot.slane %v9165_v5, 5  ;;  %v2298_v7 = vsel %vm7085_vm4, %v2293_v18, %v9167_v51  ;;  %v3990_v18 = vrot.slane %v3988_v50, 5  ;;  %v8464_v5 = vrot.slane %v3994_v61, 5 }
 0x121   : > { %6405 = vmatpush3.bf16.msra.mxu1 %v9166_v16  ;;  %6206 = vmatprep.mubr.msk.bf16.mxu1 %vm699_vm3, %v6758_v21  ;;  %v8453_v1 = vcombine.low %v2298_v7, %v2308_v41  ;;  %v8457_v21 = vld [vmem:[%s7059_s13 + $0xd4] sm:$0x1]  ;;  %v4000_v9 = vrot.slane %v3998_v49, 4  ;;  %v3978_v41 = vrot.slane %v3977_v56, 4  ;;  %v3982_v6 = vrot.slane %v3980_v31, 5 }
 0x122   : > { %v8461_v22 = vsel %vm7311_vm7, %v5739_v63, %v4438_v43  ;;  %v4440_v17 = vrot.slane %v4438_v43, 4  ;;  %v3949_v63 = vsel %vm7085_vm4, %v3944_v28, %v8361_v4  ;;  %v3959_v2 = vsel %vm7085_vm4, %v3954_v47, %v3958_v23  ;;  %v6810_v16 = vld [vmem:[%s7059_s13 + $0x1c] sm:$0xf]  ;;  %v5725_v28 = vld [vmem:[%s7059_s13 + $0xa8] sm:$0xe] }
 0x123   : > { %v4004_v50 = vshll.u32 %v8457_v21, 16  ;;  %v5740_v61 = vrot.slane %v5724_v11, 9  ;;  %v4445_v49 = vrot.slane %v8161_v25, 5  ;;  %v3973_v4 = vsel %vm7085_vm4, %v3968_v12, %v8420_v62  ;;  %v5713_v62 = vld [vmem:[%s7059_s13 + $0x18] sm:$0xe]  ;;  %v6761_v47 = vld [vmem:[%s7059_s13 + $0x48] sm:$0xff]  }
 0x124   : > { %v8470_v44 = vsel %vm7311_vm7, %v4440_v17, %v4441_v8  ;;  %v4001_v43 = vor.u32 %v4000_v9, %v8464_v5  ;;  %v4448_v23 = vrot.slane %v8206_v57, 5  ;;  %v3983_v25 = vsel %vm7085_vm4, %v3978_v41, %v3982_v6  ;;  %v6811_v11 = vld [vmem:[%s7059_s13 + $0x20] sm:$0x1] }
 0x125   : > { %v5756_v3 = vcombine.low %v8461_v22, %v8470_v44  ;;  %v4368_v56 = vrot.slane %v6810_v16, 5  ;;  %v8496_v31 = vsel %vm7311_vm7, %v5740_v61, %v4445_v49  ;;  %v4447_v51 = vrot.slane %v4445_v49, 4  ;;  %v5726_v49 = vld [vmem:[%s7059_s13 + $0xb4] sm:$0xe] }
 0x126   : > { %v5694_v7 = vcombine.low %v3949_v63, %v3959_v2  ;;  %v4002_v17 = vrot.slane %v4001_v43, 4  ;;  %v5741_v41 = vrot.slane %v5725_v28, 9  ;;  %v4452_v6 = vrot.slane %v8209_v34, 5  ;;  %v5714_v2 = vld [vmem:[%s7059_s13 + $0x24] sm:$0xe] }
 0x127   : > { %6359 = vmatmul.mubr.msk.bf16.gmra.mrb[20].mxu0 %vm699_vm3, %v8308_v24  ;;  %v3991_v24 = vor.u32 %v3990_v18, %v3987_v30  ;;  %v8501_v57 = vsel %vm7311_vm7, %v4447_v51, %v4448_v23  ;;  %v6762_v30 = vld [vmem:[%s7059_s13 + $0x54] sm:$0xff]   ;;  %v5729_v18 = vrot.slane %v5713_v62, 9  ;;  %v4370_v9 = vrot.slane %v4368_v56, 4  ;;  %v6814_v28 = vld [vmem:[%s7059_s13 + $0x2c] sm:$0x1] }
 0x128   : > { %6207 = vmatmul.mubr.msk.bf16.gmra.mrb[4].mxu1 %vm699_vm3, %v6759_v29  ;;  %6362 = vmatprep.mubr.msk.bf16.mxu0 %vm699_vm3, %v5693_v46  ;;  %v4006_v46 = vrot.slane %v4004_v50, 5  ;;  %v5695_v29 = vcombine.low %v3973_v4, %v3983_v25  ;;  %v5757_v8 = vcombine.low %v8496_v31, %v8501_v57  ;;  %v4455_v63 = vrot.slane %v8219_v48, 5  ;;  %v6812_v50 = vld [vmem:[%s7059_s13 + $0x28] sm:$0xf]  ;;  %v5715_v25 = vld [vmem:[%s7059_s13 + $0x30] sm:$0xe] }
 0x129   : > { %6210 = vmatprep.mubr.msk.bf16.mxu1 %vm699_vm3, %v6760_v19  ;;  %v3992_v12 = vrot.slane %v3991_v24, 4  ;;  %v4371_v19 = vrot.slane %v6811_v11, 5  ;;  %v4375_v61 = vrot.slane %v6812_v50, 5  ;;  %v8524_v48 = vsel %vm7311_vm7, %v5741_v41, %v4452_v6  ;;  %v6764_v11 = vld [vmem:[%s7059_s13 + $0x6c] sm:$0xff]   ;;  %v9168_v41 = vld [vmem:[#allocation13_spill] sm:$0xff] }
 0x12a   : > { %v4007_v34 = vsel %vm7085_vm4, %v4002_v17, %v4006_v46  ;;  %v4454_v24 = vrot.slane %v4452_v6, 4  ;;  %v4369_v43 = vsel %vm7311_vm7, %v5729_v18, %v4368_v56  ;;  %v5730_v51 = vrot.slane %v5714_v2, 9  ;;  %v5727_v50 = vld [vmem:[%s7059_s13 + $0xc0] sm:$0xe]  ;;  %v6828_v31 = vld [vmem:[%s7059_s13 + $0xc8] sm:$0x1] }
 0x12b   : > { %v3997_v4 = vsel %vm7085_vm4, %v3992_v12, %v8464_v5  ;;  %v4372_v23 = vsel %vm7311_vm7, %v4370_v9, %v4371_v19  ;;  %v6813_v5 = vld [vmem:[%s7059_s13 + $0x34] sm:$0xf]  ;;  %v6763_v12 = vld [vmem:[%s7059_s13 + $0x60] sm:$0xff]   ;;  %v5731_v18 = vrot.slane %v5715_v25, 9  ;;  %v4462_v9 = vrot.slane %v8333_v35, 5 }
 0x12c   : > { %v4382_v16 = vrot.slane %v6813_v5, 5  ;;  %v8535_v62 = vsel %vm7311_vm7, %v4454_v24, %v4455_v63  ;;  %v5696_v46 = vcombine.low %v3997_v4, %v4007_v34  ;;  %v5746_v17 = vcombine.low %v4369_v43, %v4372_v23  ;;  %v5716_v24 = vld [vmem:[%s7059_s13 + $0x3c] sm:$0xe] }
 0x12d   : > { %v5758_v56 = vcombine.low %v8524_v48, %v8535_v62  ;;  %v4385_v6 = vrot.slane %v9168_v41, 5  ;;  %v4376_v35 = vsel %vm7311_vm7, %v5730_v51, %v4375_v61  ;;  %v5743_v5 = vrot.slane %v5727_v50, 9 }
 0x12e   : > { %v4384_v19 = vrot.slane %v4382_v16, 4  ;;  %v4383_v23 = vsel %vm7311_vm7, %v5731_v18, %v4382_v16  ;;  %v4469_v51 = vrot.slane %v8426_v52, 5  ;;  %v2449_v57 = vshll.u32 %v6828_v31, 16 }
 0x12f   : > { %6363 = vmatmul.mubr.msk.bf16.gmra.mrb[24].mxu0 %vm699_vm3, %v5694_v7  ;;  %v5742_v7 = vrot.slane %v5726_v49, 9 }
 0x130   : > { %6211 = vmatmul.mubr.msk.bf16.gmra.mrb[8].mxu1 %vm699_vm3, %v6761_v47  ;;  %6366 = vmatprep.mubr.msk.bf16.mxu0 %vm699_vm3, %v5695_v29  ;;  %v4378_v47 = vrot.slane %v6814_v28, 5  ;;  %v4459_v29 = vrot.slane %v8284_v39, 5  ;;  %v9169_v39 = vld [vmem:[#allocation14_spill] sm:$0xff]  ;;  %v4386_v25 = vsel %vm7311_vm7, %v4384_v19, %v4385_v6  ;;  %v5732_v28 = vrot.slane %v5716_v24, 9 }
 0x131   : > { %6214 = vmatprep.mubr.msk.bf16.mxu1 %vm699_vm3, %v6762_v30  ;;  %v4377_v30 = vrot.slane %v4375_v61, 4  ;;  %v4389_v49 = vrot.slane %v9169_v39, 5  ;;  %v4466_v61 = vrot.slane %v8336_v58, 5  ;;  %v6815_v39 = vld [vmem:[%s7059_s13 + $0x70] sm:$0xf]  ;;  %v4473_v24 = vrot.slane %v8412_v55, 5 }
 0x132   : > { %v8547_v63 = vsel %vm7311_vm7, %v5742_v7, %v4459_v29  ;;  %v4461_v2 = vrot.slane %v4459_v29, 4  ;;  %v5445_v7 = vld [vmem:[%s7059_s13 + $0x6c] sm:$0xf]  ;;  %v9170_v29 = vld [vmem:[#allocation15_spill] sm:$0xff] }
 0x133   : > { %v4379_v34 = vsel %vm7311_vm7, %v4377_v30, %v4378_v47  ;;  %v4391_v47 = vrot.slane %v4389_v49, 4  ;;  %v6765_v30 = vld [vmem:[%s7059_s13 + $0x78] sm:$0xff]   ;;  %v8578_v16 = vsel %vm7311_vm7, %v5743_v5, %v4466_v61  ;;  %v4468_v18 = vrot.slane %v4466_v61, 4 }
 0x134   : > { %v8554_v4 = vsel %vm7311_vm7, %v4461_v2, %v4462_v9  ;;  %v5748_v9 = vcombine.low %v4383_v23, %v4386_v25  ;;  %v2262_v19 = vshrl.u32 %v5445_v7, 16  ;;  %v2265_v41 = vshll.u32 %v5445_v7, 16 }
 0x135   : > { %v5759_v43 = vcombine.low %v8547_v63, %v8554_v4  ;;  %v8583_v58 = vsel %vm7311_vm7, %v4468_v18, %v4469_v51  ;;  %v4390_v6 = vsel %vm7311_vm7, %v5732_v28, %v4389_v49  ;;  %v4476_v49 = vrot.slane %v8457_v21, 5  ;;  %v6767_v51 = vld [vmem:[%s7059_s13 + $0x90] sm:$0xff]   ;;  %v6768_v21 = vld [vmem:[%s7059_s13 + $0x9c] sm:$0xff]  }
 0x136   : > { %v5760_v50 = vcombine.low %v8578_v16, %v8583_v58  ;;  %v2264_v23 = vrot.slane %v2262_v19, 4  ;;  %v2267_v25 = vrot.slane %v2265_v41, 5  ;;  %v4475_v7 = vrot.slane %v4473_v24, 4 }
 0x137   : > { %6367 = vmatmul.mubr.msk.bf16.gmra.mrb[28].mxu0 %vm699_vm3, %v5696_v46  ;;  %v5747_v46 = vcombine.low %v4376_v35, %v4379_v34  ;;  %v2271_v35 = vshll.u32 %v6815_v39, 16  ;;  %v2275_v34 = vshrl.u32 %v6815_v39, 16 }
 0x138   : > { %6215 = vmatmul.mubr.msk.bf16.gmra.mrb[12].mxu1 %vm699_vm3, %v6763_v12  ;;  %6372 = vmatprep.mubr.msk.bf16.mxu0 %vm699_vm3, %v5746_v17  ;;  %v4392_v12 = vrot.slane %v9170_v29, 5  ;;  %v5728_v17 = vld [vmem:[%s7059_s13 + $0xcc] sm:$0xe]  ;;  %v8605_v55 = vsel %vm7311_vm7, %v4475_v7, %v4476_v49 }
 0x139   : > { %6218 = vmatprep.mubr.msk.bf16.mxu1 %vm699_vm3, %v6764_v11  ;;  %v6766_v11 = vld [vmem:[%s7059_s13 + $0x84] sm:$0xff]   ;;  %v5744_v52 = vrot.slane %v5728_v17, 9  ;;  %v2277_v28 = vrot.slane %v2275_v34, 4  ;;  %v6816_v17 = vld [vmem:[%s7059_s13 + $0x74] sm:$0x1] }
 0x13a   : > { %v4393_v2 = vsel %vm7311_vm7, %v4391_v47, %v4392_v12  ;;  %v5451_v47 = vld [vmem:[%s7059_s13 + $0x84] sm:$0xf]  ;;  %v2268_v12 = vor.u32 %v2267_v25, %v2264_v23  ;;  %v6770_v34 = vld [vmem:[%s7059_s13 + $0xb4] sm:$0xff]  }
 0x13b   : > { %v8600_v5 = vsel %vm7311_vm7, %v5744_v52, %v4473_v24  ;;  %v5749_v61 = vcombine.low %v4390_v6, %v4393_v2  ;;  %v2313_v18 = vshll.u32 %v5451_v47, 16  ;;  %v5454_v6 = vld [vmem:[%s7059_s13 + $0x90] sm:$0xf]  ;;  %v6769_v2 = vld [vmem:[%s7059_s13 + $0xa8] sm:$0xff]  }
 0x13c   : > { %v5761_v29 = vcombine.low %v8600_v5, %v8605_v55  ;;  %v2269_v52 = vrot.slane %v2268_v12, 4  ;;  %v2334_v23 = vshrl.u32 %v5454_v6, 16  ;;  %v2337_v25 = vshll.u32 %v5454_v6, 16 }
 0x13d   : > { %v2367_v12 = vshll.u32 %v6819_v60, 16 }
 0x13e   : > { %v2339_v14 = vrot.slane %v2337_v25, 5  ;;  %v6822_v25 = vld [vmem:[%s7059_s13 + $0xa4] sm:$0x1] }
 0x13f   : > { %6373 = vmatmul.mubr.msk.bf16.vlgmr.msra.gmra.mrb[0].mxu0 %vm699_vm3, %v5747_v46  ;;  %v2273_v46 = vrot.slane %v2271_v35, 5  ;;  %v5457_v35 = vld [vmem:[%s7059_s13 + $0x9c] sm:$0xf]  ;;  %v8647_v6 = vrot.slane %v2367_v12, 5 }
 0x140   : > { %6219 = vmatmul.mubr.msk.bf16.gmra.mrb[16].mxu1 %vm699_vm3, %v6765_v30  ;;  %6376 = vmatprep.mubr.msk.bf16.mxu0 %vm699_vm3, %v5748_v9  ;;  %v2281_v30 = vshll.u32 %v6816_v17, 16  ;;  %v2310_v9 = vshrl.u32 %v5451_v47, 16  ;;  %v2361_v47 = vshll.u32 %v5457_v35, 16  ;;  %v6820_v17 = vld [vmem:[%s7059_s13 + $0x8c] sm:$0x1] }
 0x141   : > { %6222 = vmatprep.mubr.msk.bf16.mxu1 %vm699_vm3, %v6766_v11  ;;  %v2278_v13 = vor.u32 %v2277_v28, %v2273_v46  ;;  %v6817_v11 = vld [vmem:[%s7059_s13 + $0x88] sm:$0xf]  ;;  %v2274_v7 = vsel %vm7085_vm4, %v2269_v52, %v2273_v46 }
 0x142   : > { %v2319_v19 = vshll.u32 %v6817_v11, 16  ;;  %v2323_v41 = vshrl.u32 %v6817_v11, 16  ;;  %v2283_v0 = vrot.slane %v2281_v30, 5  ;;  %v2312_v36 = vrot.slane %v2310_v9, 4 }
 0x143   : > { %v2279_v39 = vrot.slane %v2278_v13, 4  ;;  %v2329_v30 = vshll.u32 %v6820_v17, 16  ;;  %v2336_v9 = vrot.slane %v2334_v23, 4  ;;  %v2363_v11 = vrot.slane %v2361_v47, 5 }
 0x144   : > { %v8624_v24 = vrot.slane %v2319_v19, 5  ;;  %v2325_v49 = vrot.slane %v2323_v41, 4  ;;  %v6771_v19 = vld [vmem:[%s7059_s13 + $0xc0] sm:$0xff]  }
 0x145   : > { %v2284_v46 = vsel %vm7085_vm4, %v2279_v39, %v2283_v0  ;;  %v5460_v39 = vld [vmem:[%s7059_s13 + $0xa8] sm:$0xf] }
 0x146   : > { %v2326_v13 = vor.u32 %v2325_v49, %v8624_v24  ;;  %v5478_v41 = vcombine.low %v2274_v7, %v2284_v46  ;;  %v2377_v7 = vshll.u32 %v6822_v25, 16  ;;  %v2385_v45 = vshll.u32 %v5460_v39, 16 }
 0x147   : > { %6377 = vmatmul.mubr.msk.bf16.gmra.mrb[4].mxu0 %vm699_vm3, %v5749_v61  ;;  %v6818_v61 = vld [vmem:[%s7059_s13 + $0x94] sm:$0xf] }
 0x148   : > { %6223 = vmatmul.mubr.msk.bf16.gmra.mrb[20].mxu1 %vm699_vm3, %v6767_v51  ;;  %6380 = vmatprep.mubr.msk.bf16.mxu0 %vm699_vm3, %v5750_v10  ;;  %v2315_v10 = vrot.slane %v2313_v18, 5  ;;  %v2343_v51 = vshll.u32 %v6818_v61, 16  ;;  %v2347_v28 = vshrl.u32 %v6818_v61, 16  ;;  %v2327_v0 = vrot.slane %v2326_v13, 4 }
 0x149   : > { %6226 = vmatprep.mubr.msk.bf16.mxu1 %vm699_vm3, %v6768_v21  ;;  %v2358_v21 = vshrl.u32 %v5457_v35, 16  ;;  %v6821_v35 = vld [vmem:[%s7059_s13 + $0x98] sm:$0x1]  ;;  %v2382_v61 = vshrl.u32 %v5460_v39, 16  ;;  %v5466_v39 = vld [vmem:[%s7059_s13 + $0xc0] sm:$0xf] }
 0x14a   : > { %v2316_v15 = vor.u32 %v2315_v10, %v2312_v36  ;;  %v8644_v26 = vrot.slane %v2343_v51, 5  ;;  %v2331_v36 = vrot.slane %v2329_v30, 5  ;;  %v2340_v10 = vor.u32 %v2339_v14, %v2336_v9  ;;  %v5463_v51 = vld [vmem:[%s7059_s13 + $0xb4] sm:$0xf] }
 0x14b   : > { %v2360_v18 = vrot.slane %v2358_v21, 4  ;;  %v2395_v21 = vshrl.u32 %v6823_v27, 16  ;;  %v2406_v20 = vshrl.u32 %v5463_v51, 16  ;;  %v2409_v42 = vshll.u32 %v5463_v51, 16 }
 0x14c   : > { %v2317_v52 = vrot.slane %v2316_v15, 4  ;;  %v2332_v46 = vsel %vm7085_vm4, %v2327_v0, %v2331_v36  ;;  %v2341_v15 = vrot.slane %v2340_v10, 4  ;;  %v2379_v30 = vrot.slane %v2377_v7, 5 }
 0x14d   : > { %v2364_v23 = vor.u32 %v2363_v11, %v2360_v18  ;;  %v2384_v9 = vrot.slane %v2382_v61, 4  ;;  %v2397_v11 = vrot.slane %v2395_v21, 4  ;;  %v6827_v61 = vld [vmem:[%s7059_s13 + $0xbc] sm:$0x1] }
 0x14e   : > { %v2322_v47 = vsel %vm7085_vm4, %v2317_v52, %v8624_v24  ;;  %v2346_v0 = vsel %vm7085_vm4, %v2341_v15, %v8644_v26  ;;  %v2425_v22 = vshll.u32 %v6827_v61, 16 }
 0x14f   : > { %6381 = vmatmul.mubr.msk.bf16.gmra.mrb[8].mxu0 %vm699_vm3, %v5751_v40  ;;  %v2371_v40 = vshrl.u32 %v6819_v60, 16  ;;  %v2365_v17 = vrot.slane %v2364_v23, 4  ;;  %v5480_v24 = vcombine.low %v2322_v47, %v2332_v46 }
 0x150   : > { %6227 = vmatmul.mubr.msk.bf16.gmra.mrb[24].mxu1 %vm699_vm3, %v6769_v2  ;;  %6384 = vmatprep.mubr.msk.bf16.mxu0 %vm699_vm3, %v5752_v54  ;;  %v2349_v54 = vrot.slane %v2347_v28, 4 }
 0x151   : > { %6230 = vmatprep.mubr.msk.bf16.mxu1 %vm699_vm3, %v6770_v34  ;;  %v2373_v2 = vrot.slane %v2371_v40, 4  ;;  %v2353_v34 = vshll.u32 %v6821_v35, 16  ;;  %v2370_v10 = vsel %vm7085_vm4, %v2365_v17, %v8647_v6  ;;  %v2451_v17 = vrot.slane %v2449_v57, 5 }
 0x152   : > { %v2350_v49 = vor.u32 %v2349_v54, %v8644_v26  ;;  %v2387_v54 = vrot.slane %v2385_v45, 5  ;;  %v6825_v26 = vld [vmem:[%s7059_s13 + $0xb0] sm:$0x1] }
 0x153   : > { %v2374_v28 = vor.u32 %v2373_v2, %v8647_v6  ;;  %v2355_v60 = vrot.slane %v2353_v34, 5  ;;  %v2401_v35 = vshll.u32 %v6825_v26, 16  ;;  %v2430_v34 = vshrl.u32 %v5466_v39, 16 }
 0x154   : > { %v2351_v13 = vrot.slane %v2350_v49, 4  ;;  %v2388_v38 = vor.u32 %v2387_v54, %v2384_v9  ;;  %v2433_v6 = vshll.u32 %v5466_v39, 16  ;;  %v6826_v49 = vld [vmem:[%s7059_s13 + $0xc4] sm:$0xf] }
 0x155   : > { %v2375_v14 = vrot.slane %v2374_v28, 4  ;;  %v2439_v23 = vshll.u32 %v6826_v49, 16  ;;  %v2443_v25 = vshrl.u32 %v6826_v49, 16  ;;  %v2403_v45 = vrot.slane %v2401_v35, 5 }
 0x156   : > { %v2356_v36 = vsel %vm7085_vm4, %v2351_v13, %v2355_v60  ;;  %v2389_v51 = vrot.slane %v2388_v38, 4  ;;  %v2427_v60 = vrot.slane %v2425_v22, 5 }
 0x157   : > { %6385 = vmatmul.mubr.msk.bf16.gmra.mrb[12].mxu0 %vm699_vm3, %v5753_v53  ;;  %v2391_v53 = vshll.u32 %v6823_v27, 16  ;;  %v2380_v59 = vsel %vm7085_vm4, %v2375_v14, %v2379_v30  ;;  %v5481_v44 = vcombine.low %v2346_v0, %v2356_v36  ;;  %v2432_v27 = vrot.slane %v2430_v34, 4 }
 0x158   : > { %6231 = vmatmul.mubr.msk.bf16.gmra.mrb[28].mxu1 %vm699_vm3, %v6771_v19  ;;  %6388 = vmatprep.mubr.msk.bf16.mxu0 %vm699_vm3, %v5754_v33  ;;  %v6824_v33 = vld [vmem:[%s7059_s13 + $0xb8] sm:$0xf]  ;;  %v2408_v19 = vrot.slane %v2406_v20, 4  ;;  %v2441_v21 = vrot.slane %v2439_v23, 5  ;;  %v2445_v47 = vrot.slane %v2443_v25, 4  ;;  %s5240_s13 = sshll.u32 %s8736_s12, 7 }
 0x159   : > { %6252 = vmatprep.mubr.msk.bf16.mxu1 %vm699_vm3, %v5478_v41  ;;  %v2415_v12 = vshll.u32 %v6824_v33, 16  ;;  %v2419_v40 = vshrl.u32 %v6824_v33, 16  ;;  %v2393_v18 = vrot.slane %v2391_v53, 5  ;;  %v2411_v41 = vrot.slane %v2409_v42, 5  ;;  %s8753_s14 = scalar_lea.vmem [#allocation2], %s5240_s13 }
 0x15a   : > { %v2435_v53 = vrot.slane %v2433_v6, 5  ;;  %s5095_s23 = sshll.u32 %s8753_s14, 4  ;;  %s8885_s23 = int_to_ptr.vmem [resolvable:$true] %s5095_s23 }
 0x15b   : > { %v2417_v52 = vrot.slane %v2415_v12, 5  ;;  %v2421_v2 = vrot.slane %v2419_v40, 4  ;;  %v2394_v20 = vsel %vm7085_vm4, %v2389_v51, %v2393_v18  ;;  %v2446_v12 = vor.u32 %v2445_v47, %v2441_v21  ;;  %s6829_s5 = scalar_lea.vmem %s8885_s23, 2048  ;;  %p6836_p0 = scmp.lt.s32.totalorder %s8885_s23, %s6834_s7 }
 0x15c   : > { %v2436_v33 = vor.u32 %v2435_v53, %v2432_v27  ;;  %p6830_p11 = scmp.ne.s32.totalorder %s8885_s23, %s6829_s5  ;;  %p6837_p1 = scmp.lt.s32.totalorder %s6835_s8, %s6829_s5 }
 0x15d   : > { %v2422_v7 = vor.u32 %v2421_v2, %v2417_v52  ;;  %v2447_v13 = vrot.slane %v2446_v12, 4 }
 0x15e   : > { %v2437_v40 = vrot.slane %v2436_v33, 4  ;;  %p6831_p12 = pnand %p6830_p11, %p7023_p5  ;;  %p6838_p2 = por %p6837_p1, %p6836_p0 }
 0x15f   : > { %6389 = vmatmul.mubr.msk.bf16.gmra.mrb[16].mxu0 %vm699_vm3, %v5755_v37  ;;  %v2398_v37 = vor.u32 %v2397_v11, %v2393_v18  ;;  %v2423_v15 = vrot.slane %v2422_v7, 4  ;;  %v2452_v9 = vsel %vm7085_vm4, %v2447_v13, %v2451_v17 }
 0x160   : > { %6253 = vmatmul.mubr.msk.bf16.vlgmr.msra.gmra.mrb[16].mxu1 %vm699_vm3, %v8453_v1  ;;  %6392 = vmatprep.mubr.msk.bf16.mxu0 %vm699_vm3, %v5756_v3  ;;  %v2412_v1 = vor.u32 %v2411_v41, %v2408_v19  ;;  %v5482_v3 = vcombine.low %v2370_v10, %v2380_v59  ;;  %v2442_v30 = vsel %vm7085_vm4, %v2437_v40, %v2441_v21  ;;  %p6832_p13 = pneg %p6831_p12 }
 0x161   : > { %6256 = vmatprep.mubr.msk.bf16.mxu1 %vm699_vm3, %v5480_v24  ;;  %v2399_v28 = vrot.slane %v2398_v37, 4  ;;  %v2428_v48 = vsel %vm7085_vm4, %v2423_v15, %v2427_v60  ;;  %v5485_v14 = vcombine.low %v2442_v30, %v2452_v9 }
 0x162   : > { %v2413_v46 = vrot.slane %v2412_v1, 4  ;;  %p6839_p3 = pnand %p6838_p2, %p6832_p13 }
 0x163   : > { %v2404_v42 = vsel %vm7085_vm4, %v2399_v28, %v2403_v45 }
 0x164   : > { %v5483_v62 = vcombine.low %v2394_v20, %v2404_v42 }
 0x167   : > { %6393 = vmatmul.mubr.msk.bf16.gmra.mrb[20].mxu0 %vm699_vm3, %v5757_v8  ;;  %v2418_v8 = vsel %vm7085_vm4, %v2413_v46, %v2417_v52 }
 0x168   : > { %6257 = vmatmul.mubr.msk.bf16.gmra.mrb[20].mxu1 %vm699_vm3, %v5481_v44  ;;  %6396 = vmatprep.mubr.msk.bf16.mxu0 %vm699_vm3, %v5758_v56  ;;  %v5484_v56 = vcombine.low %v2418_v8, %v2428_v48 }
 0x169   : > { %6260 = vmatprep.mubr.msk.bf16.mxu1 %vm699_vm3, %v5482_v3 }
 0x16f   : > { %6397 = vmatmul.mubr.msk.bf16.gmra.mrb[24].mxu0 %vm699_vm3, %v5759_v43 }
 0x170   : > { %6261 = vmatmul.mubr.msk.bf16.gmra.mrb[24].mxu1 %vm699_vm3, %v5483_v62  ;;  %6400 = vmatprep.mubr.msk.bf16.mxu0 %vm699_vm3, %v5760_v50 }
 0x171   : > { %6264 = vmatprep.mubr.msk.bf16.mxu1 %vm699_vm3, %v5484_v56 }
 0x177   : > { %6401 = vmatmul.mubr.msk.bf16.gmra.mrb[28].mxu0 %vm699_vm3, %v5761_v29 }
 0x178   : > { %6265 = vmatmul.mubr.msk.bf16.gmra.mrb[28].mxu1 %vm699_vm3, %v5485_v14 }
 0x1f3   : > { %v6204_v63 = vpop.f32.mrb[0].mxu1 }
 0x1f4   : > { %v1862_v4 = vpop.f32.mrb[1].mxu1 }
 0x1f5   : > { %v6205_v43 = vpop.f32.mrb[2].mxu1 }
 0x1f6   : > { %v1865_v16 = vpop.f32.mrb[3].mxu1 }
 0x1fb   : > { %v6208_v58 = vpop.f32.mrb[4].mxu1 }
 0x1fc   : > { %v1878_v50 = vpop.f32.mrb[5].mxu1 }
 0x1fd   : > { %v6209_v54 = vpop.f32.mrb[6].mxu1 }
 0x1fe   : > { %v1881_v18 = vpop.f32.mrb[7].mxu1 }
 0x203   : > { %v6212_v11 = vpop.f32.mrb[8].mxu1 }
 0x204   : > { %v1894_v32 = vpop.f32.mrb[9].mxu1 }
 0x205   : > { %v6213_v24 = vpop.f32.mrb[10].mxu1 }
 0x206   : > { %v1897_v19 = vpop.f32.mrb[11].mxu1 }
 0x20b   : > { %v6216_v41 = vpop.f32.mrb[12].mxu1 }
 0x20c   : > { %v1910_v52 = vpop.f32.mrb[13].mxu1 }
 0x20d   : > { %v6217_v5 = vpop.f32.mrb[14].mxu1 }
 0x20e   : > { %v1913_v55 = vpop.f32.mrb[15].mxu1 }
 0x212   : > { %v6374_v29 = vpop.f32.mrb[0].mxu0 }
 0x213   : > { %v8738_v2 = vadd.f32 %v6374_v29, %v6204_v63  ;;  %v4613_v39 = vpop.f32.mrb[1].mxu0 }
 0x214   : > { %v8741_v0 = vadd.f32 %v4613_v39, %v1862_v4  ;;  %v6375_v36 = vpop.f32.mrb[2].mxu0 }
 0x215   : > { %v8743_v10 = vadd.f32 %v6375_v36, %v6205_v43  ;;  %v4616_v59 = vpop.f32.mrb[3].mxu0 }
 0x216   : > { %v8745_v38 = vadd.f32 %v4616_v59, %v1865_v16 }
 0x217   : > { %v5858_v37 = vpack.c.bf16 %v8743_v10, %v8738_v2 }
 0x218   : > { %v5853_v26 = vpack.c.bf16 %v8745_v38, %v8741_v0  ;;  %v4932_v35 = vadd.f32 %v8745_v38, %v8741_v0 }
 0x219   : > { %5930 = vst [vmem:[%s8753_s14 + $0x8] sm:$0xff] %v5858_v37  }
 0x21a   : > { %5854 = vst [vmem:[%s8753_s14] sm:$0xff] %v5853_v26   ;;  %v4933_v34 = vadd.f32 %v8738_v2, %v4932_v35  ;;  %v6378_v6 = vpop.f32.mrb[4].mxu0 }
 0x21b   : > { %v8758_v49 = vadd.f32 %v6378_v6, %v6208_v58  ;;  %v4629_v23 = vpop.f32.mrb[5].mxu0 }
 0x21c   : > { %v8760_v25 = vadd.f32 %v4629_v23, %v1878_v50  ;;  %v4934_v1 = vadd.f32 %v8743_v10, %v4933_v34  ;;  %v6379_v7 = vpop.f32.mrb[6].mxu0 }
 0x21d   : > { %v8763_v61 = vadd.f32 %v6379_v7, %v6209_v54  ;;  %v4632_v22 = vpop.f32.mrb[7].mxu0 }
 0x21e   : > { %v4935_v44 = vadd.f32 %v8760_v25, %v4934_v1  ;;  %v8766_v3 = vadd.f32 %v4632_v22, %v1881_v18 }
 0x21f   : > { %v5868_v51 = vpack.c.bf16 %v8763_v61, %v8758_v49 }
 0x220   : > { %v5863_v28 = vpack.c.bf16 %v8766_v3, %v8760_v25  ;;  %v4936_v45 = vadd.f32 %v8766_v3, %v4935_v44 }
 0x221   : > { %5932 = vst [vmem:[%s8753_s14 + $0x18] sm:$0xff] %v5868_v51  }
 0x222   : > { %5931 = vst [vmem:[%s8753_s14 + $0x10] sm:$0xff] %v5863_v28   ;;  %v4937_v27 = vadd.f32 %v8758_v49, %v4936_v45  ;;  %v6382_v53 = vpop.f32.mrb[8].mxu0 }
 0x223   : > { %v8776_v21 = vadd.f32 %v6382_v53, %v6212_v11  ;;  %v4645_v47 = vpop.f32.mrb[9].mxu0 }
 0x224   : > { %v8778_v46 = vadd.f32 %v4645_v47, %v1894_v32  ;;  %v4938_v15 = vadd.f32 %v8763_v61, %v4937_v27  ;;  %v6383_v60 = vpop.f32.mrb[10].mxu0 }
 0x225   : > { %v8781_v20 = vadd.f32 %v6383_v60, %v6213_v24  ;;  %v4648_v42 = vpop.f32.mrb[11].mxu0 }
 0x226   : > { %v4939_v33 = vadd.f32 %v8778_v46, %v4938_v15  ;;  %v8784_v12 = vadd.f32 %v4648_v42, %v1897_v19 }
 0x227   : > { %v5878_v31 = vpack.c.bf16 %v8781_v20, %v8776_v21 }
 0x228   : > { %v5873_v57 = vpack.c.bf16 %v8784_v12, %v8778_v46  ;;  %v4940_v8 = vadd.f32 %v8784_v12, %v4939_v33 }
 0x229   : > { %5934 = vst [vmem:[%s8753_s14 + $0x28] sm:$0xff] %v5878_v31  }
 0x22a   : > { %5933 = vst [vmem:[%s8753_s14 + $0x20] sm:$0xff] %v5873_v57   ;;  %v4941_v48 = vadd.f32 %v8776_v21, %v4940_v8  ;;  %v6386_v62 = vpop.f32.mrb[12].mxu0 }
 0x22b   : > { %v8794_v56 = vadd.f32 %v6386_v62, %v6216_v41  ;;  %v4661_v40 = vpop.f32.mrb[13].mxu0 }
 0x22c   : > { %v8796_v13 = vadd.f32 %v4661_v40, %v1910_v52  ;;  %v4942_v17 = vadd.f32 %v8781_v20, %v4941_v48  ;;  %v6387_v30 = vpop.f32.mrb[14].mxu0 }
 0x22d   : > { %v8799_v9 = vadd.f32 %v6387_v30, %v6217_v5  ;;  %v4664_v14 = vpop.f32.mrb[15].mxu0 }
 0x22e   : > { %v4943_v63 = vadd.f32 %v8796_v13, %v4942_v17  ;;  %v8802_v4 = vadd.f32 %v4664_v14, %v1913_v55 }
 0x22f   : > { %v5888_v43 = vpack.c.bf16 %v8799_v9, %v8794_v56 }
 0x230   : > { %v5883_v16 = vpack.c.bf16 %v8802_v4, %v8796_v13  ;;  %v4944_v58 = vadd.f32 %v8802_v4, %v4943_v63 }
 0x231   : > { %5936 = vst [vmem:[%s8753_s14 + $0x38] sm:$0xff] %v5888_v43  }
 0x232   : > { %5935 = vst [vmem:[%s8753_s14 + $0x30] sm:$0xff] %v5883_v16   ;;  %v4945_v50 = vadd.f32 %v8794_v56, %v4944_v58  ;;  %v6390_v54 = vpop.f32.mrb[16].mxu0 }
 0x233   : > { %v6254_v18 = vpop.f32.mrb[16].mxu1  ;;  %v4677_v11 = vpop.f32.mrb[17].mxu0 }
 0x234   : > { %v8812_v32 = vadd.f32 %v6390_v54, %v6254_v18  ;;  %v2652_v24 = vpop.f32.mrb[17].mxu1  ;;  %v4946_v19 = vadd.f32 %v8799_v9, %v4945_v50  ;;  %v6391_v41 = vpop.f32.mrb[18].mxu0 }
 0x235   : > { %v8815_v52 = vadd.f32 %v4677_v11, %v2652_v24  ;;  %v6255_v5 = vpop.f32.mrb[18].mxu1  ;;  %v4680_v55 = vpop.f32.mrb[19].mxu0 }
 0x236   : > { %v8817_v29 = vadd.f32 %v6391_v41, %v6255_v5  ;;  %v2655_v39 = vpop.f32.mrb[19].mxu1 }
 0x237   : > { %v4947_v36 = vadd.f32 %v8815_v52, %v4946_v19  ;;  %v8820_v59 = vadd.f32 %v4680_v55, %v2655_v39 }
 0x238   : > { %v5898_v37 = vpack.c.bf16 %v8817_v29, %v8812_v32 }
 0x239   : > { %v5893_v26 = vpack.c.bf16 %v8820_v59, %v8815_v52  ;;  %v4948_v35 = vadd.f32 %v8820_v59, %v4947_v36 }
 0x23a   : > { %5938 = vst [vmem:[%s8753_s14 + $0x48] sm:$0xff] %v5898_v37   ;;  %v6394_v34 = vpop.f32.mrb[20].mxu0 }
 0x23b   : > { %5937 = vst [vmem:[%s8753_s14 + $0x40] sm:$0xff] %v5893_v26   ;;  %v4949_v6 = vadd.f32 %v8812_v32, %v4948_v35  ;;  %v6258_v23 = vpop.f32.mrb[20].mxu1  ;;  %v4693_v1 = vpop.f32.mrb[21].mxu0 }
 0x23c   : > { %v8830_v7 = vadd.f32 %v6394_v34, %v6258_v23  ;;  %v2668_v22 = vpop.f32.mrb[21].mxu1  ;;  %v6395_v44 = vpop.f32.mrb[22].mxu0 }
 0x23d   : > { %v8832_v51 = vadd.f32 %v4693_v1, %v2668_v22  ;;  %v4950_v28 = vadd.f32 %v8817_v29, %v4949_v6  ;;  %v6259_v45 = vpop.f32.mrb[22].mxu1  ;;  %v4696_v27 = vpop.f32.mrb[23].mxu0 }
 0x23e   : > { %v8835_v53 = vadd.f32 %v6395_v44, %v6259_v45  ;;  %v2671_v47 = vpop.f32.mrb[23].mxu1 }
 0x23f   : > { %v4951_v15 = vadd.f32 %v8832_v51, %v4950_v28  ;;  %v8838_v60 = vadd.f32 %v4696_v27, %v2671_v47 }
 0x240   : > { %v5908_v42 = vpack.c.bf16 %v8835_v53, %v8830_v7 }
 0x241   : > { %v5903_v33 = vpack.c.bf16 %v8838_v60, %v8832_v51  ;;  %v4952_v31 = vadd.f32 %v8838_v60, %v4951_v15 }
 0x242   : > { %5940 = vst [vmem:[%s8753_s14 + $0x58] sm:$0xff] %v5908_v42   ;;  %v6398_v57 = vpop.f32.mrb[24].mxu0 }
 0x243   : > { %5939 = vst [vmem:[%s8753_s14 + $0x50] sm:$0xff] %v5903_v33   ;;  %v4953_v8 = vadd.f32 %v8830_v7, %v4952_v31  ;;  %v6262_v48 = vpop.f32.mrb[24].mxu1  ;;  %v4709_v62 = vpop.f32.mrb[25].mxu0 }
 0x244   : > { %v8848_v40 = vadd.f32 %v6398_v57, %v6262_v48  ;;  %v2684_v17 = vpop.f32.mrb[25].mxu1  ;;  %v6399_v30 = vpop.f32.mrb[26].mxu0 }
 0x245   : > { %v8850_v14 = vadd.f32 %v4709_v62, %v2684_v17  ;;  %v4954_v63 = vadd.f32 %v8835_v53, %v4953_v8  ;;  %v6263_v43 = vpop.f32.mrb[26].mxu1  ;;  %v4712_v16 = vpop.f32.mrb[27].mxu0 }
 0x246   : > { %v8853_v58 = vadd.f32 %v6399_v30, %v6263_v43  ;;  %v2687_v50 = vpop.f32.mrb[27].mxu1 }
 0x247   : > { %v4955_v54 = vadd.f32 %v8850_v14, %v4954_v63  ;;  %v8856_v18 = vadd.f32 %v4712_v16, %v2687_v50 }
 0x248   : > { %v5918_v11 = vpack.c.bf16 %v8853_v58, %v8848_v40 }
 0x249   : > { %v5913_v24 = vpack.c.bf16 %v8856_v18, %v8850_v14  ;;  %v4956_v19 = vadd.f32 %v8856_v18, %v4955_v54 }
 0x24a   : > { %5942 = vst [vmem:[%s8753_s14 + $0x68] sm:$0xff] %v5918_v11   ;;  %v6402_v41 = vpop.f32.mrb[28].mxu0 }
 0x24b   : > { %5941 = vst [vmem:[%s8753_s14 + $0x60] sm:$0xff] %v5913_v24   ;;  %v4957_v5 = vadd.f32 %v8848_v40, %v4956_v19  ;;  %v6266_v55 = vpop.f32.mrb[28].mxu1  ;;  %v4725_v39 = vpop.f32.mrb[29].mxu0 }
 0x24c   : > { %v8866_v36 = vadd.f32 %v6402_v41, %v6266_v55  ;;  %v2700_v37 = vpop.f32.mrb[29].mxu1  ;;  %v6403_v26 = vpop.f32.mrb[30].mxu0 }
 0x24d   : > { %v8868_v35 = vadd.f32 %v4725_v39, %v2700_v37  ;;  %v4958_v34 = vadd.f32 %v8853_v58, %v4957_v5  ;;  %v6267_v6 = vpop.f32.mrb[30].mxu1  ;;  %v4728_v23 = vpop.f32.mrb[31].mxu0 }
 0x24e   : > { %v8873_v1 = vadd.f32 %v6403_v26, %v6267_v6  ;;  %v2703_v22 = vpop.f32.mrb[31].mxu1 }
 0x24f   : > { %v4959_v44 = vadd.f32 %v8868_v35, %v4958_v34  ;;  %v8876_v28 = vadd.f32 %v4728_v23, %v2703_v22 }
 0x250   : > { %v5928_v45 = vpack.c.bf16 %v8873_v1, %v8866_v36 }
 0x251   : > { %v5923_v27 = vpack.c.bf16 %v8876_v28, %v8868_v35  ;;  %v4960_v47 = vadd.f32 %v8876_v28, %v4959_v44 }
 0x252   : > { %5944 = vst [vmem:[%s8753_s14 + $0x78] sm:$0xff] %v5928_v45  }
 0x253   : > { %5943 = vst [vmem:[%s8753_s14 + $0x70] sm:$0xff] %v5923_v27   ;;  %v4961_v15 = vadd.f32 %v8866_v36, %v4960_v47 }
 0x254   : > { %6842 = shalt.err (!%p6839_p3)
}
 0x255   : > { %s6843_s9 = scalar_lea.hbm %s8883_s29, 2048  ;;  %s6847_s13 = scalar_lea.hbm %s9099_s2, 4096 }
 0x256   : > { %p6844_p4 = scmp.ne.s32.totalorder %s8883_s29, %s6843_s9  ;;  %p6848_p9 = scmp.lt.u32.totalorder %s8883_s29, %s9099_s2 }
 0x257   : > { %p6849_p10 = scmp.lt.u32.totalorder %s6847_s13, %s6843_s9  ;;  %p6851_p12 = scmp.lt.u32.totalorder %s6843_s9, %s8883_s29 }
 0x258   : > { %p6845_p7 = pnand %p6844_p4, %p7023_p5 }
 0x259   : > { %p6850_p11 = por %p6849_p10, %p6848_p9 }
 0x25a   : > { %p6846_p8 = pneg %p6845_p7 }
 0x25b   : > { %p6852_p13 = por %p6851_p12, %p6850_p11 }
 0x25d   : > { %p6853_p0 = pnand %p6852_p13, %p6846_p8 }
 0x25f   : > { %6856 = shalt.err (!%p6853_p0)
}
 0x260   : > { %s6954_s27 = smov 64   ;;  %s6955_s28 = smov 4   ;;  %v4962_v42 = vadd.f32 %v8873_v1, %v4961_v15 }
 0x261   : > { %6673 = dma.vmem_to_hbm [thread:$0]  (%p7023_p5), %s8885_s23, 2048, %s8883_s29, %s5074_s30, %s6954_s27, %s6954_s27, %s6955_s28  }
 0x262   : > { %v4963_v33 = vrot.slane %v4962_v42, 4  ;;  %s5078_s5 = sand.u32 1, %s7004_s19   ;;  %s5813_s6 = sshll.u32 %s7004_s19, 4 }
 0x263   : > { %s200_s7 = scalar_lea.vmem [#allocation4], %s8736_s12  ;;  %s8926_s11 = scalar_lea.hbm %s9100_s3, %s5813_s6 }
 0x264   : > { %v4964_v31 = vadd.f32 %v4963_v33, %v4962_v42  ;;  %s5111_s8 = sshll.u32 %s200_s7, 4  ;;  %s8932_s23 = scalar_lea.sflag [#allocation5], %s5078_s5  ;;  %s8928_s8 = int_to_ptr.vmem [resolvable:$true] %s5111_s8 }
 0x265   : > { %s6857_s29 = scalar_lea.vmem %s8928_s8, 16  ;;  %s6956_s30 = smov [#allocation4]  }
 0x266   : > { %v4965_v57 = vrot.slane %v4964_v31, 2  ;;  %p6858_p1 = scmp.ne.s32.totalorder %s8928_s8, %s6857_s29  ;;  %s6861_s13 = sshll.u32 %s6956_s30, 4  ;;  %s6862_s13 = int_to_ptr.vmem [resolvable:$false] %s6861_s13 }
 0x267   : > { %s6863_s14 = scalar_lea.vmem %s6862_s13, 32  ;;  %p6864_p4 = scmp.lt.s32.totalorder %s8928_s8, %s6862_s13 }
 0x268   : > { %v4966_v8 = vadd.f32 %v4965_v57, %v4964_v31  ;;  %p6859_p2 = pnand %p6858_p1, %p7023_p5  ;;  %p6865_p7 = scmp.lt.s32.totalorder %s6863_s14, %s6857_s29 }
 0x26a   : > { %v4967_v48 = vrot.slane %v4966_v8, 1  ;;  %p6860_p3 = pneg %p6859_p2  ;;  %p6866_p8 = por %p6865_p7, %p6864_p4 }
 0x26c   : > { %v4968_v62 = vadd.f32 %v4967_v48, %v4966_v8  ;;  %p6867_p9 = pnand %p6866_p8, %p6860_p3 }
 0x26e   : > { %v8930_v17 = vmul.f32 0.00390625, %v4968_v62  ;;  %5002 = vst [vmem:[%s200_s7] sm:$0x1] %v4968_v62 }
 0x26f   : > { %6870 = shalt.err (!%p6867_p9)
}
 0x270   : > { %s6871_s22 = scalar_lea.hbm %s8926_s11, 16  ;;  %s6875_s5 = scalar_lea.hbm %s9100_s3, 32 }
 0x271   : > { %p6872_p10 = scmp.ne.s32.totalorder %s8926_s11, %s6871_s22  ;;  %p6876_p13 = scmp.lt.u32.totalorder %s8926_s11, %s9100_s3 }
 0x272   : > { %p6877_p0 = scmp.lt.u32.totalorder %s6875_s5, %s6871_s22  ;;  %p6879_p2 = scmp.lt.u32.totalorder %s6871_s22, %s8926_s11 }
 0x273   : > { %p6873_p11 = pnand %p6872_p10, %p7023_p5 }
 0x274   : > { %p6878_p1 = por %p6877_p0, %p6876_p13 }
 0x275   : > { %p6874_p12 = pneg %p6873_p11 }
 0x276   : > { %p6880_p3 = por %p6879_p2, %p6878_p1 }
 0x278   : > { %p6881_p4 = pnand %p6880_p3, %p6874_p12 }
 0x27a   : > { %6884 = shalt.err (!%p6881_p4)
}
 0x27b   : > { %6674 = dma.vmem_to_hbm [thread:$0]  (%p7023_p5), %s8928_s8, 16, %s8926_s11, %s8932_s23   ;;  %v4979_v30 = vsub.f32 %v8784_v12, %v8930_v17  ;;  %v4980_v63 = vsub.f32 %v8776_v21, %v8930_v17  ;;  %v4981_v43 = vsub.f32 %v8781_v20, %v8930_v17  ;;  %v4982_v16 = vsub.f32 %v8796_v13, %v8930_v17 }
 0x27c   : > { %v4983_v50 = vsub.f32 %v8802_v4, %v8930_v17  ;;  %v4984_v54 = vsub.f32 %v8794_v56, %v8930_v17  ;;  %v4985_v11 = vsub.f32 %v8799_v9, %v8930_v17  ;;  %v4986_v12 = vsub.f32 %v8815_v52, %v8930_v17  ;;  %s206_s8 = scalar_lea.vmem [#allocation6], %s8736_s12  ;;  %s9058_s30 = scalar_lea.hbm %s9101_s4, %s5813_s6 }
 0x27d   : > { %v4987_v21 = vsub.f32 %v8820_v59, %v8930_v17  ;;  %v4988_v20 = vsub.f32 %v8812_v32, %v8930_v17  ;;  %v4989_v13 = vsub.f32 %v8817_v29, %v8930_v17  ;;  %v4990_v4 = vsub.f32 %v8832_v51, %v8930_v17  ;;  %s5124_s10 = sshll.u32 %s206_s8, 4  ;;  %s6957_s14 = smov [#allocation6]   ;;  %s5125_s10 = int_to_ptr.vmem [resolvable:$true] %s5124_s10 }
 0x27e   : > { %v4991_v56 = vsub.f32 %v8838_v60, %v8930_v17  ;;  %v4992_v9 = vsub.f32 %v8830_v7, %v8930_v17  ;;  %v4993_v52 = vsub.f32 %v8835_v53, %v8930_v17  ;;  %v8988_v59 = vsub.f32 %v8850_v14, %v8930_v17  ;;  %s6885_s13 = scalar_lea.vmem %s5125_s10, 16  ;;  %s6889_s22 = sshll.u32 %s6957_s14, 4  ;;  %s6890_s22 = int_to_ptr.vmem [resolvable:$false] %s6889_s22 }
 0x27f   : > { %v8992_v32 = vsub.f32 %v8856_v18, %v8930_v17  ;;  %v8996_v29 = vsub.f32 %v8848_v40, %v8930_v17  ;;  %v9000_v51 = vsub.f32 %v8853_v58, %v8930_v17  ;;  %v9004_v7 = vsub.f32 %v8868_v35, %v8930_v17  ;;  %p6886_p7 = scmp.ne.s32.totalorder %s5125_s10, %s6885_s13  ;;  %s6891_s12 = scalar_lea.vmem %s6890_s22, 32 }
 0x280   : > { %v9008_v53 = vsub.f32 %v8876_v28, %v8930_v17  ;;  %v9012_v60 = vsub.f32 %v8866_v36, %v8930_v17  ;;  %v9016_v40 = vsub.f32 %v8873_v1, %v8930_v17  ;;  %v4970_v14 = vsub.f32 %v8741_v0, %v8930_v17  ;;  %p6892_p10 = scmp.lt.s32.totalorder %s5125_s10, %s6890_s22  ;;  %p6893_p11 = scmp.lt.s32.totalorder %s6891_s12, %s6885_s13 }
 0x281   : > { %v4971_v58 = vsub.f32 %v8745_v38, %v8930_v17  ;;  %v4972_v18 = vsub.f32 %v8738_v2, %v8930_v17  ;;  %v4973_v41 = vsub.f32 %v8743_v10, %v8930_v17  ;;  %v4974_v5 = vsub.f32 %v8760_v25, %v8930_v17  ;;  %p6887_p8 = pnand %p6886_p7, %p7023_p5 }
 0x282   : > { %v5003_v24 = vmul.f32 %v4970_v14, %v4970_v14  ;;  %v4975_v36 = vsub.f32 %v8766_v3, %v8930_v17  ;;  %v4976_v38 = vsub.f32 %v8758_v49, %v8930_v17  ;;  %v4977_v35 = vsub.f32 %v8763_v61, %v8930_v17  ;;  %p6894_p12 = por %p6893_p11, %p6892_p10 }
 0x283   : > { %v5004_v19 = vmul.f32 %v4971_v58, %v4971_v58  ;;  %v5005_v55 = vmul.f32 %v4972_v18, %v4972_v18  ;;  %v5006_v0 = vmul.f32 %v4973_v41, %v4973_v41  ;;  %v5007_v26 = vmul.f32 %v4974_v5, %v4974_v5  ;;  %p6888_p9 = pneg %p6887_p8 }
 0x284   : > { %v5008_v34 = vmul.f32 %v4975_v36, %v4975_v36  ;;  %v4978_v25 = vsub.f32 %v8778_v46, %v8930_v17  ;;  %v5009_v6 = vmul.f32 %v4976_v38, %v4976_v38  ;;  %v5010_v1 = vmul.f32 %v4977_v35, %v4977_v35 }
 0x285   : > { %v5035_v39 = vadd.f32 %v5004_v19, %v5003_v24  ;;  %v5012_v28 = vmul.f32 %v4979_v30, %v4979_v30  ;;  %v5013_v27 = vmul.f32 %v4980_v63, %v4980_v63  ;;  %v5014_v47 = vmul.f32 %v4981_v43, %v4981_v43  ;;  %p6895_p13 = pnand %p6894_p12, %p6888_p9 }
 0x286   : > { %v5011_v3 = vmul.f32 %v4978_v25, %v4978_v25  ;;  %v5015_v42 = vmul.f32 %v4982_v16, %v4982_v16  ;;  %v5016_v61 = vmul.f32 %v4983_v50, %v4983_v50  ;;  %v5017_v57 = vmul.f32 %v4984_v54, %v4984_v54 }
 0x287   : > { %v5036_v37 = vadd.f32 %v5035_v39, %v5005_v55  ;;  %v5018_v48 = vmul.f32 %v4985_v11, %v4985_v11  ;;  %v5019_v62 = vmul.f32 %v4986_v12, %v4986_v12  ;;  %v5020_v14 = vmul.f32 %v4987_v21, %v4987_v21 }
 0x288   : > { %v5021_v18 = vmul.f32 %v4988_v20, %v4988_v20  ;;  %v5022_v30 = vmul.f32 %v4989_v13, %v4989_v13  ;;  %v5023_v63 = vmul.f32 %v4990_v4, %v4990_v4  ;;  %v5024_v43 = vmul.f32 %v4991_v56, %v4991_v56 }
 0x289   : > { %v5037_v2 = vadd.f32 %v5036_v37, %v5006_v0  ;;  %v5025_v16 = vmul.f32 %v4992_v9, %v4992_v9  ;;  %v5026_v50 = vmul.f32 %v4993_v52, %v4993_v52  ;;  %v5027_v54 = vmul.f32 %v8988_v59, %v8988_v59 }
 0x28a   : > { %v5028_v12 = vmul.f32 %v8992_v32, %v8992_v32  ;;  %v5029_v20 = vmul.f32 %v8996_v29, %v8996_v29  ;;  %v5030_v4 = vmul.f32 %v9000_v51, %v9000_v51  ;;  %v5031_v9 = vmul.f32 %v9004_v7, %v9004_v7 }
 0x28b   : > { %v5038_v10 = vadd.f32 %v5037_v2, %v5007_v26  ;;  %v5032_v59 = vmul.f32 %v9008_v53, %v9008_v53  ;;  %v5033_v32 = vmul.f32 %v9012_v60, %v9012_v60  ;;  %v5034_v29 = vmul.f32 %v9016_v40, %v9016_v40 }
 0x28d   : > { %v5039_v23 = vadd.f32 %v5038_v10, %v5008_v34 }
 0x28f   : > { %v5040_v22 = vadd.f32 %v5039_v23, %v5009_v6 }
 0x291   : > { %v5041_v44 = vadd.f32 %v5040_v22, %v5010_v1 }
 0x293   : > { %v5042_v45 = vadd.f32 %v5041_v44, %v5011_v3 }
 0x295   : > { %v5043_v49 = vadd.f32 %v5042_v45, %v5012_v28 }
 0x297   : > { %v5044_v15 = vadd.f32 %v5043_v49, %v5013_v27 }
 0x299   : > { %v5045_v33 = vadd.f32 %v5044_v15, %v5014_v47 }
 0x29b   : > { %v5046_v31 = vadd.f32 %v5045_v33, %v5015_v42 }
 0x29d   : > { %v5047_v8 = vadd.f32 %v5046_v31, %v5016_v61 }
 0x29f   : > { %v5048_v46 = vadd.f32 %v5047_v8, %v5017_v57 }
 0x2a1   : > { %v5049_v17 = vadd.f32 %v5048_v46, %v5018_v48 }
 0x2a3   : > { %v5050_v58 = vadd.f32 %v5049_v17, %v5019_v62 }
 0x2a5   : > { %v5051_v24 = vadd.f32 %v5050_v58, %v5020_v14 }
 0x2a7   : > { %v5052_v19 = vadd.f32 %v5051_v24, %v5021_v18 }
 0x2a9   : > { %v5053_v41 = vadd.f32 %v5052_v19, %v5022_v30 }
 0x2ab   : > { %v5054_v5 = vadd.f32 %v5053_v41, %v5023_v63 }
 0x2ad   : > { %v5055_v55 = vadd.f32 %v5054_v5, %v5024_v43 }
 0x2af   : > { %v5056_v39 = vadd.f32 %v5055_v55, %v5025_v16 }
 0x2b1   : > { %v5057_v11 = vadd.f32 %v5056_v39, %v5026_v50 }
 0x2b3   : > { %v5058_v21 = vadd.f32 %v5057_v11, %v5027_v54 }
 0x2b5   : > { %v5059_v13 = vadd.f32 %v5058_v21, %v5028_v12 }
 0x2b7   : > { %v5060_v56 = vadd.f32 %v5059_v13, %v5029_v20 }
 0x2b9   : > { %v5061_v52 = vadd.f32 %v5060_v56, %v5030_v4 }
 0x2bb   : > { %v5062_v36 = vadd.f32 %v5061_v52, %v5031_v9 }
 0x2bd   : > { %v5063_v0 = vadd.f32 %v5062_v36, %v5032_v59 }
 0x2bf   : > { %v5064_v37 = vadd.f32 %v5063_v0, %v5033_v32 }
 0x2c1   : > { %v5065_v51 = vadd.f32 %v5064_v37, %v5034_v29 }
 0x2c3   : > { %v5066_v38 = vrot.slane %v5065_v51, 4 }
 0x2c5   : > { %v5067_v26 = vadd.f32 %v5066_v38, %v5065_v51 }
 0x2c7   : > { %v5068_v2 = vrot.slane %v5067_v26, 2 }
 0x2c9   : > { %v5069_v7 = vadd.f32 %v5068_v2, %v5067_v26 }
 0x2cb   : > { %v5070_v35 = vrot.slane %v5069_v7, 1 }
 0x2cd   : > { %v5071_v53 = vadd.f32 %v5070_v35, %v5069_v7 }
 0x2cf   : > { %5072 = vst [vmem:[%s206_s8] sm:$0x1] %v5071_v53 }
 0x2d0   : > { %6898 = shalt.err (!%p6895_p13)
}
 0x2d1   : > { %s6899_s19 = scalar_lea.hbm %s9058_s30, 16  ;;  %s6903_s28 = scalar_lea.hbm %s9101_s4, 32 }
 0x2d2   : > { %p6900_p0 = scmp.ne.s32.totalorder %s9058_s30, %s6899_s19  ;;  %p6904_p3 = scmp.lt.u32.totalorder %s9058_s30, %s9101_s4 }
 0x2d3   : > { %p6905_p4 = scmp.lt.u32.totalorder %s6903_s28, %s6899_s19  ;;  %p6907_p8 = scmp.lt.u32.totalorder %s6899_s19, %s9058_s30 }
 0x2d4   : > { %p6901_p1 = pnand %p6900_p0, %p7023_p5 }
 0x2d5   : > { %p6906_p7 = por %p6905_p4, %p6904_p3 }
 0x2d6   : > { %p6902_p2 = pneg %p6901_p1 }
 0x2d7   : > { %p6908_p9 = por %p6907_p8, %p6906_p7 }
 0x2d9   : > { %p6909_p10 = pnand %p6908_p9, %p6902_p2 }
 0x2db   : > { %6912 = shalt.err (!%p6909_p10)
}
 0x2dc   : > { %6675 = dma.vmem_to_hbm [thread:$0]  (%p7023_p5), %s5125_s10, 16, %s9058_s30, %s8932_s23  }
 0x2dd PF: > { %p6689_p11 = scmp.ge.s32.totalorder %s6951_s18, 2  ;;  %s5136_s9 = sand.u32 1, %s6939_s15  }
 0x2de   : > { %s5137_s8 = scalar_lea.sflag [#allocation3], %s5136_s9 }
 0x2df   : > { %p6680_p12 = pnand %p6689_p11, %p7027_p6 }
 0x2e1   : > { %6930 = dma.done.wait (!%p6680_p12), %s5137_s8, 2048  }
 0x2e2   : > { %6932 = vsyncadd (!%p6680_p12), %s5137_s8, 4294965248  ;;  %s5145_s11 = sand.u32 1, %s5236_s20  }
 0x2e3   : > { %s5146_s29 = scalar_lea.sflag [#allocation5], %s5145_s11 }
 0x2e4   : > { %6934 = dma.done.wait (!%p6680_p12), %s5146_s29, 32  }
 0x2e5   : > { %6936 = vsyncadd (!%p6680_p12), %s5146_s29, 4294967264  ;;  %p18_p5 = scmp.ge.s32.totalorder %s7008_s21, 4   ;;  %s9171_s15 = smov %s6943_s16 }
 0x2e6   : > { %s9172_s16 = smov %s6947_s17  ;;  %s9173_s17 = smov %s7021_s24 }
 0x2e7   : > { %s9174_s18 = smov %s7008_s21  ;;  %20 = sbr.rel (!%p18_p5) target bundleno = 5 (0x5), region = 105 }
 0x2ee   :  { %5158 = vsyncpa [#allocation3], 1 }
 0x2ef   :  { %5160 = vsyncpa [#allocation3 + $0x1], 1 }
 0x2f0   :  { %5161 = vsyncpa [#allocation5], 1 }
 0x2f1   :  { %5163 = vsyncpa [#allocation5 + $0x1], 1 }

</bundles_post_ra>
